<compile_context>
chip_gen: v7x
topology: tpu7x:2x2x1
jax: 0.10.0
libtpu: 0.0.40
codegen_flags: <defaults>
</compile_context>

<pallas_src>
import functools

import numpy as np
import jax
import jax.numpy as jnp
from jax.experimental import pallas as pl
from jax.experimental.pallas import tpu as pltpu


# ----------------------------------------------------------------------------
# Pallas kernels
# ----------------------------------------------------------------------------

def _conv_pool_film_kernel(p_ref, w_ref, scale_ref, shift_ref,
                           emb_ref, wg_ref, bg_ref, wb_ref, bb_ref,
                           o_ref, *, npool, g_rows):
    # Fused: conv3x3(+bias) + BN(eval) + ReLU + MaxPool + FiLM(lin_g/lin_b + affine)
    # p_ref : (1, npool*G, 9*Cin) bf16  im2col patches; rows are grouped by
    #         pooling-window member k, so max-pool == element-wise max of the
    #         npool consecutive chunks of G rows (no reshapes in-kernel).
    # w_ref : (9*Cin, C) bf16 ; scale/shift : (1, C) f32 (conv-bias + BN folded)
    # emb_ref : (1, 1, 128) f32  FiLM embedding mean for this batch element
    # wg/wb : (128, C) bf16 ; bg/bb : (1, C) f32
    # o_ref : (1, G, C) f32
    y = jnp.dot(p_ref[0], w_ref[...], preferred_element_type=jnp.float32)
    y = jnp.maximum(y * scale_ref[...] + shift_ref[...], 0.0)     # (npool*G, C)

    pooled = y[0:g_rows]
    for k in range(1, npool):                                     # static unroll
        pooled = jnp.maximum(pooled, y[k * g_rows:(k + 1) * g_rows])

    e = emb_ref[0].astype(jnp.bfloat16)                           # (1, 128)
    gamma = jnp.maximum(
        jnp.dot(e, wg_ref[...], preferred_element_type=jnp.float32) + bg_ref[...], 0.0)
    beta = jnp.maximum(
        jnp.dot(e, wb_ref[...], preferred_element_type=jnp.float32) + bb_ref[...], 0.0)
    o_ref[0] = pooled * gamma + beta


def _bigru_kernel(xf_ref, xb_ref,
                  wih_f, whh_f, bih_f, bhh_f,
                  wih_b, whh_b, bih_b, bhh_b,
                  of_ref, ob_ref, hf_ref, hb_ref, *, hidden):
    # One bidirectional GRU layer.  grid=(T,) runs sequentially ("arbitrary");
    # hf/hb are the VMEM hidden-state carries.  The backward direction reads x
    # and writes its output through reversed index_maps, so no flips are needed.
    t = pl.program_id(0)

    @pl.when(t == 0)
    def _():
        hf_ref[...] = jnp.zeros_like(hf_ref)
        hb_ref[...] = jnp.zeros_like(hb_ref)

    def step(x_t, h, wih, whh, bih, bhh):
        # Fused gates: 2 matmuls per direction per step (was 6).
        gi = jnp.dot(x_t.astype(jnp.bfloat16), wih[...],
                     preferred_element_type=jnp.float32) + bih[...]     # (B, 3H)
        gh = jnp.dot(h.astype(jnp.bfloat16), whh[...],
                     preferred_element_type=jnp.float32) + bhh[...]     # (B, 3H)
        H = hidden
        r = jax.nn.sigmoid(gi[:, :H] + gh[:, :H])
        z = jax.nn.sigmoid(gi[:, H:2 * H] + gh[:, H:2 * H])
        n = jnp.tanh(gi[:, 2 * H:] + r * gh[:, 2 * H:])
        return (1.0 - z) * n + z * h

    hf = step(xf_ref[0], hf_ref[...], wih_f, whh_f, bih_f, bhh_f)
    hf_ref[...] = hf
    of_ref[0] = hf

    hb = step(xb_ref[0], hb_ref[...], wih_b, whh_b, bih_b, bhh_b)
    hb_ref[...] = hb
    ob_ref[0] = hb


def _attn_fnn_kernel(x_ref, wqkv_ref, bqkv_ref, wo_ref, bo_ref, wf_ref, bf_ref,
                     o_ref, *, n_heads, head_dim, hid_dim):
    # Fused: single QKV projection, per-head attention, output projection
    # (issued as per-head partial matmuls summed -> identical to projecting the
    # concatenated context once), tanh, folded FNN head, tanh.
    # x_ref : (1, T, D) f32 ; wqkv : (D, 3D) bf16 ; bqkv : (1, 3D) f32
    # wo    : (nh, hd, D) bf16 ; bo : (1, D) f32
    # wf    : (D, out) bf16 ; bf : (1, out) f32
    x = x_ref[0]                                                   # (T, D)
    qkv = jnp.dot(x.astype(jnp.bfloat16), wqkv_ref[...],
                  preferred_element_type=jnp.float32) + bqkv_ref[...]
    D = hid_dim
    q, k, v = qkv[:, :D], qkv[:, D:2 * D], qkv[:, 2 * D:3 * D]
    inv_sqrt_d = 1.0 / float(np.sqrt(head_dim))

    acc = jnp.zeros(x.shape, jnp.float32)
    for h in range(n_heads):                                       # static loop
        s, e = h * head_dim, (h + 1) * head_dim
        scores = jax.lax.dot_general(
            q[:, s:e], k[:, s:e], (((1,), (1,)), ((), ())),
            preferred_element_type=jnp.float32) * inv_sqrt_d       # (T, T)
        attn = jax.nn.softmax(scores, axis=-1)
        ctx = jnp.dot(attn, v[:, s:e], preferred_element_type=jnp.float32)
        acc = acc + jnp.dot(ctx.astype(jnp.bfloat16), wo_ref[h],
                            preferred_element_type=jnp.float32)
    xa = jnp.tanh(acc + bo_ref[...])
    doa = jnp.tanh(jnp.dot(xa.astype(jnp.bfloat16), wf_ref[...],
                           preferred_element_type=jnp.float32) + bf_ref[...])
    o_ref[0] = doa


# ----------------------------------------------------------------------------
# BlockSpec helpers + pallas_call wrappers
# ----------------------------------------------------------------------------

def _full_spec(shape):
    nd = len(shape)
    return pl.BlockSpec(tuple(shape), lambda *_, nd=nd: (0,) * nd)


def _batched_spec(shape):
    nd = len(shape)
    return pl.BlockSpec((1,) + tuple(shape[1:]),
                        lambda b, nd=nd: (b,) + (0,) * (nd - 1))


def _pool_ordered_patches(x, tp, fp):
    # x: (B, H, W, C) -> (B, tp*fp*Hp*Wp, 9*C) bf16.  Rows are grouped by
    # pooling-window member so the kernel max-pools with chunk-wise maxima.
    B, H, W, C = x.shape
    Hp, Wp = H // tp, W // fp
    xp = jnp.pad(x, ((0, 0), (1, 1), (1, 1), (0, 0)))
    cols = jnp.concatenate([xp[:, dh:dh + H, dw:dw + W, :]
                            for dh in range(3) for dw in range(3)], axis=-1)
    cols = cols[:, :Hp * tp, :Wp * fp, :]                 # floor-crop like MaxPool2d
    cols = cols.reshape(B, Hp, tp, Wp, fp, 9 * C)
    cols = jnp.transpose(cols, (0, 2, 4, 1, 3, 5))        # (B, tp, fp, Hp, Wp, 9C)
    return cols.reshape(B, tp * fp * Hp * Wp, 9 * C).astype(jnp.bfloat16)


def conv_pool_film_block(x, blk, fl, emb, tp, fp):
    # x: (B, H, W, Cin) f32 -> (B, Hp, Wp, C) f32, fused conv+BN+ReLU+pool+FiLM.
    B, H, W, _ = x.shape
    Hp, Wp = H // tp, W // fp
    G, npool = Hp * Wp, tp * fp
    C = blk["scale"].shape[1]
    patches = _pool_ordered_patches(x, tp, fp)
    kern = functools.partial(_conv_pool_film_kernel, npool=npool, g_rows=G)
    out = pl.pallas_call(
        kern,
        out_shape=jax.ShapeDtypeStruct((B, G, C), jnp.float32),
        grid=(B,),
        in_specs=[_batched_spec(patches.shape),
                  _full_spec(blk["w"].shape),
                  _full_spec(blk["scale"].shape),
                  _full_spec(blk["shift"].shape),
                  _batched_spec(emb.shape),
                  _full_spec(fl["wg_t"].shape), _full_spec(fl["bg"].shape),
                  _full_spec(fl["wb_t"].shape), _full_spec(fl["bb"].shape)],
        out_specs=_batched_spec((B, G, C)),
        compiler_params=pltpu.CompilerParams(dimension_semantics=("parallel",)),
    )(patches, blk["w"], blk["scale"], blk["shift"], emb,
      fl["wg_t"], fl["bg"], fl["wb_t"], fl["bb"])
    return out.reshape(B, Hp, Wp, C)


def bigru_layer(x_tm, layer):
    # x_tm: (T, B, In) f32 time-major.  Both directions in a single pallas_call.
    T, B, In = x_tm.shape
    H = layer["fwd"]["whh"].shape[0]
    names = ("wih", "whh", "bih", "bhh")
    weight_args = [layer["fwd"][k] for k in names] + [layer["bwd"][k] for k in names]
    of, ob = pl.pallas_call(
        functools.partial(_bigru_kernel, hidden=H),
        out_shape=(jax.ShapeDtypeStruct((T, B, H), jnp.float32),
                   jax.ShapeDtypeStruct((T, B, H), jnp.float32)),
        grid=(T,),
        in_specs=[pl.BlockSpec((1, B, In), lambda t: (t, 0, 0)),
                  pl.BlockSpec((1, B, In), lambda t, T=T: (T - 1 - t, 0, 0))]
                 + [_full_spec(w.shape) for w in weight_args],
        out_specs=(pl.BlockSpec((1, B, H), lambda t: (t, 0, 0)),
                   pl.BlockSpec((1, B, H), lambda t, T=T: (T - 1 - t, 0, 0))),
        scratch_shapes=[pltpu.VMEM((B, H), jnp.float32),
                        pltpu.VMEM((B, H), jnp.float32)],
        # must stay sequential: the hidden state carries across the T axis
        compiler_params=pltpu.CompilerParams(dimension_semantics=("arbitrary",)),
    )(x_tm, x_tm, *weight_args)
    return of, ob


def attn_fnn(x, a, n_heads):
    # x: (B, T, D) f32 -> (B, T, out_dim) f32 (MHA + tanh + folded FNN + tanh).
    B, T, D = x.shape
    out_dim = a["wf_t"].shape[1]
    kern = functools.partial(_attn_fnn_kernel, n_heads=n_heads,
                             head_dim=D // n_heads, hid_dim=D)
    arrays = (a["wqkv_t"], a["bqkv"], a["wo_h"], a["bo"], a["wf_t"], a["bf"])
    return pl.pallas_call(
        kern,
        out_shape=jax.ShapeDtypeStruct((B, T, out_dim), jnp.float32),
        grid=(B,),
        in_specs=[_batched_spec(x.shape)] + [_full_spec(w.shape) for w in arrays],
        out_specs=_batched_spec((B, T, out_dim)),
        compiler_params=pltpu.CompilerParams(dimension_semantics=("parallel",)),
    )(x, *arrays)


# ----------------------------------------------------------------------------
# Parameter construction + forward orchestration
# ----------------------------------------------------------------------------

def _init_linear(key, in_dim, out_dim, scale=0.1):
    k1, k2 = jax.random.split(key)
    w = jax.random.normal(k1, (out_dim, in_dim), jnp.float32) * scale  # torch layout
    b = jax.random.normal(k2, (out_dim,), jnp.float32) * scale
    return w, b


def build_params(key, in_feat_shape, out_dim, P):
    _, cin0, _, F0 = in_feat_shape
    C = P["nb_cnn2d_filt"]
    H = P["rnn_size"]
    nh = P["nb_heads"]
    hd = H // nh
    assert H % nh == 0
    # FiLM gamma (width num_categories) is broadcast over the channel axis:
    assert P["num_categories"] == C, "FiLM gamma width must equal nb_cnn2d_filt"

    bf16 = jnp.bfloat16
    keys = iter(jax.random.split(key, 64))
    prm = {}
    cfg = {"t_pool": tuple(P["t_pool_size"]), "f_pool": tuple(P["f_pool_size"]),
           "n_heads": nh}

    # ConvBlock = Conv2d(3x3, pad=1, bias) + BatchNorm2d(eval) + ReLU,
    # then MaxPool2d + Dropout2d(eval=id) + FiLM  (all fused in one kernel).
    conv_blocks, cin = [], cin0
    for _ in range(len(P["f_pool_size"])):
        w = jax.random.normal(next(keys), (C, cin, 3, 3), jnp.float32) * 0.1
        b = jax.random.normal(next(keys), (C,), jnp.float32) * 0.1
        bn_g = 1.0 + 0.1 * jax.random.normal(next(keys), (C,), jnp.float32)
        bn_b = 0.1 * jax.random.normal(next(keys), (C,), jnp.float32)
        bn_mean, bn_var, eps = jnp.zeros((C,)), jnp.ones((C,)), 1e-5
        scale = bn_g / jnp.sqrt(bn_var + eps)
        shift = (b - bn_mean) * scale + bn_b
        w_flat = jnp.transpose(w, (2, 3, 1, 0)).reshape(9 * cin, C)
        conv_blocks.append({"w": w_flat.astype(bf16),
                            "scale": scale.reshape(1, C),
                            "shift": shift.reshape(1, C)})
        cin = C
    prm["conv_blocks"] = conv_blocks

    # FiLM: Embedding(256,128) + relu(Linear(128,num_categories)) / relu(Linear(128,C))
    film_layers = []
    for _ in range(len(P["f_pool_size"])):
        emb = jax.random.normal(next(keys), (256, 128), jnp.float32) * 0.1
        wg, bg = _init_linear(next(keys), 128, P["num_categories"])
        wb, bb = _init_linear(next(keys), 128, C)
        film_layers.append({"embedding": emb,
                            "wg_t": wg.T.astype(bf16), "bg": bg.reshape(1, -1),
                            "wb_t": wb.T.astype(bf16), "bb": bb.reshape(1, -1)})
    prm["film_layers"] = film_layers

    # Bidirectional GRU: PyTorch gate order (r,z,n) kept, gates fused into
    # single (In,3H)/(H,3H) weights per direction.
    in_l = C * int(np.floor(F0 / np.prod(P["f_pool_size"])))
    gru = []
    for _ in range(P["nb_rnn_layers"]):
        layer = {}
        for dname in ("fwd", "bwd"):
            w_ih = jax.random.normal(next(keys), (3 * H, in_l), jnp.float32) * 0.1
            w_hh = jax.random.normal(next(keys), (3 * H, H), jnp.float32) * 0.1
            b_ih = jax.random.normal(next(keys), (3 * H,), jnp.float32) * 0.1
            b_hh = jax.random.normal(next(keys), (3 * H,), jnp.float32) * 0.1
            layer[dname] = {"wih": w_ih.T.astype(bf16),   # (In, 3H)
                            "whh": w_hh.T.astype(bf16),   # (H, 3H)
                            "bih": b_ih.reshape(1, 3 * H),
                            "bhh": b_hh.reshape(1, 3 * H)}
        gru.append(layer)
        in_l = 2 * H
    prm["gru"] = gru

    # Multi-head self-attention: fused QKV weight + per-head slices of W_o.
    wq, bq = _init_linear(next(keys), H, H)
    wk, bk = _init_linear(next(keys), H, H)
    wv, bv = _init_linear(next(keys), H, H)
    wo, bo = _init_linear(next(keys), H, H)
    wqkv_t = jnp.concatenate([wq.T, wk.T, wv.T], axis=1)          # (H, 3H)
    bqkv = jnp.concatenate([bq, bk, bv]).reshape(1, 3 * H)
    wo_h = jnp.stack([wo[:, h * hd:(h + 1) * hd].T for h in range(nh)], axis=0)

    # FNN head: hidden layers have no activation in the reference forward, so
    # fold the whole affine chain (incl. final layer) into one (H, out) matmul.
    wf_t = jnp.eye(H, dtype=jnp.float32)
    bf = jnp.zeros((H,), jnp.float32)
    fin = H
    for _ in range(P["nb_fnn_layers"]):
        w, b = _init_linear(next(keys), fin, P["fnn_size"])
        wf_t = wf_t @ w.T
        bf = bf @ w.T + b
        fin = P["fnn_size"]
    w, b = _init_linear(next(keys), fin, out_dim)
    wf_t = wf_t @ w.T
    bf = bf @ w.T + b

    prm["attn_fnn"] = {"wqkv_t": wqkv_t.astype(bf16), "bqkv": bqkv,
                       "wo_h": wo_h.astype(bf16), "bo": bo.reshape(1, H),
                       "wf_t": wf_t.astype(bf16), "bf": bf.reshape(1, -1)}
    return prm, cfg


def crnn_forward(x, sed_labels, prm, cfg):
    # TODO(synk): the reference's `self.film_generator(_sed_labels)` (FiLMGenerator)
    # is dead code that crashes in PyTorch (nn.Embedding on a float one-hot) and its
    # outputs are never used, so it is skipped; `spatial_fc` is also unused.
    B = x.shape[0]
    x = jnp.transpose(x, (0, 2, 3, 1))                     # NCHW -> (B, T, F, C)

    for i, blk in enumerate(prm["conv_blocks"]):
        fl = prm["film_layers"][i]
        # FiLM conditioning input: Embedding -> mean over labels (dropout = id)
        emb = jnp.mean(jnp.take(fl["embedding"], sed_labels, axis=0), axis=1)
        emb = emb.reshape(B, 1, 128)
        x = conv_pool_film_block(x, blk, fl, emb,
                                 cfg["t_pool"][i], cfg["f_pool"][i])

    # (B, T', F', C) -> time-major (T', B, C*F'), matching torch transpose(1,2)+view
    Bc, Tp, Fp, C = x.shape
    x_tm = jnp.transpose(x, (1, 0, 3, 2)).reshape(Tp, Bc, C * Fp)

    # Bidirectional GRU stack (time-major throughout; inter-layer dropout = id)
    of = ob = None
    n_layers = len(prm["gru"])
    for l in range(n_layers):
        of, ob = bigru_layer(x_tm, prm["gru"][l])
        if l + 1 < n_layers:
            x_tm = jnp.concatenate([of, ob], axis=-1)      # (T, B, 2H)

    # tanh + gated combination of the two directions, back to batch-major
    x_attn = jnp.transpose(jnp.tanh(of) * jnp.tanh(ob), (1, 0, 2))   # (B, T', H)

    # Fused self-attention + tanh + (folded) FNN head + tanh
    return attn_fnn(x_attn, prm["attn_fnn"], cfg["n_heads"])


# ----------------------------------------------------------------------------
if __name__ == "__main__":
    P = dict(
        unique_classes=4,
        nb_cnn2d_filt=16,
        num_categories=16,          # must equal nb_cnn2d_filt (FiLM broadcast)
        f_pool_size=[2, 2],
        t_pool_size=[2, 2],
        dropout_rate=0.05,
        nb_rnn_layers=2,
        rnn_size=32,
        self_attn=True,
        nb_heads=4,
        nb_fnn_layers=1,
        fnn_size=32,
    )
    in_feat_shape = (2, 4, 16, 8)                 # (B, C_in, T, F)
    out_dim = 3 * P["unique_classes"]             # out_shape[-1]

    key = jax.random.PRNGKey(0)
    k_param, k_x, k_lab = jax.random.split(key, 3)
    prm, cfg = build_params(k_param, in_feat_shape, out_dim, P)

    x = jax.random.normal(k_x, in_feat_shape, jnp.float32)
    sed_labels = jax.random.randint(k_lab, (in_feat_shape[0], 3), 0, 256,
                                    dtype=jnp.int32)

    fwd = jax.jit(functools.partial(crnn_forward, cfg=cfg))
    doa = fwd(x, sed_labels, prm)
    doa = jax.block_until_ready(doa)
    assert doa.shape == (in_feat_shape[0], 4, out_dim), doa.shape
    assert bool(jnp.all(jnp.isfinite(doa)))
    print("KERNEL_OK")
</pallas_src>

<mosaic_0001>
module attributes {stable_mosaic.version = 11 : i64} {
  func.func @_conv_pool_film_kernel(%arg0: i32, %arg1: memref<1x128x36xbf16, #tpu.memory_space<vmem>>, %arg2: memref<36x16xbf16, #tpu.memory_space<vmem>>, %arg3: memref<1x16xf32, #tpu.memory_space<vmem>>, %arg4: memref<1x16xf32, #tpu.memory_space<vmem>>, %arg5: memref<1x1x128xf32, #tpu.memory_space<vmem>>, %arg6: memref<128x16xbf16, #tpu.memory_space<vmem>>, %arg7: memref<1x16xf32, #tpu.memory_space<vmem>>, %arg8: memref<128x16xbf16, #tpu.memory_space<vmem>>, %arg9: memref<1x16xf32, #tpu.memory_space<vmem>>, %arg10: memref<1x32x16xf32, #tpu.memory_space<vmem>>) attributes {dimension_semantics = [#tpu.dimension_semantics<parallel>], iteration_bounds = array<i64: 2>, scalar_prefetch = 0 : i64, scratch_operands = 0 : i64, tpu.core_type = #tpu.core_type<tc>, window_params = [{transform_indices = @transform_0, window_bounds = array<i64: 1, 128, 36>}, {pipeline_mode = #tpu.pipeline_mode<synchronous>, transform_indices = @transform_1, window_bounds = array<i64: 36, 16>}, {pipeline_mode = #tpu.pipeline_mode<synchronous>, transform_indices = @transform_2, window_bounds = array<i64: 1, 16>}, {pipeline_mode = #tpu.pipeline_mode<synchronous>, transform_indices = @transform_3, window_bounds = array<i64: 1, 16>}, {transform_indices = @transform_4, window_bounds = array<i64: 1, 1, 128>}, {pipeline_mode = #tpu.pipeline_mode<synchronous>, transform_indices = @transform_5, window_bounds = array<i64: 128, 16>}, {pipeline_mode = #tpu.pipeline_mode<synchronous>, transform_indices = @transform_6, window_bounds = array<i64: 1, 16>}, {pipeline_mode = #tpu.pipeline_mode<synchronous>, transform_indices = @transform_7, window_bounds = array<i64: 128, 16>}, {pipeline_mode = #tpu.pipeline_mode<synchronous>, transform_indices = @transform_8, window_bounds = array<i64: 1, 16>}, {transform_indices = @transform_9, window_bounds = array<i64: 1, 32, 16>}]} {
    %c0 = arith.constant 0 : index
    %c0_0 = arith.constant 0 : index
    %c0_1 = arith.constant 0 : index
    %0 = vector.load %arg1[%c0, %c0_0, %c0_1] : memref<1x128x36xbf16, #tpu.memory_space<vmem>>, vector<1x128x36xbf16>
    %1 = vector.shape_cast %0 : vector<1x128x36xbf16> to vector<128x36xbf16>
    %c0_2 = arith.constant 0 : index
    %c0_3 = arith.constant 0 : index
    %2 = vector.load %arg2[%c0_2, %c0_3] : memref<36x16xbf16, #tpu.memory_space<vmem>>, vector<36x16xbf16>
    %cst = arith.constant dense<0.000000e+00> : vector<128x16xf32>
    %3 = tpu.matmul %1, %2, %cst {dimension_numbers = #tpu.dot_dimension_numbers<[1], [0], [0], [1], [0, 0, 1, 1], [], []>} : vector<128x36xbf16>, vector<36x16xbf16>, vector<128x16xf32> -> vector<128x16xf32>
    %c0_4 = arith.constant 0 : index
    %c0_5 = arith.constant 0 : index
    %4 = vector.load %arg3[%c0_4, %c0_5] : memref<1x16xf32, #tpu.memory_space<vmem>>, vector<1x16xf32>
    %5 = vector.broadcast %4 : vector<1x16xf32> to vector<128x16xf32>
    %6 = arith.mulf %3, %5 : vector<128x16xf32>
    %c0_6 = arith.constant 0 : index
    %c0_7 = arith.constant 0 : index
    %7 = vector.load %arg4[%c0_6, %c0_7] : memref<1x16xf32, #tpu.memory_space<vmem>>, vector<1x16xf32>
    %8 = vector.broadcast %7 : vector<1x16xf32> to vector<128x16xf32>
    %9 = arith.addf %6, %8 : vector<128x16xf32>
    %cst_8 = arith.constant 0.000000e+00 : f32
    %10 = vector.broadcast %cst_8 : f32 to vector<128x16xf32>
    %11 = arith.maximumf %9, %10 : vector<128x16xf32>
    %12 = vector.extract_strided_slice %11 {offsets = [0, 0], sizes = [32, 16], strides = [1, 1]} : vector<128x16xf32> to vector<32x16xf32>
    %13 = vector.extract_strided_slice %11 {offsets = [32, 0], sizes = [32, 16], strides = [1, 1]} : vector<128x16xf32> to vector<32x16xf32>
    %14 = arith.maximumf %12, %13 : vector<32x16xf32>
    %15 = vector.extract_strided_slice %11 {offsets = [64, 0], sizes = [32, 16], strides = [1, 1]} : vector<128x16xf32> to vector<32x16xf32>
    %16 = arith.maximumf %14, %15 : vector<32x16xf32>
    %17 = vector.extract_strided_slice %11 {offsets = [96, 0], sizes = [32, 16], strides = [1, 1]} : vector<128x16xf32> to vector<32x16xf32>
    %18 = arith.maximumf %16, %17 : vector<32x16xf32>
    %c0_9 = arith.constant 0 : index
    %c0_10 = arith.constant 0 : index
    %c0_11 = arith.constant 0 : index
    %19 = vector.load %arg5[%c0_9, %c0_10, %c0_11] : memref<1x1x128xf32, #tpu.memory_space<vmem>>, vector<1x1x128xf32>
    %20 = vector.shape_cast %19 : vector<1x1x128xf32> to vector<1x128xf32>
    %21 = arith.truncf %20 : vector<1x128xf32> to vector<1x128xbf16>
    %c0_12 = arith.constant 0 : index
    %c0_13 = arith.constant 0 : index
    %22 = vector.load %arg6[%c0_12, %c0_13] : memref<128x16xbf16, #tpu.memory_space<vmem>>, vector<128x16xbf16>
    %cst_14 = arith.constant dense<0.000000e+00> : vector<1x16xf32>
    %23 = tpu.matmul %21, %22, %cst_14 {dimension_numbers = #tpu.dot_dimension_numbers<[1], [0], [0], [1], [0, 0, 1, 1], [], []>} : vector<1x128xbf16>, vector<128x16xbf16>, vector<1x16xf32> -> vector<1x16xf32>
    %c0_15 = arith.constant 0 : index
    %c0_16 = arith.constant 0 : index
    %24 = vector.load %arg7[%c0_15, %c0_16] : memref<1x16xf32, #tpu.memory_space<vmem>>, vector<1x16xf32>
    %25 = arith.addf %23, %24 : vector<1x16xf32>
    %cst_17 = arith.constant 0.000000e+00 : f32
    %26 = vector.broadcast %cst_17 : f32 to vector<1x16xf32>
    %27 = arith.maximumf %25, %26 : vector<1x16xf32>
    %c0_18 = arith.constant 0 : index
    %c0_19 = arith.constant 0 : index
    %28 = vector.load %arg8[%c0_18, %c0_19] : memref<128x16xbf16, #tpu.memory_space<vmem>>, vector<128x16xbf16>
    %cst_20 = arith.constant dense<0.000000e+00> : vector<1x16xf32>
    %29 = tpu.matmul %21, %28, %cst_20 {dimension_numbers = #tpu.dot_dimension_numbers<[1], [0], [0], [1], [0, 0, 1, 1], [], []>} : vector<1x128xbf16>, vector<128x16xbf16>, vector<1x16xf32> -> vector<1x16xf32>
    %c0_21 = arith.constant 0 : index
    %c0_22 = arith.constant 0 : index
    %30 = vector.load %arg9[%c0_21, %c0_22] : memref<1x16xf32, #tpu.memory_space<vmem>>, vector<1x16xf32>
    %31 = arith.addf %29, %30 : vector<1x16xf32>
    %cst_23 = arith.constant 0.000000e+00 : f32
    %32 = vector.broadcast %cst_23 : f32 to vector<1x16xf32>
    %33 = arith.maximumf %31, %32 : vector<1x16xf32>
    %34 = vector.broadcast %27 : vector<1x16xf32> to vector<32x16xf32>
    %35 = arith.mulf %18, %34 : vector<32x16xf32>
    %36 = vector.broadcast %33 : vector<1x16xf32> to vector<32x16xf32>
    %37 = arith.addf %35, %36 : vector<32x16xf32>
    %c0_24 = arith.constant 0 : index
    %c0_25 = arith.constant 0 : index
    %c0_26 = arith.constant 0 : index
    %38 = vector.load %arg10[%c0_24, %c0_25, %c0_26] : memref<1x32x16xf32, #tpu.memory_space<vmem>>, vector<1x32x16xf32>
    %39 = vector.shape_cast %38 : vector<1x32x16xf32> to vector<32x16xf32>
    %40 = vector.shape_cast %37 : vector<32x16xf32> to vector<1x32x16xf32>
    tpu.vector_store %arg10[%c0_24, %c0_25, %c0_26], %40 {strides = array<i32>} : memref<1x32x16xf32, #tpu.memory_space<vmem>>, vector<1x32x16xf32>,
    return
  }
  func.func @transform_0(%arg0: i32) -> (i32, i32, i32) {
    %c0_i32 = arith.constant 0 : i32
    %c0_i32_0 = arith.constant 0 : i32
    %c0_i32_1 = arith.constant 0 : i32
    return %arg0, %c0_i32, %c0_i32_0 : i32, i32, i32
  }
  func.func @transform_1(%arg0: i32) -> (i32, i32) {
    %c0_i32 = arith.constant 0 : i32
    %c0_i32_0 = arith.constant 0 : i32
    %c0_i32_1 = arith.constant 0 : i32
    return %c0_i32, %c0_i32_0 : i32, i32
  }
  func.func @transform_2(%arg0: i32) -> (i32, i32) {
    %c0_i32 = arith.constant 0 : i32
    %c0_i32_0 = arith.constant 0 : i32
    %c0_i32_1 = arith.constant 0 : i32
    return %c0_i32, %c0_i32_0 : i32, i32
  }
  func.func @transform_3(%arg0: i32) -> (i32, i32) {
    %c0_i32 = arith.constant 0 : i32
    %c0_i32_0 = arith.constant 0 : i32
    %c0_i32_1 = arith.constant 0 : i32
    return %c0_i32, %c0_i32_0 : i32, i32
  }
  func.func @transform_4(%arg0: i32) -> (i32, i32, i32) {
    %c0_i32 = arith.constant 0 : i32
    %c0_i32_0 = arith.constant 0 : i32
    %c0_i32_1 = arith.constant 0 : i32
    return %arg0, %c0_i32, %c0_i32_0 : i32, i32, i32
  }
  func.func @transform_5(%arg0: i32) -> (i32, i32) {
    %c0_i32 = arith.constant 0 : i32
    %c0_i32_0 = arith.constant 0 : i32
    %c0_i32_1 = arith.constant 0 : i32
    return %c0_i32, %c0_i32_0 : i32, i32
  }
  func.func @transform_6(%arg0: i32) -> (i32, i32) {
    %c0_i32 = arith.constant 0 : i32
    %c0_i32_0 = arith.constant 0 : i32
    %c0_i32_1 = arith.constant 0 : i32
    return %c0_i32, %c0_i32_0 : i32, i32
  }
  func.func @transform_7(%arg0: i32) -> (i32, i32) {
    %c0_i32 = arith.constant 0 : i32
    %c0_i32_0 = arith.constant 0 : i32
    %c0_i32_1 = arith.constant 0 : i32
    return %c0_i32, %c0_i32_0 : i32, i32
  }
  func.func @transform_8(%arg0: i32) -> (i32, i32) {
    %c0_i32 = arith.constant 0 : i32
    %c0_i32_0 = arith.constant 0 : i32
    %c0_i32_1 = arith.constant 0 : i32
    return %c0_i32, %c0_i32_0 : i32, i32
  }
  func.func @transform_9(%arg0: i32) -> (i32, i32, i32) {
    %c0_i32 = arith.constant 0 : i32
    %c0_i32_0 = arith.constant 0 : i32
    %c0_i32_1 = arith.constant 0 : i32
    return %arg0, %c0_i32, %c0_i32_0 : i32, i32, i32
  }
}

module attributes {stable_mosaic.version = 11 : i64} {
  func.func @_bigru_kernel(%arg0: i32, %arg1: memref<1x2x32xf32, #tpu.memory_space<vmem>>, %arg2: memref<1x2x32xf32, #tpu.memory_space<vmem>>, %arg3: memref<32x96xbf16, #tpu.memory_space<vmem>>, %arg4: memref<32x96xbf16, #tpu.memory_space<vmem>>, %arg5: memref<1x96xf32, #tpu.memory_space<vmem>>, %arg6: memref<1x96xf32, #tpu.memory_space<vmem>>, %arg7: memref<32x96xbf16, #tpu.memory_space<vmem>>, %arg8: memref<32x96xbf16, #tpu.memory_space<vmem>>, %arg9: memref<1x96xf32, #tpu.memory_space<vmem>>, %arg10: memref<1x96xf32, #tpu.memory_space<vmem>>, %arg11: memref<1x2x32xf32, #tpu.memory_space<vmem>>, %arg12: memref<1x2x32xf32, #tpu.memory_space<vmem>>, %arg13: memref<2x32xf32, #tpu.memory_space<vmem>>, %arg14: memref<2x32xf32, #tpu.memory_space<vmem>>) attributes {dimension_semantics = [#tpu.dimension_semantics<arbitrary>], iteration_bounds = array<i64: 4>, scalar_prefetch = 0 : i64, scratch_operands = 2 : i64, tpu.core_type = #tpu.core_type<tc>, window_params = [{transform_indices = @transform_0, window_bounds = array<i64: 1, 2, 32>}, {transform_indices = @transform_1, window_bounds = array<i64: 1, 2, 32>}, {pipeline_mode = #tpu.pipeline_mode<synchronous>, transform_indices = @transform_2, window_bounds = array<i64: 32, 96>}, {pipeline_mode = #tpu.pipeline_mode<synchronous>, transform_indices = @transform_3, window_bounds = array<i64: 32, 96>}, {pipeline_mode = #tpu.pipeline_mode<synchronous>, transform_indices = @transform_4, window_bounds = array<i64: 1, 96>}, {pipeline_mode = #tpu.pipeline_mode<synchronous>, transform_indices = @transform_5, window_bounds = array<i64: 1, 96>}, {pipeline_mode = #tpu.pipeline_mode<synchronous>, transform_indices = @transform_6, window_bounds = array<i64: 32, 96>}, {pipeline_mode = #tpu.pipeline_mode<synchronous>, transform_indices = @transform_7, window_bounds = array<i64: 32, 96>}, {pipeline_mode = #tpu.pipeline_mode<synchronous>, transform_indices = @transform_8, window_bounds = array<i64: 1, 96>}, {pipeline_mode = #tpu.pipeline_mode<synchronous>, transform_indices = @transform_9, window_bounds = array<i64: 1, 96>}, {transform_indices = @transform_10, window_bounds = array<i64: 1, 2, 32>}, {transform_indices = @transform_11, window_bounds = array<i64: 1, 2, 32>}]} {
    %c0_i32 = arith.constant 0 : i32
    %0 = arith.cmpi eq, %arg0, %c0_i32 : i32
    %1 = arith.extui %0 : i1 to i32
    %c0_i32_0 = arith.constant 0 : i32
    %2 = arith.cmpi ne, %1, %c0_i32_0 : i32
    scf.if %2 {
      %cst_45 = arith.constant 0.000000e+00 : f32
      %93 = vector.broadcast %cst_45 : f32 to vector<2x32xf32>
      %c0_46 = arith.constant 0 : index
      %c0_47 = arith.constant 0 : index
      %94 = vector.load %arg13[%c0_46, %c0_47] : memref<2x32xf32, #tpu.memory_space<vmem>>, vector<2x32xf32>
      tpu.vector_store %arg13[%c0_46, %c0_47], %93 {strides = array<i32>} : memref<2x32xf32, #tpu.memory_space<vmem>>, vector<2x32xf32>,
      %cst_48 = arith.constant 0.000000e+00 : f32
      %95 = vector.broadcast %cst_48 : f32 to vector<2x32xf32>
      %c0_49 = arith.constant 0 : index
      %c0_50 = arith.constant 0 : index
      %96 = vector.load %arg14[%c0_49, %c0_50] : memref<2x32xf32, #tpu.memory_space<vmem>>, vector<2x32xf32>
      tpu.vector_store %arg14[%c0_49, %c0_50], %95 {strides = array<i32>} : memref<2x32xf32, #tpu.memory_space<vmem>>, vector<2x32xf32>,
    } else {
    }
    %c0 = arith.constant 0 : index
    %c0_1 = arith.constant 0 : index
    %c0_2 = arith.constant 0 : index
    %3 = vector.load %arg1[%c0, %c0_1, %c0_2] : memref<1x2x32xf32, #tpu.memory_space<vmem>>, vector<1x2x32xf32>
    %4 = vector.shape_cast %3 : vector<1x2x32xf32> to vector<2x32xf32>
    %c0_3 = arith.constant 0 : index
    %c0_4 = arith.constant 0 : index
    %5 = vector.load %arg13[%c0_3, %c0_4] : memref<2x32xf32, #tpu.memory_space<vmem>>, vector<2x32xf32>
    %6 = arith.truncf %4 : vector<2x32xf32> to vector<2x32xbf16>
    %c0_5 = arith.constant 0 : index
    %c0_6 = arith.constant 0 : index
    %7 = vector.load %arg3[%c0_5, %c0_6] : memref<32x96xbf16, #tpu.memory_space<vmem>>, vector<32x96xbf16>
    %cst = arith.constant dense<0.000000e+00> : vector<2x96xf32>
    %8 = tpu.matmul %6, %7, %cst {dimension_numbers = #tpu.dot_dimension_numbers<[1], [0], [0], [1], [0, 0, 1, 1], [], []>} : vector<2x32xbf16>, vector<32x96xbf16>, vector<2x96xf32> -> vector<2x96xf32>
    %c0_7 = arith.constant 0 : index
    %c0_8 = arith.constant 0 : index
    %9 = vector.load %arg5[%c0_7, %c0_8] : memref<1x96xf32, #tpu.memory_space<vmem>>, vector<1x96xf32>
    %10 = vector.broadcast %9 : vector<1x96xf32> to vector<2x96xf32>
    %11 = arith.addf %8, %10 : vector<2x96xf32>
    %12 = arith.truncf %5 : vector<2x32xf32> to vector<2x32xbf16>
    %c0_9 = arith.constant 0 : index
    %c0_10 = arith.constant 0 : index
    %13 = vector.load %arg4[%c0_9, %c0_10] : memref<32x96xbf16, #tpu.memory_space<vmem>>, vector<32x96xbf16>
    %cst_11 = arith.constant dense<0.000000e+00> : vector<2x96xf32>
    %14 = tpu.matmul %12, %13, %cst_11 {dimension_numbers = #tpu.dot_dimension_numbers<[1], [0], [0], [1], [0, 0, 1, 1], [], []>} : vector<2x32xbf16>, vector<32x96xbf16>, vector<2x96xf32> -> vector<2x96xf32>
    %c0_12 = arith.constant 0 : index
    %c0_13 = arith.constant 0 : index
    %15 = vector.load %arg6[%c0_12, %c0_13] : memref<1x96xf32, #tpu.memory_space<vmem>>, vector<1x96xf32>
    %16 = vector.broadcast %15 : vector<1x96xf32> to vector<2x96xf32>
    %17 = arith.addf %14, %16 : vector<2x96xf32>
    %18 = vector.extract_strided_slice %11 {offsets = [0, 0], sizes = [2, 32], strides = [1, 1]} : vector<2x96xf32> to vector<2x32xf32>
    %19 = vector.extract_strided_slice %17 {offsets = [0, 0], sizes = [2, 32], strides = [1, 1]} : vector<2x96xf32> to vector<2x32xf32>
    %20 = arith.addf %18, %19 : vector<2x32xf32>
    %21 = arith.negf %20 : vector<2x32xf32>
    %22 = math.exp %21 : vector<2x32xf32>
    %cst_14 = arith.constant 1.000000e+00 : f32
    %23 = vector.broadcast %cst_14 : f32 to vector<2x32xf32>
    %24 = arith.addf %23, %22 : vector<2x32xf32>
    %25 = arith.divf %23, %24 : vector<2x32xf32>
    %26 = vector.extract_strided_slice %11 {offsets = [0, 32], sizes = [2, 32], strides = [1, 1]} : vector<2x96xf32> to vector<2x32xf32>
    %27 = vector.extract_strided_slice %17 {offsets = [0, 32], sizes = [2, 32], strides = [1, 1]} : vector<2x96xf32> to vector<2x32xf32>
    %28 = arith.addf %26, %27 : vector<2x32xf32>
    %29 = arith.negf %28 : vector<2x32xf32>
    %30 = math.exp %29 : vector<2x32xf32>
    %cst_15 = arith.constant 1.000000e+00 : f32
    %31 = vector.broadcast %cst_15 : f32 to vector<2x32xf32>
    %32 = arith.addf %31, %30 : vector<2x32xf32>
    %33 = arith.divf %31, %32 : vector<2x32xf32>
    %34 = vector.extract_strided_slice %11 {offsets = [0, 64], sizes = [2, 32], strides = [1, 1]} : vector<2x96xf32> to vector<2x32xf32>
    %35 = vector.extract_strided_slice %17 {offsets = [0, 64], sizes = [2, 32], strides = [1, 1]} : vector<2x96xf32> to vector<2x32xf32>
    %36 = arith.mulf %25, %35 : vector<2x32xf32>
    %37 = arith.addf %34, %36 : vector<2x32xf32>
    %38 = math.tanh %37 : vector<2x32xf32>
    %cst_16 = arith.constant 1.000000e+00 : f32
    %39 = vector.broadcast %cst_16 : f32 to vector<2x32xf32>
    %40 = arith.subf %39, %33 : vector<2x32xf32>
    %41 = arith.mulf %40, %38 : vector<2x32xf32>
    %42 = arith.mulf %33, %5 : vector<2x32xf32>
    %43 = arith.addf %41, %42 : vector<2x32xf32>
    %c0_17 = arith.constant 0 : index
    %c0_18 = arith.constant 0 : index
    %44 = vector.load %arg13[%c0_17, %c0_18] : memref<2x32xf32, #tpu.memory_space<vmem>>, vector<2x32xf32>
    tpu.vector_store %arg13[%c0_17, %c0_18], %43 {strides = array<i32>} : memref<2x32xf32, #tpu.memory_space<vmem>>, vector<2x32xf32>,
    %c0_19 = arith.constant 0 : index
    %c0_20 = arith.constant 0 : index
    %c0_21 = arith.constant 0 : index
    %45 = vector.load %arg11[%c0_19, %c0_20, %c0_21] : memref<1x2x32xf32, #tpu.memory_space<vmem>>, vector<1x2x32xf32>
    %46 = vector.shape_cast %45 : vector<1x2x32xf32> to vector<2x32xf32>
    %47 = vector.shape_cast %43 : vector<2x32xf32> to vector<1x2x32xf32>
    tpu.vector_store %arg11[%c0_19, %c0_20, %c0_21], %47 {strides = array<i32>} : memref<1x2x32xf32, #tpu.memory_space<vmem>>, vector<1x2x32xf32>,
    %c0_22 = arith.constant 0 : index
    %c0_23 = arith.constant 0 : index
    %c0_24 = arith.constant 0 : index
    %48 = vector.load %arg2[%c0_22, %c0_23, %c0_24] : memref<1x2x32xf32, #tpu.memory_space<vmem>>, vector<1x2x32xf32>
    %49 = vector.shape_cast %48 : vector<1x2x32xf32> to vector<2x32xf32>
    %c0_25 = arith.constant 0 : index
    %c0_26 = arith.constant 0 : index
    %50 = vector.load %arg14[%c0_25, %c0_26] : memref<2x32xf32, #tpu.memory_space<vmem>>, vector<2x32xf32>
    %51 = arith.truncf %49 : vector<2x32xf32> to vector<2x32xbf16>
    %c0_27 = arith.constant 0 : index
    %c0_28 = arith.constant 0 : index
    %52 = vector.load %arg7[%c0_27, %c0_28] : memref<32x96xbf16, #tpu.memory_space<vmem>>, vector<32x96xbf16>
    %cst_29 = arith.constant dense<0.000000e+00> : vector<2x96xf32>
    %53 = tpu.matmul %51, %52, %cst_29 {dimension_numbers = #tpu.dot_dimension_numbers<[1], [0], [0], [1], [0, 0, 1, 1], [], []>} : vector<2x32xbf16>, vector<32x96xbf16>, vector<2x96xf32> -> vector<2x96xf32>
    %c0_30 = arith.constant 0 : index
    %c0_31 = arith.constant 0 : index
    %54 = vector.load %arg9[%c0_30, %c0_31] : memref<1x96xf32, #tpu.memory_space<vmem>>, vector<1x96xf32>
    %55 = vector.broadcast %54 : vector<1x96xf32> to vector<2x96xf32>
    %56 = arith.addf %53, %55 : vector<2x96xf32>
    %57 = arith.truncf %50 : vector<2x32xf32> to vector<2x32xbf16>
    %c0_32 = arith.constant 0 : index
    %c0_33 = arith.constant 0 : index
    %58 = vector.load %arg8[%c0_32, %c0_33] : memref<32x96xbf16, #tpu.memory_space<vmem>>, vector<32x96xbf16>
    %cst_34 = arith.constant dense<0.000000e+00> : vector<2x96xf32>
    %59 = tpu.matmul %57, %58, %cst_34 {dimension_numbers = #tpu.dot_dimension_numbers<[1], [0], [0], [1], [0, 0, 1, 1], [], []>} : vector<2x32xbf16>, vector<32x96xbf16>, vector<2x96xf32> -> vector<2x96xf32>
    %c0_35 = arith.constant 0 : index
    %c0_36 = arith.constant 0 : index
    %60 = vector.load %arg10[%c0_35, %c0_36] : memref<1x96xf32, #tpu.memory_space<vmem>>, vector<1x96xf32>
    %61 = vector.broadcast %60 : vector<1x96xf32> to vector<2x96xf32>
    %62 = arith.addf %59, %61 : vector<2x96xf32>
    %63 = vector.extract_strided_slice %56 {offsets = [0, 0], sizes = [2, 32], strides = [1, 1]} : vector<2x96xf32> to vector<2x32xf32>
    %64 = vector.extract_strided_slice %62 {offsets = [0, 0], sizes = [2, 32], strides = [1, 1]} : vector<2x96xf32> to vector<2x32xf32>
    %65 = arith.addf %63, %64 : vector<2x32xf32>
    %66 = arith.negf %65 : vector<2x32xf32>
    %67 = math.exp %66 : vector<2x32xf32>
    %cst_37 = arith.constant 1.000000e+00 : f32
    %68 = vector.broadcast %cst_37 : f32 to vector<2x32xf32>
    %69 = arith.addf %68, %67 : vector<2x32xf32>
    %70 = arith.divf %68, %69 : vector<2x32xf32>
    %71 = vector.extract_strided_slice %56 {offsets = [0, 32], sizes = [2, 32], strides = [1, 1]} : vector<2x96xf32> to vector<2x32xf32>
    %72 = vector.extract_strided_slice %62 {offsets = [0, 32], sizes = [2, 32], strides = [1, 1]} : vector<2x96xf32> to vector<2x32xf32>
    %73 = arith.addf %71, %72 : vector<2x32xf32>
    %74 = arith.negf %73 : vector<2x32xf32>
    %75 = math.exp %74 : vector<2x32xf32>
    %cst_38 = arith.constant 1.000000e+00 : f32
    %76 = vector.broadcast %cst_38 : f32 to vector<2x32xf32>
    %77 = arith.addf %76, %75 : vector<2x32xf32>
    %78 = arith.divf %76, %77 : vector<2x32xf32>
    %79 = vector.extract_strided_slice %56 {offsets = [0, 64], sizes = [2, 32], strides = [1, 1]} : vector<2x96xf32> to vector<2x32xf32>
    %80 = vector.extract_strided_slice %62 {offsets = [0, 64], sizes = [2, 32], strides = [1, 1]} : vector<2x96xf32> to vector<2x32xf32>
    %81 = arith.mulf %70, %80 : vector<2x32xf32>
    %82 = arith.addf %79, %81 : vector<2x32xf32>
    %83 = math.tanh %82 : vector<2x32xf32>
    %cst_39 = arith.constant 1.000000e+00 : f32
    %84 = vector.broadcast %cst_39 : f32 to vector<2x32xf32>
    %85 = arith.subf %84, %78 : vector<2x32xf32>
    %86 = arith.mulf %85, %83 : vector<2x32xf32>
    %87 = arith.mulf %78, %50 : vector<2x32xf32>
    %88 = arith.addf %86, %87 : vector<2x32xf32>
    %c0_40 = arith.constant 0 : index
    %c0_41 = arith.constant 0 : index
    %89 = vector.load %arg14[%c0_40, %c0_41] : memref<2x32xf32, #tpu.memory_space<vmem>>, vector<2x32xf32>
    tpu.vector_store %arg14[%c0_40, %c0_41], %88 {strides = array<i32>} : memref<2x32xf32, #tpu.memory_space<vmem>>, vector<2x32xf32>,
    %c0_42 = arith.constant 0 : index
    %c0_43 = arith.constant 0 : index
    %c0_44 = arith.constant 0 : index
    %90 = vector.load %arg12[%c0_42, %c0_43, %c0_44] : memref<1x2x32xf32, #tpu.memory_space<vmem>>, vector<1x2x32xf32>
    %91 = vector.shape_cast %90 : vector<1x2x32xf32> to vector<2x32xf32>
    %92 = vector.shape_cast %88 : vector<2x32xf32> to vector<1x2x32xf32>
    tpu.vector_store %arg12[%c0_42, %c0_43, %c0_44], %92 {strides = array<i32>} : memref<1x2x32xf32, #tpu.memory_space<vmem>>, vector<1x2x32xf32>,
    return
  }
  func.func @transform_0(%arg0: i32) -> (i32, i32, i32) {
    %c0_i32 = arith.constant 0 : i32
    %c0_i32_0 = arith.constant 0 : i32
    %c0_i32_1 = arith.constant 0 : i32
    return %arg0, %c0_i32, %c0_i32_0 : i32, i32, i32
  }
  func.func @transform_1(%arg0: i32) -> (i32, i32, i32) {
    %c3_i32 = arith.constant 3 : i32
    %0 = arith.subi %c3_i32, %arg0 : i32
    %c0_i32 = arith.constant 0 : i32
    %c0_i32_0 = arith.constant 0 : i32
    %c0_i32_1 = arith.constant 0 : i32
    return %0, %c0_i32, %c0_i32_0 : i32, i32, i32
  }
  func.func @transform_2(%arg0: i32) -> (i32, i32) {
    %c0_i32 = arith.constant 0 : i32
    %c0_i32_0 = arith.constant 0 : i32
    %c0_i32_1 = arith.constant 0 : i32
    return %c0_i32, %c0_i32_0 : i32, i32
  }
  func.func @transform_3(%arg0: i32) -> (i32, i32) {
    %c0_i32 = arith.constant 0 : i32
    %c0_i32_0 = arith.constant 0 : i32
    %c0_i32_1 = arith.constant 0 : i32
    return %c0_i32, %c0_i32_0 : i32, i32
  }
  func.func @transform_4(%arg0: i32) -> (i32, i32) {
    %c0_i32 = arith.constant 0 : i32
    %c0_i32_0 = arith.constant 0 : i32
    %c0_i32_1 = arith.constant 0 : i32
    return %c0_i32, %c0_i32_0 : i32, i32
  }
  func.func @transform_5(%arg0: i32) -> (i32, i32) {
    %c0_i32 = arith.constant 0 : i32
    %c0_i32_0 = arith.constant 0 : i32
    %c0_i32_1 = arith.constant 0 : i32
    return %c0_i32, %c0_i32_0 : i32, i32
  }
  func.func @transform_6(%arg0: i32) -> (i32, i32) {
    %c0_i32 = arith.constant 0 : i32
    %c0_i32_0 = arith.constant 0 : i32
    %c0_i32_1 = arith.constant 0 : i32
    return %c0_i32, %c0_i32_0 : i32, i32
  }
  func.func @transform_7(%arg0: i32) -> (i32, i32) {
    %c0_i32 = arith.constant 0 : i32
    %c0_i32_0 = arith.constant 0 : i32
    %c0_i32_1 = arith.constant 0 : i32
    return %c0_i32, %c0_i32_0 : i32, i32
  }
  func.func @transform_8(%arg0: i32) -> (i32, i32) {
    %c0_i32 = arith.constant 0 : i32
    %c0_i32_0 = arith.constant 0 : i32
    %c0_i32_1 = arith.constant 0 : i32
    return %c0_i32, %c0_i32_0 : i32, i32
  }
  func.func @transform_9(%arg0: i32) -> (i32, i32) {
    %c0_i32 = arith.constant 0 : i32
    %c0_i32_0 = arith.constant 0 : i32
    %c0_i32_1 = arith.constant 0 : i32
    return %c0_i32, %c0_i32_0 : i32, i32
  }
  func.func @transform_10(%arg0: i32) -> (i32, i32, i32) {
    %c0_i32 = arith.constant 0 : i32
    %c0_i32_0 = arith.constant 0 : i32
    %c0_i32_1 = arith.constant 0 : i32
    return %arg0, %c0_i32, %c0_i32_0 : i32, i32, i32
  }
  func.func @transform_11(%arg0: i32) -> (i32, i32, i32) {
    %c3_i32 = arith.constant 3 : i32
    %0 = arith.subi %c3_i32, %arg0 : i32
    %c0_i32 = arith.constant 0 : i32
    %c0_i32_0 = arith.constant 0 : i32
    %c0_i32_1 = arith.constant 0 : i32
    return %0, %c0_i32, %c0_i32_0 : i32, i32, i32
  }
}

module attributes {stable_mosaic.version = 11 : i64} {
  func.func @_conv_pool_film_kernel(%arg0: i32, %arg1: memref<1x32x144xbf16, #tpu.memory_space<vmem>>, %arg2: memref<144x16xbf16, #tpu.memory_space<vmem>>, %arg3: memref<1x16xf32, #tpu.memory_space<vmem>>, %arg4: memref<1x16xf32, #tpu.memory_space<vmem>>, %arg5: memref<1x1x128xf32, #tpu.memory_space<vmem>>, %arg6: memref<128x16xbf16, #tpu.memory_space<vmem>>, %arg7: memref<1x16xf32, #tpu.memory_space<vmem>>, %arg8: memref<128x16xbf16, #tpu.memory_space<vmem>>, %arg9: memref<1x16xf32, #tpu.memory_space<vmem>>, %arg10: memref<1x8x16xf32, #tpu.memory_space<vmem>>) attributes {dimension_semantics = [#tpu.dimension_semantics<parallel>], iteration_bounds = array<i64: 2>, scalar_prefetch = 0 : i64, scratch_operands = 0 : i64, tpu.core_type = #tpu.core_type<tc>, window_params = [{transform_indices = @transform_0, window_bounds = array<i64: 1, 32, 144>}, {pipeline_mode = #tpu.pipeline_mode<synchronous>, transform_indices = @transform_1, window_bounds = array<i64: 144, 16>}, {pipeline_mode = #tpu.pipeline_mode<synchronous>, transform_indices = @transform_2, window_bounds = array<i64: 1, 16>}, {pipeline_mode = #tpu.pipeline_mode<synchronous>, transform_indices = @transform_3, window_bounds = array<i64: 1, 16>}, {transform_indices = @transform_4, window_bounds = array<i64: 1, 1, 128>}, {pipeline_mode = #tpu.pipeline_mode<synchronous>, transform_indices = @transform_5, window_bounds = array<i64: 128, 16>}, {pipeline_mode = #tpu.pipeline_mode<synchronous>, transform_indices = @transform_6, window_bounds = array<i64: 1, 16>}, {pipeline_mode = #tpu.pipeline_mode<synchronous>, transform_indices = @transform_7, window_bounds = array<i64: 128, 16>}, {pipeline_mode = #tpu.pipeline_mode<synchronous>, transform_indices = @transform_8, window_bounds = array<i64: 1, 16>}, {transform_indices = @transform_9, window_bounds = array<i64: 1, 8, 16>}]} {
    %c0 = arith.constant 0 : index
    %c0_0 = arith.constant 0 : index
    %c0_1 = arith.constant 0 : index
    %0 = vector.load %arg1[%c0, %c0_0, %c0_1] : memref<1x32x144xbf16, #tpu.memory_space<vmem>>, vector<1x32x144xbf16>
    %1 = vector.shape_cast %0 : vector<1x32x144xbf16> to vector<32x144xbf16>
    %c0_2 = arith.constant 0 : index
    %c0_3 = arith.constant 0 : index
    %2 = vector.load %arg2[%c0_2, %c0_3] : memref<144x16xbf16, #tpu.memory_space<vmem>>, vector<144x16xbf16>
    %cst = arith.constant dense<0.000000e+00> : vector<32x16xf32>
    %3 = tpu.matmul %1, %2, %cst {dimension_numbers = #tpu.dot_dimension_numbers<[1], [0], [0], [1], [0, 0, 1, 1], [], []>} : vector<32x144xbf16>, vector<144x16xbf16>, vector<32x16xf32> -> vector<32x16xf32>
    %c0_4 = arith.constant 0 : index
    %c0_5 = arith.constant 0 : index
    %4 = vector.load %arg3[%c0_4, %c0_5] : memref<1x16xf32, #tpu.memory_space<vmem>>, vector<1x16xf32>
    %5 = vector.broadcast %4 : vector<1x16xf32> to vector<32x16xf32>
    %6 = arith.mulf %3, %5 : vector<32x16xf32>
    %c0_6 = arith.constant 0 : index
    %c0_7 = arith.constant 0 : index
    %7 = vector.load %arg4[%c0_6, %c0_7] : memref<1x16xf32, #tpu.memory_space<vmem>>, vector<1x16xf32>
    %8 = vector.broadcast %7 : vector<1x16xf32> to vector<32x16xf32>
    %9 = arith.addf %6, %8 : vector<32x16xf32>
    %cst_8 = arith.constant 0.000000e+00 : f32
    %10 = vector.broadcast %cst_8 : f32 to vector<32x16xf32>
    %11 = arith.maximumf %9, %10 : vector<32x16xf32>
    %12 = vector.extract_strided_slice %11 {offsets = [0, 0], sizes = [8, 16], strides = [1, 1]} : vector<32x16xf32> to vector<8x16xf32>
    %13 = vector.extract_strided_slice %11 {offsets = [8, 0], sizes = [8, 16], strides = [1, 1]} : vector<32x16xf32> to vector<8x16xf32>
    %14 = arith.maximumf %12, %13 : vector<8x16xf32>
    %15 = vector.extract_strided_slice %11 {offsets = [16, 0], sizes = [8, 16], strides = [1, 1]} : vector<32x16xf32> to vector<8x16xf32>
    %16 = arith.maximumf %14, %15 : vector<8x16xf32>
    %17 = vector.extract_strided_slice %11 {offsets = [24, 0], sizes = [8, 16], strides = [1, 1]} : vector<32x16xf32> to vector<8x16xf32>
    %18 = arith.maximumf %16, %17 : vector<8x16xf32>
    %c0_9 = arith.constant 0 : index
    %c0_10 = arith.constant 0 : index
    %c0_11 = arith.constant 0 : index
    %19 = vector.load %arg5[%c0_9, %c0_10, %c0_11] : memref<1x1x128xf32, #tpu.memory_space<vmem>>, vector<1x1x128xf32>
    %20 = vector.shape_cast %19 : vector<1x1x128xf32> to vector<1x128xf32>
    %21 = arith.truncf %20 : vector<1x128xf32> to vector<1x128xbf16>
    %c0_12 = arith.constant 0 : index
    %c0_13 = arith.constant 0 : index
    %22 = vector.load %arg6[%c0_12, %c0_13] : memref<128x16xbf16, #tpu.memory_space<vmem>>, vector<128x16xbf16>
    %cst_14 = arith.constant dense<0.000000e+00> : vector<1x16xf32>
    %23 = tpu.matmul %21, %22, %cst_14 {dimension_numbers = #tpu.dot_dimension_numbers<[1], [0], [0], [1], [0, 0, 1, 1], [], []>} : vector<1x128xbf16>, vector<128x16xbf16>, vector<1x16xf32> -> vector<1x16xf32>
    %c0_15 = arith.constant 0 : index
    %c0_16 = arith.constant 0 : index
    %24 = vector.load %arg7[%c0_15, %c0_16] : memref<1x16xf32, #tpu.memory_space<vmem>>, vector<1x16xf32>
    %25 = arith.addf %23, %24 : vector<1x16xf32>
    %cst_17 = arith.constant 0.000000e+00 : f32
    %26 = vector.broadcast %cst_17 : f32 to vector<1x16xf32>
    %27 = arith.maximumf %25, %26 : vector<1x16xf32>
    %c0_18 = arith.constant 0 : index
    %c0_19 = arith.constant 0 : index
    %28 = vector.load %arg8[%c0_18, %c0_19] : memref<128x16xbf16, #tpu.memory_space<vmem>>, vector<128x16xbf16>
    %cst_20 = arith.constant dense<0.000000e+00> : vector<1x16xf32>
    %29 = tpu.matmul %21, %28, %cst_20 {dimension_numbers = #tpu.dot_dimension_numbers<[1], [0], [0], [1], [0, 0, 1, 1], [], []>} : vector<1x128xbf16>, vector<128x16xbf16>, vector<1x16xf32> -> vector<1x16xf32>
    %c0_21 = arith.constant 0 : index
    %c0_22 = arith.constant 0 : index
    %30 = vector.load %arg9[%c0_21, %c0_22] : memref<1x16xf32, #tpu.memory_space<vmem>>, vector<1x16xf32>
    %31 = arith.addf %29, %30 : vector<1x16xf32>
    %cst_23 = arith.constant 0.000000e+00 : f32
    %32 = vector.broadcast %cst_23 : f32 to vector<1x16xf32>
    %33 = arith.maximumf %31, %32 : vector<1x16xf32>
    %34 = vector.broadcast %27 : vector<1x16xf32> to vector<8x16xf32>
    %35 = arith.mulf %18, %34 : vector<8x16xf32>
    %36 = vector.broadcast %33 : vector<1x16xf32> to vector<8x16xf32>
    %37 = arith.addf %35, %36 : vector<8x16xf32>
    %c0_24 = arith.constant 0 : index
    %c0_25 = arith.constant 0 : index
    %c0_26 = arith.constant 0 : index
    %38 = vector.load %arg10[%c0_24, %c0_25, %c0_26] : memref<1x8x16xf32, #tpu.memory_space<vmem>>, vector<1x8x16xf32>
    %39 = vector.shape_cast %38 : vector<1x8x16xf32> to vector<8x16xf32>
    %40 = vector.shape_cast %37 : vector<8x16xf32> to vector<1x8x16xf32>
    tpu.vector_store %arg10[%c0_24, %c0_25, %c0_26], %40 {strides = array<i32>} : memref<1x8x16xf32, #tpu.memory_space<vmem>>, vector<1x8x16xf32>,
    return
  }
  func.func @transform_0(%arg0: i32) -> (i32, i32, i32) {
    %c0_i32 = arith.constant 0 : i32
    %c0_i32_0 = arith.constant 0 : i32
    %c0_i32_1 = arith.constant 0 : i32
    return %arg0, %c0_i32, %c0_i32_0 : i32, i32, i32
  }
  func.func @transform_1(%arg0: i32) -> (i32, i32) {
    %c0_i32 = arith.constant 0 : i32
    %c0_i32_0 = arith.constant 0 : i32
    %c0_i32_1 = arith.constant 0 : i32
    return %c0_i32, %c0_i32_0 : i32, i32
  }
  func.func @transform_2(%arg0: i32) -> (i32, i32) {
    %c0_i32 = arith.constant 0 : i32
    %c0_i32_0 = arith.constant 0 : i32
    %c0_i32_1 = arith.constant 0 : i32
    return %c0_i32, %c0_i32_0 : i32, i32
  }
  func.func @transform_3(%arg0: i32) -> (i32, i32) {
    %c0_i32 = arith.constant 0 : i32
    %c0_i32_0 = arith.constant 0 : i32
    %c0_i32_1 = arith.constant 0 : i32
    return %c0_i32, %c0_i32_0 : i32, i32
  }
  func.func @transform_4(%arg0: i32) -> (i32, i32, i32) {
    %c0_i32 = arith.constant 0 : i32
    %c0_i32_0 = arith.constant 0 : i32
    %c0_i32_1 = arith.constant 0 : i32
    return %arg0, %c0_i32, %c0_i32_0 : i32, i32, i32
  }
  func.func @transform_5(%arg0: i32) -> (i32, i32) {
    %c0_i32 = arith.constant 0 : i32
    %c0_i32_0 = arith.constant 0 : i32
    %c0_i32_1 = arith.constant 0 : i32
    return %c0_i32, %c0_i32_0 : i32, i32
  }
  func.func @transform_6(%arg0: i32) -> (i32, i32) {
    %c0_i32 = arith.constant 0 : i32
    %c0_i32_0 = arith.constant 0 : i32
    %c0_i32_1 = arith.constant 0 : i32
    return %c0_i32, %c0_i32_0 : i32, i32
  }
  func.func @transform_7(%arg0: i32) -> (i32, i32) {
    %c0_i32 = arith.constant 0 : i32
    %c0_i32_0 = arith.constant 0 : i32
    %c0_i32_1 = arith.constant 0 : i32
    return %c0_i32, %c0_i32_0 : i32, i32
  }
  func.func @transform_8(%arg0: i32) -> (i32, i32) {
    %c0_i32 = arith.constant 0 : i32
    %c0_i32_0 = arith.constant 0 : i32
    %c0_i32_1 = arith.constant 0 : i32
    return %c0_i32, %c0_i32_0 : i32, i32
  }
  func.func @transform_9(%arg0: i32) -> (i32, i32, i32) {
    %c0_i32 = arith.constant 0 : i32
    %c0_i32_0 = arith.constant 0 : i32
    %c0_i32_1 = arith.constant 0 : i32
    return %arg0, %c0_i32, %c0_i32_0 : i32, i32, i32
  }
}

module attributes {stable_mosaic.version = 11 : i64} {
  func.func @_bigru_kernel(%arg0: i32, %arg1: memref<1x2x64xf32, #tpu.memory_space<vmem>>, %arg2: memref<1x2x64xf32, #tpu.memory_space<vmem>>, %arg3: memref<64x96xbf16, #tpu.memory_space<vmem>>, %arg4: memref<32x96xbf16, #tpu.memory_space<vmem>>, %arg5: memref<1x96xf32, #tpu.memory_space<vmem>>, %arg6: memref<1x96xf32, #tpu.memory_space<vmem>>, %arg7: memref<64x96xbf16, #tpu.memory_space<vmem>>, %arg8: memref<32x96xbf16, #tpu.memory_space<vmem>>, %arg9: memref<1x96xf32, #tpu.memory_space<vmem>>, %arg10: memref<1x96xf32, #tpu.memory_space<vmem>>, %arg11: memref<1x2x32xf32, #tpu.memory_space<vmem>>, %arg12: memref<1x2x32xf32, #tpu.memory_space<vmem>>, %arg13: memref<2x32xf32, #tpu.memory_space<vmem>>, %arg14: memref<2x32xf32, #tpu.memory_space<vmem>>) attributes {dimension_semantics = [#tpu.dimension_semantics<arbitrary>], iteration_bounds = array<i64: 4>, scalar_prefetch = 0 : i64, scratch_operands = 2 : i64, tpu.core_type = #tpu.core_type<tc>, window_params = [{transform_indices = @transform_0, window_bounds = array<i64: 1, 2, 64>}, {transform_indices = @transform_1, window_bounds = array<i64: 1, 2, 64>}, {pipeline_mode = #tpu.pipeline_mode<synchronous>, transform_indices = @transform_2, window_bounds = array<i64: 64, 96>}, {pipeline_mode = #tpu.pipeline_mode<synchronous>, transform_indices = @transform_3, window_bounds = array<i64: 32, 96>}, {pipeline_mode = #tpu.pipeline_mode<synchronous>, transform_indices = @transform_4, window_bounds = array<i64: 1, 96>}, {pipeline_mode = #tpu.pipeline_mode<synchronous>, transform_indices = @transform_5, window_bounds = array<i64: 1, 96>}, {pipeline_mode = #tpu.pipeline_mode<synchronous>, transform_indices = @transform_6, window_bounds = array<i64: 64, 96>}, {pipeline_mode = #tpu.pipeline_mode<synchronous>, transform_indices = @transform_7, window_bounds = array<i64: 32, 96>}, {pipeline_mode = #tpu.pipeline_mode<synchronous>, transform_indices = @transform_8, window_bounds = array<i64: 1, 96>}, {pipeline_mode = #tpu.pipeline_mode<synchronous>, transform_indices = @transform_9, window_bounds = array<i64: 1, 96>}, {transform_indices = @transform_10, window_bounds = array<i64: 1, 2, 32>}, {transform_indices = @transform_11, window_bounds = array<i64: 1, 2, 32>}]} {
    %c0_i32 = arith.constant 0 : i32
    %0 = arith.cmpi eq, %arg0, %c0_i32 : i32
    %1 = arith.extui %0 : i1 to i32
    %c0_i32_0 = arith.constant 0 : i32
    %2 = arith.cmpi ne, %1, %c0_i32_0 : i32
    scf.if %2 {
      %cst_45 = arith.constant 0.000000e+00 : f32
      %93 = vector.broadcast %cst_45 : f32 to vector<2x32xf32>
      %c0_46 = arith.constant 0 : index
      %c0_47 = arith.constant 0 : index
      %94 = vector.load %arg13[%c0_46, %c0_47] : memref<2x32xf32, #tpu.memory_space<vmem>>, vector<2x32xf32>
      tpu.vector_store %arg13[%c0_46, %c0_47], %93 {strides = array<i32>} : memref<2x32xf32, #tpu.memory_space<vmem>>, vector<2x32xf32>,
      %cst_48 = arith.constant 0.000000e+00 : f32
      %95 = vector.broadcast %cst_48 : f32 to vector<2x32xf32>
      %c0_49 = arith.constant 0 : index
      %c0_50 = arith.constant 0 : index
      %96 = vector.load %arg14[%c0_49, %c0_50] : memref<2x32xf32, #tpu.memory_space<vmem>>, vector<2x32xf32>
      tpu.vector_store %arg14[%c0_49, %c0_50], %95 {strides = array<i32>} : memref<2x32xf32, #tpu.memory_space<vmem>>, vector<2x32xf32>,
    } else {
    }
    %c0 = arith.constant 0 : index
    %c0_1 = arith.constant 0 : index
    %c0_2 = arith.constant 0 : index
    %3 = vector.load %arg1[%c0, %c0_1, %c0_2] : memref<1x2x64xf32, #tpu.memory_space<vmem>>, vector<1x2x64xf32>
    %4 = vector.shape_cast %3 : vector<1x2x64xf32> to vector<2x64xf32>
    %c0_3 = arith.constant 0 : index
    %c0_4 = arith.constant 0 : index
    %5 = vector.load %arg13[%c0_3, %c0_4] : memref<2x32xf32, #tpu.memory_space<vmem>>, vector<2x32xf32>
    %6 = arith.truncf %4 : vector<2x64xf32> to vector<2x64xbf16>
    %c0_5 = arith.constant 0 : index
    %c0_6 = arith.constant 0 : index
    %7 = vector.load %arg3[%c0_5, %c0_6] : memref<64x96xbf16, #tpu.memory_space<vmem>>, vector<64x96xbf16>
    %cst = arith.constant dense<0.000000e+00> : vector<2x96xf32>
    %8 = tpu.matmul %6, %7, %cst {dimension_numbers = #tpu.dot_dimension_numbers<[1], [0], [0], [1], [0, 0, 1, 1], [], []>} : vector<2x64xbf16>, vector<64x96xbf16>, vector<2x96xf32> -> vector<2x96xf32>
    %c0_7 = arith.constant 0 : index
    %c0_8 = arith.constant 0 : index
    %9 = vector.load %arg5[%c0_7, %c0_8] : memref<1x96xf32, #tpu.memory_space<vmem>>, vector<1x96xf32>
    %10 = vector.broadcast %9 : vector<1x96xf32> to vector<2x96xf32>
    %11 = arith.addf %8, %10 : vector<2x96xf32>
    %12 = arith.truncf %5 : vector<2x32xf32> to vector<2x32xbf16>
    %c0_9 = arith.constant 0 : index
    %c0_10 = arith.constant 0 : index
    %13 = vector.load %arg4[%c0_9, %c0_10] : memref<32x96xbf16, #tpu.memory_space<vmem>>, vector<32x96xbf16>
    %cst_11 = arith.constant dense<0.000000e+00> : vector<2x96xf32>
    %14 = tpu.matmul %12, %13, %cst_11 {dimension_numbers = #tpu.dot_dimension_numbers<[1], [0], [0], [1], [0, 0, 1, 1], [], []>} : vector<2x32xbf16>, vector<32x96xbf16>, vector<2x96xf32> -> vector<2x96xf32>
    %c0_12 = arith.constant 0 : index
    %c0_13 = arith.constant 0 : index
    %15 = vector.load %arg6[%c0_12, %c0_13] : memref<1x96xf32, #tpu.memory_space<vmem>>, vector<1x96xf32>
    %16 = vector.broadcast %15 : vector<1x96xf32> to vector<2x96xf32>
    %17 = arith.addf %14, %16 : vector<2x96xf32>
    %18 = vector.extract_strided_slice %11 {offsets = [0, 0], sizes = [2, 32], strides = [1, 1]} : vector<2x96xf32> to vector<2x32xf32>
    %19 = vector.extract_strided_slice %17 {offsets = [0, 0], sizes = [2, 32], strides = [1, 1]} : vector<2x96xf32> to vector<2x32xf32>
    %20 = arith.addf %18, %19 : vector<2x32xf32>
    %21 = arith.negf %20 : vector<2x32xf32>
    %22 = math.exp %21 : vector<2x32xf32>
    %cst_14 = arith.constant 1.000000e+00 : f32
    %23 = vector.broadcast %cst_14 : f32 to vector<2x32xf32>
    %24 = arith.addf %23, %22 : vector<2x32xf32>
    %25 = arith.divf %23, %24 : vector<2x32xf32>
    %26 = vector.extract_strided_slice %11 {offsets = [0, 32], sizes = [2, 32], strides = [1, 1]} : vector<2x96xf32> to vector<2x32xf32>
    %27 = vector.extract_strided_slice %17 {offsets = [0, 32], sizes = [2, 32], strides = [1, 1]} : vector<2x96xf32> to vector<2x32xf32>
    %28 = arith.addf %26, %27 : vector<2x32xf32>
    %29 = arith.negf %28 : vector<2x32xf32>
    %30 = math.exp %29 : vector<2x32xf32>
    %cst_15 = arith.constant 1.000000e+00 : f32
    %31 = vector.broadcast %cst_15 : f32 to vector<2x32xf32>
    %32 = arith.addf %31, %30 : vector<2x32xf32>
    %33 = arith.divf %31, %32 : vector<2x32xf32>
    %34 = vector.extract_strided_slice %11 {offsets = [0, 64], sizes = [2, 32], strides = [1, 1]} : vector<2x96xf32> to vector<2x32xf32>
    %35 = vector.extract_strided_slice %17 {offsets = [0, 64], sizes = [2, 32], strides = [1, 1]} : vector<2x96xf32> to vector<2x32xf32>
    %36 = arith.mulf %25, %35 : vector<2x32xf32>
    %37 = arith.addf %34, %36 : vector<2x32xf32>
    %38 = math.tanh %37 : vector<2x32xf32>
    %cst_16 = arith.constant 1.000000e+00 : f32
    %39 = vector.broadcast %cst_16 : f32 to vector<2x32xf32>
    %40 = arith.subf %39, %33 : vector<2x32xf32>
    %41 = arith.mulf %40, %38 : vector<2x32xf32>
    %42 = arith.mulf %33, %5 : vector<2x32xf32>
    %43 = arith.addf %41, %42 : vector<2x32xf32>
    %c0_17 = arith.constant 0 : index
    %c0_18 = arith.constant 0 : index
    %44 = vector.load %arg13[%c0_17, %c0_18] : memref<2x32xf32, #tpu.memory_space<vmem>>, vector<2x32xf32>
    tpu.vector_store %arg13[%c0_17, %c0_18], %43 {strides = array<i32>} : memref<2x32xf32, #tpu.memory_space<vmem>>, vector<2x32xf32>,
    %c0_19 = arith.constant 0 : index
    %c0_20 = arith.constant 0 : index
    %c0_21 = arith.constant 0 : index
    %45 = vector.load %arg11[%c0_19, %c0_20, %c0_21] : memref<1x2x32xf32, #tpu.memory_space<vmem>>, vector<1x2x32xf32>
    %46 = vector.shape_cast %45 : vector<1x2x32xf32> to vector<2x32xf32>
    %47 = vector.shape_cast %43 : vector<2x32xf32> to vector<1x2x32xf32>
    tpu.vector_store %arg11[%c0_19, %c0_20, %c0_21], %47 {strides = array<i32>} : memref<1x2x32xf32, #tpu.memory_space<vmem>>, vector<1x2x32xf32>,
    %c0_22 = arith.constant 0 : index
    %c0_23 = arith.constant 0 : index
    %c0_24 = arith.constant 0 : index
    %48 = vector.load %arg2[%c0_22, %c0_23, %c0_24] : memref<1x2x64xf32, #tpu.memory_space<vmem>>, vector<1x2x64xf32>
    %49 = vector.shape_cast %48 : vector<1x2x64xf32> to vector<2x64xf32>
    %c0_25 = arith.constant 0 : index
    %c0_26 = arith.constant 0 : index
    %50 = vector.load %arg14[%c0_25, %c0_26] : memref<2x32xf32, #tpu.memory_space<vmem>>, vector<2x32xf32>
    %51 = arith.truncf %49 : vector<2x64xf32> to vector<2x64xbf16>
    %c0_27 = arith.constant 0 : index
    %c0_28 = arith.constant 0 : index
    %52 = vector.load %arg7[%c0_27, %c0_28] : memref<64x96xbf16, #tpu.memory_space<vmem>>, vector<64x96xbf16>
    %cst_29 = arith.constant dense<0.000000e+00> : vector<2x96xf32>
    %53 = tpu.matmul %51, %52, %cst_29 {dimension_numbers = #tpu.dot_dimension_numbers<[1], [0], [0], [1], [0, 0, 1, 1], [], []>} : vector<2x64xbf16>, vector<64x96xbf16>, vector<2x96xf32> -> vector<2x96xf32>
    %c0_30 = arith.constant 0 : index
    %c0_31 = arith.constant 0 : index
    %54 = vector.load %arg9[%c0_30, %c0_31] : memref<1x96xf32, #tpu.memory_space<vmem>>, vector<1x96xf32>
    %55 = vector.broadcast %54 : vector<1x96xf32> to vector<2x96xf32>
    %56 = arith.addf %53, %55 : vector<2x96xf32>
    %57 = arith.truncf %50 : vector<2x32xf32> to vector<2x32xbf16>
    %c0_32 = arith.constant 0 : index
    %c0_33 = arith.constant 0 : index
    %58 = vector.load %arg8[%c0_32, %c0_33] : memref<32x96xbf16, #tpu.memory_space<vmem>>, vector<32x96xbf16>
    %cst_34 = arith.constant dense<0.000000e+00> : vector<2x96xf32>
    %59 = tpu.matmul %57, %58, %cst_34 {dimension_numbers = #tpu.dot_dimension_numbers<[1], [0], [0], [1], [0, 0, 1, 1], [], []>} : vector<2x32xbf16>, vector<32x96xbf16>, vector<2x96xf32> -> vector<2x96xf32>
    %c0_35 = arith.constant 0 : index
    %c0_36 = arith.constant 0 : index
    %60 = vector.load %arg10[%c0_35, %c0_36] : memref<1x96xf32, #tpu.memory_space<vmem>>, vector<1x96xf32>
    %61 = vector.broadcast %60 : vector<1x96xf32> to vector<2x96xf32>
    %62 = arith.addf %59, %61 : vector<2x96xf32>
    %63 = vector.extract_strided_slice %56 {offsets = [0, 0], sizes = [2, 32], strides = [1, 1]} : vector<2x96xf32> to vector<2x32xf32>
    %64 = vector.extract_strided_slice %62 {offsets = [0, 0], sizes = [2, 32], strides = [1, 1]} : vector<2x96xf32> to vector<2x32xf32>
    %65 = arith.addf %63, %64 : vector<2x32xf32>
    %66 = arith.negf %65 : vector<2x32xf32>
    %67 = math.exp %66 : vector<2x32xf32>
    %cst_37 = arith.constant 1.000000e+00 : f32
    %68 = vector.broadcast %cst_37 : f32 to vector<2x32xf32>
    %69 = arith.addf %68, %67 : vector<2x32xf32>
    %70 = arith.divf %68, %69 : vector<2x32xf32>
    %71 = vector.extract_strided_slice %56 {offsets = [0, 32], sizes = [2, 32], strides = [1, 1]} : vector<2x96xf32> to vector<2x32xf32>
    %72 = vector.extract_strided_slice %62 {offsets = [0, 32], sizes = [2, 32], strides = [1, 1]} : vector<2x96xf32> to vector<2x32xf32>
    %73 = arith.addf %71, %72 : vector<2x32xf32>
    %74 = arith.negf %73 : vector<2x32xf32>
    %75 = math.exp %74 : vector<2x32xf32>
    %cst_38 = arith.constant 1.000000e+00 : f32
    %76 = vector.broadcast %cst_38 : f32 to vector<2x32xf32>
    %77 = arith.addf %76, %75 : vector<2x32xf32>
    %78 = arith.divf %76, %77 : vector<2x32xf32>
    %79 = vector.extract_strided_slice %56 {offsets = [0, 64], sizes = [2, 32], strides = [1, 1]} : vector<2x96xf32> to vector<2x32xf32>
    %80 = vector.extract_strided_slice %62 {offsets = [0, 64], sizes = [2, 32], strides = [1, 1]} : vector<2x96xf32> to vector<2x32xf32>
    %81 = arith.mulf %70, %80 : vector<2x32xf32>
    %82 = arith.addf %79, %81 : vector<2x32xf32>
    %83 = math.tanh %82 : vector<2x32xf32>
    %cst_39 = arith.constant 1.000000e+00 : f32
    %84 = vector.broadcast %cst_39 : f32 to vector<2x32xf32>
    %85 = arith.subf %84, %78 : vector<2x32xf32>
    %86 = arith.mulf %85, %83 : vector<2x32xf32>
    %87 = arith.mulf %78, %50 : vector<2x32xf32>
    %88 = arith.addf %86, %87 : vector<2x32xf32>
    %c0_40 = arith.constant 0 : index
    %c0_41 = arith.constant 0 : index
    %89 = vector.load %arg14[%c0_40, %c0_41] : memref<2x32xf32, #tpu.memory_space<vmem>>, vector<2x32xf32>
    tpu.vector_store %arg14[%c0_40, %c0_41], %88 {strides = array<i32>} : memref<2x32xf32, #tpu.memory_space<vmem>>, vector<2x32xf32>,
    %c0_42 = arith.constant 0 : index
    %c0_43 = arith.constant 0 : index
    %c0_44 = arith.constant 0 : index
    %90 = vector.load %arg12[%c0_42, %c0_43, %c0_44] : memref<1x2x32xf32, #tpu.memory_space<vmem>>, vector<1x2x32xf32>
    %91 = vector.shape_cast %90 : vector<1x2x32xf32> to vector<2x32xf32>
    %92 = vector.shape_cast %88 : vector<2x32xf32> to vector<1x2x32xf32>
    tpu.vector_store %arg12[%c0_42, %c0_43, %c0_44], %92 {strides = array<i32>} : memref<1x2x32xf32, #tpu.memory_space<vmem>>, vector<1x2x32xf32>,
    return
  }
  func.func @transform_0(%arg0: i32) -> (i32, i32, i32) {
    %c0_i32 = arith.constant 0 : i32
    %c0_i32_0 = arith.constant 0 : i32
    %c0_i32_1 = arith.constant 0 : i32
    return %arg0, %c0_i32, %c0_i32_0 : i32, i32, i32
  }
  func.func @transform_1(%arg0: i32) -> (i32, i32, i32) {
    %c3_i32 = arith.constant 3 : i32
    %0 = arith.subi %c3_i32, %arg0 : i32
    %c0_i32 = arith.constant 0 : i32
    %c0_i32_0 = arith.constant 0 : i32
    %c0_i32_1 = arith.constant 0 : i32
    return %0, %c0_i32, %c0_i32_0 : i32, i32, i32
  }
  func.func @transform_2(%arg0: i32) -> (i32, i32) {
    %c0_i32 = arith.constant 0 : i32
    %c0_i32_0 = arith.constant 0 : i32
    %c0_i32_1 = arith.constant 0 : i32
    return %c0_i32, %c0_i32_0 : i32, i32
  }
  func.func @transform_3(%arg0: i32) -> (i32, i32) {
    %c0_i32 = arith.constant 0 : i32
    %c0_i32_0 = arith.constant 0 : i32
    %c0_i32_1 = arith.constant 0 : i32
    return %c0_i32, %c0_i32_0 : i32, i32
  }
  func.func @transform_4(%arg0: i32) -> (i32, i32) {
    %c0_i32 = arith.constant 0 : i32
    %c0_i32_0 = arith.constant 0 : i32
    %c0_i32_1 = arith.constant 0 : i32
    return %c0_i32, %c0_i32_0 : i32, i32
  }
  func.func @transform_5(%arg0: i32) -> (i32, i32) {
    %c0_i32 = arith.constant 0 : i32
    %c0_i32_0 = arith.constant 0 : i32
    %c0_i32_1 = arith.constant 0 : i32
    return %c0_i32, %c0_i32_0 : i32, i32
  }
  func.func @transform_6(%arg0: i32) -> (i32, i32) {
    %c0_i32 = arith.constant 0 : i32
    %c0_i32_0 = arith.constant 0 : i32
    %c0_i32_1 = arith.constant 0 : i32
    return %c0_i32, %c0_i32_0 : i32, i32
  }
  func.func @transform_7(%arg0: i32) -> (i32, i32) {
    %c0_i32 = arith.constant 0 : i32
    %c0_i32_0 = arith.constant 0 : i32
    %c0_i32_1 = arith.constant 0 : i32
    return %c0_i32, %c0_i32_0 : i32, i32
  }
  func.func @transform_8(%arg0: i32) -> (i32, i32) {
    %c0_i32 = arith.constant 0 : i32
    %c0_i32_0 = arith.constant 0 : i32
    %c0_i32_1 = arith.constant 0 : i32
    return %c0_i32, %c0_i32_0 : i32, i32
  }
  func.func @transform_9(%arg0: i32) -> (i32, i32) {
    %c0_i32 = arith.constant 0 : i32
    %c0_i32_0 = arith.constant 0 : i32
    %c0_i32_1 = arith.constant 0 : i32
    return %c0_i32, %c0_i32_0 : i32, i32
  }
  func.func @transform_10(%arg0: i32) -> (i32, i32, i32) {
    %c0_i32 = arith.constant 0 : i32
    %c0_i32_0 = arith.constant 0 : i32
    %c0_i32_1 = arith.constant 0 : i32
    return %arg0, %c0_i32, %c0_i32_0 : i32, i32, i32
  }
  func.func @transform_11(%arg0: i32) -> (i32, i32, i32) {
    %c3_i32 = arith.constant 3 : i32
    %0 = arith.subi %c3_i32, %arg0 : i32
    %c0_i32 = arith.constant 0 : i32
    %c0_i32_0 = arith.constant 0 : i32
    %c0_i32_1 = arith.constant 0 : i32
    return %0, %c0_i32, %c0_i32_0 : i32, i32, i32
  }
}

module attributes {stable_mosaic.version = 11 : i64} {
  func.func @_attn_fnn_kernel(%arg0: i32, %arg1: memref<1x4x32xf32, #tpu.memory_space<vmem>>, %arg2: memref<32x96xbf16, #tpu.memory_space<vmem>>, %arg3: memref<1x96xf32, #tpu.memory_space<vmem>>, %arg4: memref<4x8x32xbf16, #tpu.memory_space<vmem>>, %arg5: memref<1x32xf32, #tpu.memory_space<vmem>>, %arg6: memref<32x12xbf16, #tpu.memory_space<vmem>>, %arg7: memref<1x12xf32, #tpu.memory_space<vmem>>, %arg8: memref<1x4x12xf32, #tpu.memory_space<vmem>>) attributes {dimension_semantics = [#tpu.dimension_semantics<parallel>], iteration_bounds = array<i64: 2>, scalar_prefetch = 0 : i64, scratch_operands = 0 : i64, tpu.core_type = #tpu.core_type<tc>, window_params = [{transform_indices = @transform_0, window_bounds = array<i64: 1, 4, 32>}, {pipeline_mode = #tpu.pipeline_mode<synchronous>, transform_indices = @transform_1, window_bounds = array<i64: 32, 96>}, {pipeline_mode = #tpu.pipeline_mode<synchronous>, transform_indices = @transform_2, window_bounds = array<i64: 1, 96>}, {pipeline_mode = #tpu.pipeline_mode<synchronous>, transform_indices = @transform_3, window_bounds = array<i64: 4, 8, 32>}, {pipeline_mode = #tpu.pipeline_mode<synchronous>, transform_indices = @transform_4, window_bounds = array<i64: 1, 32>}, {pipeline_mode = #tpu.pipeline_mode<synchronous>, transform_indices = @transform_5, window_bounds = array<i64: 32, 12>}, {pipeline_mode = #tpu.pipeline_mode<synchronous>, transform_indices = @transform_6, window_bounds = array<i64: 1, 12>}, {transform_indices = @transform_7, window_bounds = array<i64: 1, 4, 12>}]} {
    %c0 = arith.constant 0 : index
    %c0_0 = arith.constant 0 : index
    %c0_1 = arith.constant 0 : index
    %0 = vector.load %arg1[%c0, %c0_0, %c0_1] : memref<1x4x32xf32, #tpu.memory_space<vmem>>, vector<1x4x32xf32>
    %1 = vector.shape_cast %0 : vector<1x4x32xf32> to vector<4x32xf32>
    %2 = arith.truncf %1 : vector<4x32xf32> to vector<4x32xbf16>
    %c0_2 = arith.constant 0 : index
    %c0_3 = arith.constant 0 : index
    %3 = vector.load %arg2[%c0_2, %c0_3] : memref<32x96xbf16, #tpu.memory_space<vmem>>, vector<32x96xbf16>
    %cst = arith.constant dense<0.000000e+00> : vector<4x96xf32>
    %4 = tpu.matmul %2, %3, %cst {dimension_numbers = #tpu.dot_dimension_numbers<[1], [0], [0], [1], [0, 0, 1, 1], [], []>} : vector<4x32xbf16>, vector<32x96xbf16>, vector<4x96xf32> -> vector<4x96xf32>
    %c0_4 = arith.constant 0 : index
    %c0_5 = arith.constant 0 : index
    %5 = vector.load %arg3[%c0_4, %c0_5] : memref<1x96xf32, #tpu.memory_space<vmem>>, vector<1x96xf32>
    %6 = vector.broadcast %5 : vector<1x96xf32> to vector<4x96xf32>
    %7 = arith.addf %4, %6 : vector<4x96xf32>
    %8 = vector.extract_strided_slice %7 {offsets = [0, 0], sizes = [4, 32], strides = [1, 1]} : vector<4x96xf32> to vector<4x32xf32>
    %9 = vector.extract_strided_slice %7 {offsets = [0, 32], sizes = [4, 32], strides = [1, 1]} : vector<4x96xf32> to vector<4x32xf32>
    %10 = vector.extract_strided_slice %7 {offsets = [0, 64], sizes = [4, 32], strides = [1, 1]} : vector<4x96xf32> to vector<4x32xf32>
    %cst_6 = arith.constant 0.000000e+00 : f32
    %11 = vector.broadcast %cst_6 : f32 to vector<4x32xf32>
    %12 = vector.extract_strided_slice %8 {offsets = [0, 0], sizes = [4, 8], strides = [1, 1]} : vector<4x32xf32> to vector<4x8xf32>
    %13 = vector.extract_strided_slice %9 {offsets = [0, 0], sizes = [4, 8], strides = [1, 1]} : vector<4x32xf32> to vector<4x8xf32>
    %cst_7 = arith.constant dense<0.000000e+00> : vector<4x4xf32>
    %14 = tpu.matmul %12, %13, %cst_7 {dimension_numbers = #tpu.dot_dimension_numbers<[1], [1], [0], [0], [0, 0, 1, 0], [], []>} : vector<4x8xf32>, vector<4x8xf32>, vector<4x4xf32> -> vector<4x4xf32>
    %cst_8 = arith.constant 0.353553385 : f32
    %15 = vector.broadcast %cst_8 : f32 to vector<4x4xf32>
    %16 = arith.mulf %14, %15 : vector<4x4xf32>
    %cst_9 = arith.constant dense<0xFF800000> : vector<4xf32>
    %17 = vector.multi_reduction <maximumf>, %16, %cst_9 [1] : vector<4x4xf32> to vector<4xf32>
    %cst_10 = arith.constant 0xFF800000 : f32
    %18 = vector.broadcast %cst_10 : f32 to vector<4xf32>
    %19 = arith.maximumf %18, %17 : vector<4xf32>
    %20 = vector.shape_cast %19 : vector<4xf32> to vector<4x1xf32>
    %21 = vector.broadcast %20 : vector<4x1xf32> to vector<4x4xf32>
    %22 = arith.subf %16, %21 : vector<4x4xf32>
    %23 = math.exp %22 : vector<4x4xf32>
    %cst_11 = arith.constant dense<0.000000e+00> : vector<4xf32>
    %24 = vector.multi_reduction <add>, %23, %cst_11 [1] : vector<4x4xf32> to vector<4xf32>
    %25 = vector.shape_cast %24 : vector<4xf32> to vector<4x1xf32>
    %26 = vector.broadcast %25 : vector<4x1xf32> to vector<4x4xf32>
    %27 = arith.divf %23, %26 : vector<4x4xf32>
    %28 = vector.extract_strided_slice %10 {offsets = [0, 0], sizes = [4, 8], strides = [1, 1]} : vector<4x32xf32> to vector<4x8xf32>
    %cst_12 = arith.constant dense<0.000000e+00> : vector<4x8xf32>
    %29 = tpu.matmul %27, %28, %cst_12 {dimension_numbers = #tpu.dot_dimension_numbers<[1], [0], [0], [1], [0, 0, 1, 1], [], []>} : vector<4x4xf32>, vector<4x8xf32>, vector<4x8xf32> -> vector<4x8xf32>
    %30 = arith.truncf %29 : vector<4x8xf32> to vector<4x8xbf16>
    %c0_13 = arith.constant 0 : index
    %c0_14 = arith.constant 0 : index
    %c0_15 = arith.constant 0 : index
    %31 = vector.load %arg4[%c0_13, %c0_14, %c0_15] : memref<4x8x32xbf16, #tpu.memory_space<vmem>>, vector<1x8x32xbf16>
    %32 = vector.shape_cast %31 : vector<1x8x32xbf16> to vector<8x32xbf16>
    %cst_16 = arith.constant dense<0.000000e+00> : vector<4x32xf32>
    %33 = tpu.matmul %30, %32, %cst_16 {dimension_numbers = #tpu.dot_dimension_numbers<[1], [0], [0], [1], [0, 0, 1, 1], [], []>} : vector<4x8xbf16>, vector<8x32xbf16>, vector<4x32xf32> -> vector<4x32xf32>
    %34 = arith.addf %11, %33 : vector<4x32xf32>
    %35 = vector.extract_strided_slice %8 {offsets = [0, 8], sizes = [4, 8], strides = [1, 1]} : vector<4x32xf32> to vector<4x8xf32>
    %36 = vector.extract_strided_slice %9 {offsets = [0, 8], sizes = [4, 8], strides = [1, 1]} : vector<4x32xf32> to vector<4x8xf32>
    %cst_17 = arith.constant dense<0.000000e+00> : vector<4x4xf32>
    %37 = tpu.matmul %35, %36, %cst_17 {dimension_numbers = #tpu.dot_dimension_numbers<[1], [1], [0], [0], [0, 0, 1, 0], [], []>} : vector<4x8xf32>, vector<4x8xf32>, vector<4x4xf32> -> vector<4x4xf32>
    %cst_18 = arith.constant 0.353553385 : f32
    %38 = vector.broadcast %cst_18 : f32 to vector<4x4xf32>
    %39 = arith.mulf %37, %38 : vector<4x4xf32>
    %cst_19 = arith.constant dense<0xFF800000> : vector<4xf32>
    %40 = vector.multi_reduction <maximumf>, %39, %cst_19 [1] : vector<4x4xf32> to vector<4xf32>
    %cst_20 = arith.constant 0xFF800000 : f32
    %41 = vector.broadcast %cst_20 : f32 to vector<4xf32>
    %42 = arith.maximumf %41, %40 : vector<4xf32>
    %43 = vector.shape_cast %42 : vector<4xf32> to vector<4x1xf32>
    %44 = vector.broadcast %43 : vector<4x1xf32> to vector<4x4xf32>
    %45 = arith.subf %39, %44 : vector<4x4xf32>
    %46 = math.exp %45 : vector<4x4xf32>
    %cst_21 = arith.constant dense<0.000000e+00> : vector<4xf32>
    %47 = vector.multi_reduction <add>, %46, %cst_21 [1] : vector<4x4xf32> to vector<4xf32>
    %48 = vector.shape_cast %47 : vector<4xf32> to vector<4x1xf32>
    %49 = vector.broadcast %48 : vector<4x1xf32> to vector<4x4xf32>
    %50 = arith.divf %46, %49 : vector<4x4xf32>
    %51 = vector.extract_strided_slice %10 {offsets = [0, 8], sizes = [4, 8], strides = [1, 1]} : vector<4x32xf32> to vector<4x8xf32>
    %cst_22 = arith.constant dense<0.000000e+00> : vector<4x8xf32>
    %52 = tpu.matmul %50, %51, %cst_22 {dimension_numbers = #tpu.dot_dimension_numbers<[1], [0], [0], [1], [0, 0, 1, 1], [], []>} : vector<4x4xf32>, vector<4x8xf32>, vector<4x8xf32> -> vector<4x8xf32>
    %53 = arith.truncf %52 : vector<4x8xf32> to vector<4x8xbf16>
    %c1 = arith.constant 1 : index
    %c0_23 = arith.constant 0 : index
    %c0_24 = arith.constant 0 : index
    %54 = vector.load %arg4[%c1, %c0_23, %c0_24] : memref<4x8x32xbf16, #tpu.memory_space<vmem>>, vector<1x8x32xbf16>
    %55 = vector.shape_cast %54 : vector<1x8x32xbf16> to vector<8x32xbf16>
    %cst_25 = arith.constant dense<0.000000e+00> : vector<4x32xf32>
    %56 = tpu.matmul %53, %55, %cst_25 {dimension_numbers = #tpu.dot_dimension_numbers<[1], [0], [0], [1], [0, 0, 1, 1], [], []>} : vector<4x8xbf16>, vector<8x32xbf16>, vector<4x32xf32> -> vector<4x32xf32>
    %57 = arith.addf %34, %56 : vector<4x32xf32>
    %58 = vector.extract_strided_slice %8 {offsets = [0, 16], sizes = [4, 8], strides = [1, 1]} : vector<4x32xf32> to vector<4x8xf32>
    %59 = vector.extract_strided_slice %9 {offsets = [0, 16], sizes = [4, 8], strides = [1, 1]} : vector<4x32xf32> to vector<4x8xf32>
    %cst_26 = arith.constant dense<0.000000e+00> : vector<4x4xf32>
    %60 = tpu.matmul %58, %59, %cst_26 {dimension_numbers = #tpu.dot_dimension_numbers<[1], [1], [0], [0], [0, 0, 1, 0], [], []>} : vector<4x8xf32>, vector<4x8xf32>, vector<4x4xf32> -> vector<4x4xf32>
    %cst_27 = arith.constant 0.353553385 : f32
    %61 = vector.broadcast %cst_27 : f32 to vector<4x4xf32>
    %62 = arith.mulf %60, %61 : vector<4x4xf32>
    %cst_28 = arith.constant dense<0xFF800000> : vector<4xf32>
    %63 = vector.multi_reduction <maximumf>, %62, %cst_28 [1] : vector<4x4xf32> to vector<4xf32>
    %cst_29 = arith.constant 0xFF800000 : f32
    %64 = vector.broadcast %cst_29 : f32 to vector<4xf32>
    %65 = arith.maximumf %64, %63 : vector<4xf32>
    %66 = vector.shape_cast %65 : vector<4xf32> to vector<4x1xf32>
    %67 = vector.broadcast %66 : vector<4x1xf32> to vector<4x4xf32>
    %68 = arith.subf %62, %67 : vector<4x4xf32>
    %69 = math.exp %68 : vector<4x4xf32>
    %cst_30 = arith.constant dense<0.000000e+00> : vector<4xf32>
    %70 = vector.multi_reduction <add>, %69, %cst_30 [1] : vector<4x4xf32> to vector<4xf32>
    %71 = vector.shape_cast %70 : vector<4xf32> to vector<4x1xf32>
    %72 = vector.broadcast %71 : vector<4x1xf32> to vector<4x4xf32>
    %73 = arith.divf %69, %72 : vector<4x4xf32>
    %74 = vector.extract_strided_slice %10 {offsets = [0, 16], sizes = [4, 8], strides = [1, 1]} : vector<4x32xf32> to vector<4x8xf32>
    %cst_31 = arith.constant dense<0.000000e+00> : vector<4x8xf32>
    %75 = tpu.matmul %73, %74, %cst_31 {dimension_numbers = #tpu.dot_dimension_numbers<[1], [0], [0], [1], [0, 0, 1, 1], [], []>} : vector<4x4xf32>, vector<4x8xf32>, vector<4x8xf32> -> vector<4x8xf32>
    %76 = arith.truncf %75 : vector<4x8xf32> to vector<4x8xbf16>
    %c2 = arith.constant 2 : index
    %c0_32 = arith.constant 0 : index
    %c0_33 = arith.constant 0 : index
    %77 = vector.load %arg4[%c2, %c0_32, %c0_33] : memref<4x8x32xbf16, #tpu.memory_space<vmem>>, vector<1x8x32xbf16>
    %78 = vector.shape_cast %77 : vector<1x8x32xbf16> to vector<8x32xbf16>
    %cst_34 = arith.constant dense<0.000000e+00> : vector<4x32xf32>
    %79 = tpu.matmul %76, %78, %cst_34 {dimension_numbers = #tpu.dot_dimension_numbers<[1], [0], [0], [1], [0, 0, 1, 1], [], []>} : vector<4x8xbf16>, vector<8x32xbf16>, vector<4x32xf32> -> vector<4x32xf32>
    %80 = arith.addf %57, %79 : vector<4x32xf32>
    %81 = vector.extract_strided_slice %8 {offsets = [0, 24], sizes = [4, 8], strides = [1, 1]} : vector<4x32xf32> to vector<4x8xf32>
    %82 = vector.extract_strided_slice %9 {offsets = [0, 24], sizes = [4, 8], strides = [1, 1]} : vector<4x32xf32> to vector<4x8xf32>
    %cst_35 = arith.constant dense<0.000000e+00> : vector<4x4xf32>
    %83 = tpu.matmul %81, %82, %cst_35 {dimension_numbers = #tpu.dot_dimension_numbers<[1], [1], [0], [0], [0, 0, 1, 0], [], []>} : vector<4x8xf32>, vector<4x8xf32>, vector<4x4xf32> -> vector<4x4xf32>
    %cst_36 = arith.constant 0.353553385 : f32
    %84 = vector.broadcast %cst_36 : f32 to vector<4x4xf32>
    %85 = arith.mulf %83, %84 : vector<4x4xf32>
    %cst_37 = arith.constant dense<0xFF800000> : vector<4xf32>
    %86 = vector.multi_reduction <maximumf>, %85, %cst_37 [1] : vector<4x4xf32> to vector<4xf32>
    %cst_38 = arith.constant 0xFF800000 : f32
    %87 = vector.broadcast %cst_38 : f32 to vector<4xf32>
    %88 = arith.maximumf %87, %86 : vector<4xf32>
    %89 = vector.shape_cast %88 : vector<4xf32> to vector<4x1xf32>
    %90 = vector.broadcast %89 : vector<4x1xf32> to vector<4x4xf32>
    %91 = arith.subf %85, %90 : vector<4x4xf32>
    %92 = math.exp %91 : vector<4x4xf32>
    %cst_39 = arith.constant dense<0.000000e+00> : vector<4xf32>
    %93 = vector.multi_reduction <add>, %92, %cst_39 [1] : vector<4x4xf32> to vector<4xf32>
    %94 = vector.shape_cast %93 : vector<4xf32> to vector<4x1xf32>
    %95 = vector.broadcast %94 : vector<4x1xf32> to vector<4x4xf32>
    %96 = arith.divf %92, %95 : vector<4x4xf32>
    %97 = vector.extract_strided_slice %10 {offsets = [0, 24], sizes = [4, 8], strides = [1, 1]} : vector<4x32xf32> to vector<4x8xf32>
    %cst_40 = arith.constant dense<0.000000e+00> : vector<4x8xf32>
    %98 = tpu.matmul %96, %97, %cst_40 {dimension_numbers = #tpu.dot_dimension_numbers<[1], [0], [0], [1], [0, 0, 1, 1], [], []>} : vector<4x4xf32>, vector<4x8xf32>, vector<4x8xf32> -> vector<4x8xf32>
    %99 = arith.truncf %98 : vector<4x8xf32> to vector<4x8xbf16>
    %c3 = arith.constant 3 : index
    %c0_41 = arith.constant 0 : index
    %c0_42 = arith.constant 0 : index
    %100 = vector.load %arg4[%c3, %c0_41, %c0_42] : memref<4x8x32xbf16, #tpu.memory_space<vmem>>, vector<1x8x32xbf16>
    %101 = vector.shape_cast %100 : vector<1x8x32xbf16> to vector<8x32xbf16>
    %cst_43 = arith.constant dense<0.000000e+00> : vector<4x32xf32>
    %102 = tpu.matmul %99, %101, %cst_43 {dimension_numbers = #tpu.dot_dimension_numbers<[1], [0], [0], [1], [0, 0, 1, 1], [], []>} : vector<4x8xbf16>, vector<8x32xbf16>, vector<4x32xf32> -> vector<4x32xf32>
    %103 = arith.addf %80, %102 : vector<4x32xf32>
    %c0_44 = arith.constant 0 : index
    %c0_45 = arith.constant 0 : index
    %104 = vector.load %arg5[%c0_44, %c0_45] : memref<1x32xf32, #tpu.memory_space<vmem>>, vector<1x32xf32>
    %105 = vector.broadcast %104 : vector<1x32xf32> to vector<4x32xf32>
    %106 = arith.addf %103, %105 : vector<4x32xf32>
    %107 = math.tanh %106 : vector<4x32xf32>
    %108 = arith.truncf %107 : vector<4x32xf32> to vector<4x32xbf16>
    %c0_46 = arith.constant 0 : index
    %c0_47 = arith.constant 0 : index
    %109 = vector.load %arg6[%c0_46, %c0_47] : memref<32x12xbf16, #tpu.memory_space<vmem>>, vector<32x12xbf16>
    %cst_48 = arith.constant dense<0.000000e+00> : vector<4x12xf32>
    %110 = tpu.matmul %108, %109, %cst_48 {dimension_numbers = #tpu.dot_dimension_numbers<[1], [0], [0], [1], [0, 0, 1, 1], [], []>} : vector<4x32xbf16>, vector<32x12xbf16>, vector<4x12xf32> -> vector<4x12xf32>
    %c0_49 = arith.constant 0 : index
    %c0_50 = arith.constant 0 : index
    %111 = vector.load %arg7[%c0_49, %c0_50] : memref<1x12xf32, #tpu.memory_space<vmem>>, vector<1x12xf32>
    %112 = vector.broadcast %111 : vector<1x12xf32> to vector<4x12xf32>
    %113 = arith.addf %110, %112 : vector<4x12xf32>
    %114 = math.tanh %113 : vector<4x12xf32>
    %c0_51 = arith.constant 0 : index
    %c0_52 = arith.constant 0 : index
    %c0_53 = arith.constant 0 : index
    %115 = vector.load %arg8[%c0_51, %c0_52, %c0_53] : memref<1x4x12xf32, #tpu.memory_space<vmem>>, vector<1x4x12xf32>
    %116 = vector.shape_cast %115 : vector<1x4x12xf32> to vector<4x12xf32>
    %117 = vector.shape_cast %114 : vector<4x12xf32> to vector<1x4x12xf32>
    tpu.vector_store %arg8[%c0_51, %c0_52, %c0_53], %117 {strides = array<i32>} : memref<1x4x12xf32, #tpu.memory_space<vmem>>, vector<1x4x12xf32>,
    return
  }
  func.func @transform_0(%arg0: i32) -> (i32, i32, i32) {
    %c0_i32 = arith.constant 0 : i32
    %c0_i32_0 = arith.constant 0 : i32
    %c0_i32_1 = arith.constant 0 : i32
    return %arg0, %c0_i32, %c0_i32_0 : i32, i32, i32
  }
  func.func @transform_1(%arg0: i32) -> (i32, i32) {
    %c0_i32 = arith.constant 0 : i32
    %c0_i32_0 = arith.constant 0 : i32
    %c0_i32_1 = arith.constant 0 : i32
    return %c0_i32, %c0_i32_0 : i32, i32
  }
  func.func @transform_2(%arg0: i32) -> (i32, i32) {
    %c0_i32 = arith.constant 0 : i32
    %c0_i32_0 = arith.constant 0 : i32
    %c0_i32_1 = arith.constant 0 : i32
    return %c0_i32, %c0_i32_0 : i32, i32
  }
  func.func @transform_3(%arg0: i32) -> (i32, i32, i32) {
    %c0_i32 = arith.constant 0 : i32
    %c0_i32_0 = arith.constant 0 : i32
    %c0_i32_1 = arith.constant 0 : i32
    %c0_i32_2 = arith.constant 0 : i32
    return %c0_i32, %c0_i32_0, %c0_i32_1 : i32, i32, i32
  }
  func.func @transform_4(%arg0: i32) -> (i32, i32) {
    %c0_i32 = arith.constant 0 : i32
    %c0_i32_0 = arith.constant 0 : i32
    %c0_i32_1 = arith.constant 0 : i32
    return %c0_i32, %c0_i32_0 : i32, i32
  }
  func.func @transform_5(%arg0: i32) -> (i32, i32) {
    %c0_i32 = arith.constant 0 : i32
    %c0_i32_0 = arith.constant 0 : i32
    %c0_i32_1 = arith.constant 0 : i32
    return %c0_i32, %c0_i32_0 : i32, i32
  }
  func.func @transform_6(%arg0: i32) -> (i32, i32) {
    %c0_i32 = arith.constant 0 : i32
    %c0_i32_0 = arith.constant 0 : i32
    %c0_i32_1 = arith.constant 0 : i32
    return %c0_i32, %c0_i32_0 : i32, i32
  }
  func.func @transform_7(%arg0: i32) -> (i32, i32, i32) {
    %c0_i32 = arith.constant 0 : i32
    %c0_i32_0 = arith.constant 0 : i32
    %c0_i32_1 = arith.constant 0 : i32
    return %arg0, %c0_i32, %c0_i32_0 : i32, i32, i32
  }
}

</mosaic_0001>

<bundles_post_ra>
// kernel: crnn_forward.5
= control target key start
LH: loop header
LB: loop body
LE: loop exit
PB: predicated region body
PF: predicated region fallthrough
CT: control target
= control target key end

     0   :  { %s1162_s30 = smov 0   ;;  %s1330_s0 = inlined_call_operand.vmem [shape: bf16[2,128,36], index: 0, kind: input, shape index: {}]   ;;  %s1331_s1 = inlined_call_operand.vmem [shape: bf16[36,16], index: 1, kind: input, shape index: {}]   ;;  %s1332_s2 = inlined_call_operand.vmem [shape: f32[1,16], index: 2, kind: input, shape index: {}]   ;;  %s1333_s3 = inlined_call_operand.vmem [shape: f32[1,16], index: 3, kind: input, shape index: {}]   ;;  %s1334_s4 = inlined_call_operand.vmem [shape: f32[2,1,128], index: 4, kind: input, shape index: {}]   ;;  %s1335_s5 = inlined_call_operand.vmem [shape: bf16[128,16], index: 5, kind: input, shape index: {}]   ;;  %s1336_s6 = inlined_call_operand.vmem [shape: f32[1,16], index: 6, kind: input, shape index: {}]   ;;  %s1337_s7 = inlined_call_operand.vmem [shape: bf16[128,16], index: 7, kind: input, shape index: {}]   ;;  %s1338_s8 = inlined_call_operand.vmem [shape: f32[1,16], index: 8, kind: input, shape index: {}]   ;;  %s1339_s9 = inlined_call_operand.vmem [shape: f32[2,32,16], index: 9, kind: output, shape index: {}]  }
   0x1 LB: > { %s923_s10 = sadd.s32 4294967295, %s1108_s30   ;;  %p927_p0 = scmp.ge.s32.totalorder %s1108_s30, 1  ;;  %s1108_s30 = sphi %s1162_s30, %s19_s30  }
   0x2   : > { %p295_p1 = scmp.lt.s32.totalorder %s1108_s30, 3 }
   0x4   : > { %p296_p2 = pnand %p927_p0, %p295_p1 }
   0x5   : > { %v1075_v0 = vld [vmem:[%s1331_s1] sm:$0xff] (!%p296_p2)   ;;  %v1076_v1 = vld [vmem:[%s1331_s1 + $0x8] sm:$0xff] (!%p296_p2)   ;;  %v1110_v2 = vmov (!%p296_p2), 0.0   ;;  %p334_p3 = scmp.lt.s32.totalorder (!%p296_p2), %s923_s10, 1  ;;  %vm449_vm0 = vcmask (!%p296_p2), 1041408   ;;  %vm424_vm1 = vcmask (!%p296_p2), 293888  }
   0x6   : > { %299 = sbr.rel (%p296_p2) target bundleno = 272 (0x110), region = 56  ;;  %1024 = vmatprep.subr.bf16.mxu1 (!%p296_p2), %v1110_v2  ;;  %1002 = vmatprep.subr.bf16.mxu0 (!%p296_p2), %v1075_v0  ;;  %v1077_v3 = vld [vmem:[%s1335_s5] sm:$0xff] (!%p296_p2)   ;;  %v1078_v4 = vld [vmem:[%s1331_s1 + $0x10] ss:$0 sps:$4 sm:$0x33] (!%p296_p2)   ;;  %v1080_v5 = vld [vmem:[%s1335_s5 + $0x8] sm:$0xff] (!%p296_p2)  }
   0x7   : > { %1003 = vmatpush3.bf16.msra.mxu0 (!%p296_p2), %v1075_v0  ;;  %1025 = vmatpush3.bf16.msra.mxu1 (!%p296_p2), %v1077_v3  ;;  %v1083_v6 = vld [vmem:[%s1335_s5 + $0x10] sm:$0xff] (!%p296_p2)   ;;  %v451_v7 = vsel (!%p296_p2), %vm449_vm0, %v1078_v4, 0  ;;  %v1082_v9 = vld [vmem:[%s1337_s7] sm:$0xff] (!%p296_p2)   ;;  %vm1111_vm2 = vmmov (!%p296_p2), 0   ;;  %v1086_v12 = vld [vmem:[%s1335_s5 + $0x18] sm:$0xff] (!%p296_p2)   ;;  %vm854_vm3 = vcmask (!%p296_p2), 130048  }
   0x8   : > { %1004 = vmatprep.subr.bf16.mxu0 (!%p296_p2), %v1076_v1  ;;  %1026 = vmatprep.subr.bf16.mxu1 (!%p296_p2), %v1110_v2  ;;  %v1084_v13 = vld [vmem:[%s1337_s7 + $0x8] sm:$0xff] (!%p296_p2)   ;;  %v1089_v14 = vld [vmem:[%s1335_s5 + $0x20] sm:$0xff] (!%p296_p2)   ;;  %v1088_v16 = vld [vmem:[%s1337_s7 + $0x10] sm:$0xff] (!%p296_p2)  }
   0x9   : > { %1040 = vmatprep.mubr.msk.bf16.mxu1 (!%p296_p2), %vm1111_vm2, %v1110_v2  ;;  %v1092_v18 = vld [vmem:[%s1335_s5 + $0x28] sm:$0xff] (!%p296_p2)   ;;  %v1090_v19 = vld [vmem:[%s1337_s7 + $0x18] sm:$0xff] (!%p296_p2)   ;;  %v1095_v20 = vld [vmem:[%s1335_s5 + $0x30] sm:$0xff] (!%p296_p2)  }
   0xa   : > { %v1094_v22 = vld [vmem:[%s1337_s7 + $0x20] sm:$0xff] (!%p296_p2)   ;;  %v1098_v24 = vld [vmem:[%s1335_s5 + $0x38] sm:$0xff] (!%p296_p2)   ;;  %v1096_v26 = vld [vmem:[%s1337_s7 + $0x28] sm:$0xff] (!%p296_p2)  }
   0xb   : > { %1005 = vmatpush3.bf16.msra.mxu0 (!%p296_p2), %v1076_v1  ;;  %1027 = vmatpush3.bf16.msra.mxu1 (!%p296_p2), %v1080_v5  ;;  %v1100_v29 = vld [vmem:[%s1337_s7 + $0x30] sm:$0xff] (!%p296_p2)   ;;  %v1101_v30 = vld [vmem:[%s1337_s7 + $0x38] sm:$0xff] (!%p296_p2)   ;;  %v1278_v33 = vld [vmem:[%s1332_s2] ss:$0 sm:$0xff] (!%p296_p2) }
   0xc   : > { %1064 = vmatprep.subr.msk.bf16.mxu0 (!%p296_p2), %vm449_vm0, %v1078_v4  ;;  %1028 = vmatprep.subr.bf16.mxu1 (!%p296_p2), %v1110_v2  ;;  %v1284_v37 = vld [vmem:[%s1333_s3] ss:$0 sm:$0xff] (!%p296_p2) }
   0xd   : > { %s1341_s10 = smov (!%p334_p3, %s923_s10), 1 }
   0xe   : > { %s971_s21 = sshll.u32 %s1341_s10, 6  ;;  %s341_s27 = scalar_lea.vmem %s1334_s4, %s1341_s10 }
   0xf   : > { %s1193_s24 = scalar_lea.vmem %s1330_s0, %s971_s21  ;;  %1007 = vmatpush3.bf16.msra.mxu0 %v451_v7  ;;  %1029 = vmatpush3.bf16.msra.mxu1 %v1083_v6  ;;  %v624_v25 = vld [vmem:[%s341_s27] sm:$0x1]  ;;  %v838_v7 = vlaneseq  ;;  %s972_s27 = sshll.u32 %s1341_s10, 5 }
  0x10   : > { %v1079_v8 = vld [vmem:[%s1193_s24] sm:$0xff]   ;;  %v1081_v10 = vld [vmem:[%s1193_s24 + $0x8] sm:$0xff]   ;;  %v1085_v11 = vld [vmem:[%s1193_s24 + $0x10] sm:$0xff]   ;;  %1044 = vmatprep.subr.bf16.mxu0 %v1110_v2  ;;  %1030 = vmatprep.subr.bf16.mxu1 %v1110_v2  ;;  %v625_v27 = vpack.c.bf16 %v624_v25, %v624_v25  ;;  %s346_s11 = scalar_lea.vmem %s1339_s9, %s972_s27 }
  0x11   : > { %1008 = vmatprep.mubr.msk.bf16.mxu0 %vm424_vm1, %v1079_v8  ;;  %v1087_v15 = vld [vmem:[%s1193_s24 + $0x18] sm:$0xff]   ;;  %v1091_v17 = vld [vmem:[%s1193_s24 + $0x20] sm:$0xff]   ;;  %v1093_v21 = vld [vmem:[%s1193_s24 + $0x28] sm:$0xff]  }
  0x12   : > { %1009 = vmatmul.mubr.msk.bf16.vlgmr.msra.gmra.mrb[0].mxu0 %vm424_vm1, %v1081_v10  ;;  %v1097_v23 = vld [vmem:[%s1193_s24 + $0x30] sm:$0xff]   ;;  %v1099_v28 = vld [vmem:[%s1193_s24 + $0x38] sm:$0xff]  }
  0x13   : > { %1045 = vmatpush3.bf16.msra.mxu0 %v1082_v9  ;;  %1012 = vmatprep.mubr.msk.bf16.mxu0 %vm424_vm1, %v1085_v11 }
  0x14   : > { %1046 = vmatprep.subr.bf16.mxu0 %v1110_v2  ;;  %1031 = vmatpush3.bf16.msra.mxu1 %v1086_v12 }
  0x15   : > { %1032 = vmatprep.subr.bf16.mxu1 %v1110_v2 }
  0x17   : > { %1047 = vmatpush3.bf16.msra.mxu0 %v1084_v13 }
  0x18   : > { %1048 = vmatprep.subr.bf16.mxu0 %v1110_v2  ;;  %1033 = vmatpush3.bf16.msra.mxu1 %v1089_v14  ;;  %v642_v14 = vld [vmem:[%s1336_s6] sm:$0x1] }
  0x19   : > { %1034 = vmatprep.subr.bf16.mxu1 %v1110_v2 }
  0x1a   : > { %1013 = vmatmul.mubr.msk.bf16.gmra.mrb[4].mxu0 %vm424_vm1, %v1087_v15 }
  0x1b   : > { %1049 = vmatpush3.bf16.msra.mxu0 %v1088_v16  ;;  %1016 = vmatprep.mubr.msk.bf16.mxu0 %vm424_vm1, %v1091_v17 }
  0x1c   : > { %1050 = vmatprep.subr.bf16.mxu0 %v1110_v2  ;;  %1035 = vmatpush3.bf16.msra.mxu1 %v1092_v18 }
  0x1d   : > { %1036 = vmatprep.subr.bf16.mxu1 %v1110_v2 }
  0x1f   : > { %1051 = vmatpush3.bf16.msra.mxu0 %v1090_v19 }
  0x20   : > { %1052 = vmatprep.subr.bf16.mxu0 %v1110_v2  ;;  %1037 = vmatpush3.bf16.msra.mxu1 %v1095_v20  ;;  %v839_v20 = vshrl.u32 %v838_v7, 7 }
  0x21   : > { %1038 = vmatprep.subr.bf16.mxu1 %v1110_v2 }
  0x22   : > { %1017 = vmatmul.mubr.msk.bf16.gmra.mrb[8].mxu0 %vm424_vm1, %v1093_v21 }
  0x23   : > { %1053 = vmatpush3.bf16.msra.mxu0 %v1094_v22  ;;  %1020 = vmatprep.mubr.msk.bf16.mxu0 %vm424_vm1, %v1097_v23 }
  0x24   : > { %1054 = vmatprep.subr.bf16.mxu0 %v1110_v2  ;;  %1039 = vmatpush3.bf16.msra.mxu1 %v1098_v24 }
  0x27   : > { %1055 = vmatpush3.bf16.msra.mxu0 %v1096_v26  ;;  %1041 = vmatmul.mubr.bf16.vlgmr.msra.gmra.mrb[0].mxu1 %v625_v27 }
  0x28   : > { %1056 = vmatprep.subr.bf16.mxu0 %v1110_v2 }
  0x2a   : > { %1021 = vmatmul.mubr.msk.bf16.gmra.mrb[12].mxu0 %vm424_vm1, %v1099_v28 }
  0x2b   : > { %1057 = vmatpush3.bf16.msra.mxu0 %v1100_v29  ;;  %1060 = vmatprep.mubr.msk.bf16.mxu0 %vm1111_vm2, %v1110_v2 }
  0x2c   : > { %1058 = vmatprep.subr.bf16.mxu0 %v1110_v2 }
  0x2f   : > { %1059 = vmatpush3.bf16.msra.mxu0 %v1101_v30 }
  0x32   : > { %1061 = vmatmul.mubr.bf16.vlgmr.msra.gmra.mrb[16].mxu0 %v625_v27 }
  0xe5   : > { %v1010_v31 = vpop.f32.mrb[0].mxu0 }
  0xe6   : > { %v487_v32 = vpop.f32.mrb[1].mxu0  ;;  %v559_v36 = vmul.f32 %v1010_v31, %v1278_v33 }
  0xe7   : > { %v1011_v34 = vpop.f32.mrb[2].mxu0  ;;  %v557_v38 = vmul.f32 %v1278_v33, %v487_v32 }
  0xe8   : > { %v490_v35 = vpop.f32.mrb[3].mxu0  ;;  %v560_v39 = vmul.f32 %v1011_v34, %v1278_v33  ;;  %v582_v42 = vadd.f32 %v1284_v37, %v559_v36 }
  0xe9   : > { %v558_v40 = vmul.f32 %v1278_v33, %v490_v35  ;;  %v580_v45 = vadd.f32 %v1284_v37, %v557_v38  ;;  %v840_v38 = vsub.s32 0, %v839_v20 }
  0xea   : > { %v583_v48 = vadd.f32 %v1284_v37, %v560_v39  ;;  %v598_v55 = vmax.f32 %v582_v42, 0.0 }
  0xeb   : > { %v581_v52 = vadd.f32 %v1284_v37, %v558_v40  ;;  %v596_v58 = vmax.f32 %v580_v45, 0.0 }
  0xec   : > { %v599_v61 = vmax.f32 %v583_v48, 0.0 }
  0xed   : > { %v1014_v41 = vpop.f32.mrb[4].mxu0  ;;  %v597_v0 = vmax.f32 %v581_v52, 0.0  ;;  %v748_v52 = vld [vmem:[%s1338_s8] sm:$0x1] }
  0xee   : > { %v563_v43 = vmul.f32 %v1014_v41, %v1278_v33  ;;  %v503_v44 = vpop.f32.mrb[5].mxu0 }
  0xef   : > { %v561_v46 = vmul.f32 %v1278_v33, %v503_v44  ;;  %v1015_v47 = vpop.f32.mrb[6].mxu0 }
  0xf0   : > { %v586_v49 = vadd.f32 %v1284_v37, %v563_v43  ;;  %v564_v50 = vmul.f32 %v1015_v47, %v1278_v33  ;;  %v506_v51 = vpop.f32.mrb[7].mxu0 }
  0xf1   : > { %v584_v53 = vadd.f32 %v1284_v37, %v561_v46  ;;  %v562_v54 = vmul.f32 %v1278_v33, %v506_v51 }
  0xf2   : > { %v602_v56 = vmax.f32 %v586_v49, 0.0  ;;  %v587_v57 = vadd.f32 %v1284_v37, %v564_v50 }
  0xf3   : > { %v600_v59 = vmax.f32 %v584_v53, 0.0  ;;  %v585_v60 = vadd.f32 %v1284_v37, %v562_v54 }
  0xf4   : > { %v614_v62 = vmax.f32 %v598_v55, %v602_v56  ;;  %v603_v63 = vmax.f32 %v587_v57, 0.0 }
  0xf5   : > { %v612_v1 = vmax.f32 %v596_v58, %v600_v59  ;;  %v601_v2 = vmax.f32 %v585_v60, 0.0  ;;  %v1018_v3 = vpop.f32.mrb[8].mxu0 }
  0xf6   : > { %v615_v4 = vmax.f32 %v599_v61, %v603_v63  ;;  %v567_v5 = vmul.f32 %v1018_v3, %v1278_v33  ;;  %v519_v6 = vpop.f32.mrb[9].mxu0 }
  0xf7   : > { %v613_v8 = vmax.f32 %v597_v0, %v601_v2  ;;  %v565_v9 = vmul.f32 %v1278_v33, %v519_v6  ;;  %v1019_v10 = vpop.f32.mrb[10].mxu0 }
  0xf8   : > { %v590_v11 = vadd.f32 %v1284_v37, %v567_v5  ;;  %v568_v12 = vmul.f32 %v1019_v10, %v1278_v33  ;;  %v522_v13 = vpop.f32.mrb[11].mxu0 }
  0xf9   : > { %v588_v15 = vadd.f32 %v1284_v37, %v565_v9  ;;  %v566_v16 = vmul.f32 %v1278_v33, %v522_v13 }
  0xfa   : > { %v606_v17 = vmax.f32 %v590_v11, 0.0  ;;  %v591_v18 = vadd.f32 %v1284_v37, %v568_v12  ;;  %v725_v19 = vpop.f32.mrb[0].mxu1 }
  0xfb   : > { %v604_v21 = vmax.f32 %v588_v15, 0.0  ;;  %v589_v22 = vadd.f32 %v1284_v37, %v566_v16  ;;  %v726_v23 = vadd.f32 %v725_v19, %v642_v14  ;;  %v1042_v24 = vpop.f32.mrb[1].mxu1 }
  0xfc   : > { %v618_v25 = vmax.f32 %v614_v62, %v606_v17  ;;  %v607_v26 = vmax.f32 %v591_v18, 0.0  ;;  %v728_v27 = vpop.f32.mrb[2].mxu1 }
  0xfd   : > { %v616_v28 = vmax.f32 %v612_v1, %v604_v21  ;;  %v605_v29 = vmax.f32 %v589_v22, 0.0  ;;  %v1022_v30 = vpop.f32.mrb[12].mxu0  ;;  %v1043_v31 = vpop.f32.mrb[3].mxu1  ;;  %v731_v36 = vmax.f32 %v726_v23, 0.0 }
  0xfe   : > { %v619_v32 = vmax.f32 %v615_v4, %v607_v26  ;;  %v571_v34 = vmul.f32 %v1022_v30, %v1278_v33  ;;  %v535_v35 = vpop.f32.mrb[13].mxu0 }
  0xff   : > { %v617_v39 = vmax.f32 %v613_v8, %v605_v29  ;;  %v569_v40 = vmul.f32 %v1278_v33, %v535_v35  ;;  %v1023_v41 = vpop.f32.mrb[14].mxu0  ;;  %v841_v49 = vrot.slane %v731_v36, %v840_v38 }
 0x100   : > { %v594_v42 = vadd.f32 %v1284_v37, %v571_v34  ;;  %v572_v43 = vmul.f32 %v1023_v41, %v1278_v33  ;;  %v538_v44 = vpop.f32.mrb[15].mxu0 }
 0x101   : > { %v592_v45 = vadd.f32 %v1284_v37, %v569_v40  ;;  %v570_v46 = vmul.f32 %v1278_v33, %v538_v44 }
 0x102   : > { %v610_v47 = vmax.f32 %v594_v42, 0.0  ;;  %v595_v48 = vadd.f32 %v1284_v37, %v572_v43 }
 0x103   : > { %v608_v50 = vmax.f32 %v592_v45, 0.0  ;;  %v593_v51 = vadd.f32 %v1284_v37, %v570_v46 }
 0x104   : > { %v622_v53 = vmax.f32 %v618_v25, %v610_v47  ;;  %v611_v54 = vmax.f32 %v595_v48, 0.0 }
 0x105   : > { %v620_v55 = vmax.f32 %v616_v28, %v608_v50  ;;  %v609_v56 = vmax.f32 %v593_v51, 0.0  ;;  %v831_v57 = vpop.f32.mrb[16].mxu0 }
 0x106   : > { %v623_v58 = vmax.f32 %v619_v32, %v611_v54  ;;  %v844_v59 = vmul.f32 %v841_v49, %v622_v53  ;;  %v832_v33 = vadd.f32 %v831_v57, %v748_v52  ;;  %v1062_v60 = vpop.f32.mrb[17].mxu0 }
 0x107   : > { %v842_v61 = vmul.f32 %v841_v49, %v620_v55  ;;  %v621_v62 = vmax.f32 %v617_v39, %v609_v56  ;;  %v834_v63 = vpop.f32.mrb[18].mxu0 }
 0x108   : > { %v845_v0 = vmul.f32 %v841_v49, %v623_v58  ;;  %v837_v1 = vmax.f32 %v832_v33, 0.0  ;;  %v1063_v37 = vpop.f32.mrb[19].mxu0 }
 0x109   : > { %v843_v2 = vmul.f32 %v841_v49, %v621_v62 }
 0x10a   : > { %v849_v3 = vrot.slane %v837_v1, %v840_v38 }
 0x10c   : > { %v850_v4 = vadd.f32 %v849_v3, %v842_v61  ;;  %v851_v5 = vadd.f32 %v849_v3, %v843_v2  ;;  %v852_v6 = vadd.f32 %v849_v3, %v844_v59  ;;  %v853_v7 = vadd.f32 %v849_v3, %v845_v0 }
 0x10e   : > { %855 = vst.msk [vmem:[%s346_s11] sm:$0xff] %vm854_vm3, %v850_v4  ;;  %856 = vst.msk [vmem:[%s346_s11 + $0x8] sm:$0xff] %vm854_vm3, %v851_v5 }
 0x10f   : > { %857 = vst.msk [vmem:[%s346_s11 + $0x10] sm:$0xff] %vm854_vm3, %v852_v6  ;;  %858 = vst.msk [vmem:[%s346_s11 + $0x18] sm:$0xff] %vm854_vm3, %v853_v7 }
 0x110 PF: > { %s19_s30 = sadd.s32 1, %s1108_s30  }
 0x111   : > { %p16_p4 = scmp.ge.s32.totalorder %s19_s30, 4  }
 0x113   :  { %18 = sbr.rel (!%p16_p4) target bundleno = 1 (0x1), region = 89 }

// kernel: crnn_forward.6
= control target key start
LH: loop header
LB: loop body
LE: loop exit
PB: predicated region body
PF: predicated region fallthrough
CT: control target
= control target key end

     0   :  { %s1017_s30 = smov 0   ;;  %s1158_s0 = inlined_call_operand.vmem [shape: bf16[2,32,144], index: 0, kind: input, shape index: {}]   ;;  %s1159_s1 = inlined_call_operand.vmem [shape: bf16[144,16], index: 1, kind: input, shape index: {}]   ;;  %s1160_s2 = inlined_call_operand.vmem [shape: f32[1,16], index: 2, kind: input, shape index: {}]   ;;  %s1161_s3 = inlined_call_operand.vmem [shape: f32[1,16], index: 3, kind: input, shape index: {}]   ;;  %s1162_s4 = inlined_call_operand.vmem [shape: f32[2,1,128], index: 4, kind: input, shape index: {}]   ;;  %s1163_s5 = inlined_call_operand.vmem [shape: bf16[128,16], index: 5, kind: input, shape index: {}]   ;;  %s1164_s6 = inlined_call_operand.vmem [shape: f32[1,16], index: 6, kind: input, shape index: {}]   ;;  %s1165_s7 = inlined_call_operand.vmem [shape: bf16[128,16], index: 7, kind: input, shape index: {}]   ;;  %s1166_s8 = inlined_call_operand.vmem [shape: f32[1,16], index: 8, kind: input, shape index: {}]   ;;  %s1167_s9 = inlined_call_operand.vmem [shape: f32[2,8,16], index: 9, kind: output, shape index: {}]  }
   0x1 LB: > { %s812_s10 = sadd.s32 4294967295, %s962_s30   ;;  %p816_p0 = scmp.ge.s32.totalorder %s962_s30, 1  ;;  %s962_s30 = sphi %s1017_s30, %s19_s30  }
   0x2   : > { %p295_p1 = scmp.lt.s32.totalorder %s962_s30, 3 }
   0x4   : > { %p296_p2 = pnand %p816_p0, %p295_p1 }
   0x5   : > { %v964_v0 = vmov (!%p296_p2), 0   ;;  %v965_v1 = vmov (!%p296_p2), 0.0   ;;  %v925_v2 = vld [vmem:[%s1159_s1] sm:$0xff] (!%p296_p2)   ;;  %vm966_vm0 = vmmov (!%p296_p2), 0   ;;  %v927_v4 = vld [vmem:[%s1159_s1 + $0x8] sm:$0xff] (!%p296_p2)   ;;  %v929_v6 = vld [vmem:[%s1159_s1 + $0x10] sm:$0xff] (!%p296_p2)   ;;  %v739_v46 = vlaneseq (!%p296_p2) }
   0x6   : > { %299 = sbr.rel (%p296_p2) target bundleno = 292 (0x124), region = 56  ;;  %447 = vmatprep.subr.bf16.mxu0 (!%p296_p2), %v964_v0  ;;  %874 = vmatprep.subr.bf16.mxu1 (!%p296_p2), %v965_v1  ;;  %v926_v3 = vld [vmem:[%s1163_s5] sm:$0xff] (!%p296_p2)   ;;  %v928_v5 = vld [vmem:[%s1163_s5 + $0x8] sm:$0xff] (!%p296_p2)   ;;  %p333_p3 = scmp.lt.s32.totalorder (!%p296_p2), %s812_s10, 1  ;;  %v930_v7 = vld [vmem:[%s1163_s5 + $0x10] sm:$0xff] (!%p296_p2)   ;;  %vm440_vm1 = vcmask (!%p296_p2), 130048  }
   0x7   : > { %890 = vmatprep.mubr.msk.bf16.mxu1 (!%p296_p2), %vm966_vm0, %v965_v1  ;;  %448 = vmatpush1.bf16.msra.mxu0 (!%p296_p2), %v925_v2  ;;  %v931_v8 = vld [vmem:[%s1159_s1 + $0x18] sm:$0xff] (!%p296_p2)   ;;  %v933_v10 = vld [vmem:[%s1159_s1 + $0x20] sm:$0xff] (!%p296_p2)   ;;  %v935_v12 = vld [vmem:[%s1159_s1 + $0x28] sm:$0xff] (!%p296_p2)   ;;  %v740_v53 = vshrl.u32 (!%p296_p2), %v739_v46, 7 }
   0x8   : > { %875 = vmatpush3.bf16.msra.mxu1 (!%p296_p2), %v926_v3  ;;  %449 = vmatprep.subr.bf16.mxu0 (!%p296_p2), %v964_v0  ;;  %v932_v9 = vld [vmem:[%s1163_s5 + $0x18] sm:$0xff] (!%p296_p2)   ;;  %v934_v11 = vld [vmem:[%s1163_s5 + $0x20] sm:$0xff] (!%p296_p2)   ;;  %v936_v14 = vld [vmem:[%s1163_s5 + $0x28] sm:$0xff] (!%p296_p2)  }
   0x9   : > { %876 = vmatprep.subr.bf16.mxu1 (!%p296_p2), %v965_v1  ;;  %v937_v15 = vld [vmem:[%s1159_s1 + $0x30] sm:$0xff] (!%p296_p2)   ;;  %v939_v17 = vld [vmem:[%s1159_s1 + $0x38] sm:$0xff] (!%p296_p2)   ;;  %v941_v21 = vld [vmem:[%s1159_s1 + $0x40] sm:$0xff] (!%p296_p2)   ;;  %v741_v62 = vsub.s32 (!%p296_p2), 0, %v740_v53 }
   0xa   : > { %v938_v16 = vld [vmem:[%s1163_s5 + $0x30] sm:$0xff] (!%p296_p2)   ;;  %v940_v18 = vld [vmem:[%s1163_s5 + $0x38] sm:$0xff] (!%p296_p2)   ;;  %v942_v22 = vld [vmem:[%s1165_s7] sm:$0xff] (!%p296_p2)  }
   0xb   : > { %450 = vmatpush1.bf16.msra.mxu0 (!%p296_p2), %v927_v4  ;;  %v946_v25 = vld [vmem:[%s1165_s7 + $0x8] sm:$0xff] (!%p296_p2)   ;;  %v947_v26 = vld [vmem:[%s1165_s7 + $0x10] sm:$0xff] (!%p296_p2)   ;;  %v951_v28 = vld [vmem:[%s1165_s7 + $0x18] sm:$0xff] (!%p296_p2)  }
   0xc   : > { %877 = vmatpush3.bf16.msra.mxu1 (!%p296_p2), %v928_v5  ;;  %451 = vmatprep.subr.bf16.mxu0 (!%p296_p2), %v964_v0  ;;  %v952_v29 = vld [vmem:[%s1165_s7 + $0x20] sm:$0xff] (!%p296_p2)   ;;  %v953_v30 = vld [vmem:[%s1165_s7 + $0x28] sm:$0xff] (!%p296_p2)   ;;  %v954_v31 = vld [vmem:[%s1165_s7 + $0x30] sm:$0xff] (!%p296_p2)  }
   0xd   : > { %878 = vmatprep.subr.bf16.mxu1 %v965_v1  ;;  %s1169_s10 = smov (!%p333_p3, %s812_s10), 1  ;;  %v955_v32 = vld [vmem:[%s1165_s7 + $0x38] sm:$0xff]   ;;  %v835_v35 = vld [vmem:[%s1160_s2] ss:$0 sm:$0xff] }
   0xe   : > { %s855_s27 = sshll.u32 %s1169_s10, 5  ;;  %s340_s26 = scalar_lea.vmem %s1162_s4, %s1169_s10  ;;  %v836_v39 = vld [vmem:[%s1161_s3] ss:$0 sm:$0xff] }
   0xf   : > { %452 = vmatpush1.bf16.msra.mxu0 %v929_v6  ;;  %s1067_s15 = scalar_lea.vmem %s1158_s0, %s855_s27  ;;  %v525_v19 = vld [vmem:[%s340_s26] sm:$0x1]  ;;  %s819_s20 = sshll.u32 %s1169_s10, 3 }
  0x10   : > { %879 = vmatpush3.bf16.msra.mxu1 %v930_v7  ;;  %453 = vmatprep.subr.bf16.mxu0 %v964_v0  ;;  %v945_v13 = vld [vmem:[%s1067_s15 + $0x4] ss:$8 sps:$4 sm:$0xff]   ;;  %v526_v20 = vpack.c.bf16 %v525_v19, %v525_v19  ;;  %v943_v23 = vld [vmem:[%s1067_s15] ss:$8 sps:$4 sm:$0xff]   ;;  %v948_v24 = vld [vmem:[%s1067_s15 + $0x14] ss:$8 sps:$4 sm:$0xff]   ;;  %s344_s23 = scalar_lea.vmem %s1167_s9, %s819_s20 }
  0x11   : > { %880 = vmatprep.subr.bf16.mxu1 %v965_v1  ;;  %833 = vmatprep.mubr.msk.bf16.mxu0 %vm440_vm1, %v945_v13  ;;  %v950_v27 = vld [vmem:[%s1067_s15 + $0x10] ss:$8 sps:$4 sm:$0xff]   ;;  %v543_v49 = vld [vmem:[%s1164_s6] sm:$0x1] }
  0x12   : > { %v649_v6 = vld [vmem:[%s1166_s8] sm:$0x1] }
  0x13   : > { %454 = vmatpush1.bf16.msra.mxu0 %v931_v8 }
  0x14   : > { %881 = vmatpush3.bf16.msra.mxu1 %v932_v9  ;;  %455 = vmatprep.subr.bf16.mxu0 %v964_v0 }
  0x15   : > { %882 = vmatprep.subr.bf16.mxu1 %v965_v1 }
  0x17   : > { %456 = vmatpush1.bf16.msra.mxu0 %v933_v10 }
  0x18   : > { %883 = vmatpush3.bf16.msra.mxu1 %v934_v11  ;;  %457 = vmatprep.subr.bf16.mxu0 %v964_v0 }
  0x19   : > { %884 = vmatprep.subr.bf16.mxu1 %v965_v1 }
  0x1b   : > { %458 = vmatpush1.bf16.msra.mxu0 %v935_v12 }
  0x1c   : > { %885 = vmatpush3.bf16.msra.mxu1 %v936_v14  ;;  %459 = vmatprep.subr.bf16.mxu0 %v964_v0 }
  0x1d   : > { %886 = vmatprep.subr.bf16.mxu1 %v965_v1 }
  0x1f   : > { %460 = vmatpush1.bf16.msra.mxu0 %v937_v15 }
  0x20   : > { %887 = vmatpush3.bf16.msra.mxu1 %v938_v16  ;;  %461 = vmatprep.subr.bf16.mxu0 %v964_v0 }
  0x21   : > { %888 = vmatprep.subr.bf16.mxu1 %v965_v1 }
  0x23   : > { %462 = vmatpush1.bf16.msra.mxu0 %v939_v17 }
  0x24   : > { %889 = vmatpush3.bf16.msra.mxu1 %v940_v18  ;;  %463 = vmatprep.subr.bf16.mxu0 %v964_v0 }
  0x25   : > { %894 = vmatprep.subr.bf16.mxu1 %v965_v1 }
  0x27   : > { %891 = vmatmul.mubr.bf16.vlgmr.msra.gmra.mrb[0].mxu1 %v526_v20  ;;  %464 = vmatpush1.bf16.msra.mxu0 %v941_v21 }
  0x28   : > { %895 = vmatpush3.bf16.msra.mxu1 %v942_v22  ;;  %910 = vmatprep.mubr.msk.bf16.mxu1 %vm966_vm0, %v965_v1 }
  0x29   : > { %896 = vmatprep.subr.bf16.mxu1 %v965_v1 }
  0x2a   : > { %480 = vmatmul.mubr.bf16.vlgmr.msra.gmra.mrb[0].mxu0 %v943_v23 }
  0x2b   : > { %834 = vmatprep.mubr.msk.bf16.mxu0 %vm440_vm1, %v948_v24 }
  0x2c   : > { %897 = vmatpush3.bf16.msra.mxu1 %v946_v25 }
  0x2d   : > { %898 = vmatprep.subr.bf16.mxu1 %v965_v1 }
  0x30   : > { %899 = vmatpush3.bf16.msra.mxu1 %v947_v26 }
  0x31   : > { %900 = vmatprep.subr.bf16.mxu1 %v965_v1 }
  0x32   : > { %488 = vmatmul.mubr.bf16.gmra.mrb[4].mxu0 %v950_v27 }
  0x34   : > { %901 = vmatpush3.bf16.msra.mxu1 %v951_v28 }
  0x35   : > { %902 = vmatprep.subr.bf16.mxu1 %v965_v1 }
  0x38   : > { %903 = vmatpush3.bf16.msra.mxu1 %v952_v29 }
  0x39   : > { %904 = vmatprep.subr.bf16.mxu1 %v965_v1 }
  0x3c   : > { %905 = vmatpush3.bf16.msra.mxu1 %v953_v30 }
  0x3d   : > { %906 = vmatprep.subr.bf16.mxu1 %v965_v1 }
  0x40   : > { %907 = vmatpush3.bf16.msra.mxu1 %v954_v31 }
  0x41   : > { %908 = vmatprep.subr.bf16.mxu1 %v965_v1 }
  0x44   : > { %909 = vmatpush3.bf16.msra.mxu1 %v955_v32 }
  0x47   : > { %911 = vmatmul.mubr.bf16.vlgmr.msra.gmra.mrb[4].mxu1 %v526_v20 }
  0xfa   : > { %v626_v33 = vpop.f32.mrb[0].mxu1 }
  0xfb   : > { %v892_v34 = vpop.f32.mrb[1].mxu1  ;;  %v627_v52 = vadd.f32 %v626_v33, %v543_v49 }
  0xfc   : > { %v629_v36 = vpop.f32.mrb[2].mxu1 }
  0xfd   : > { %v893_v37 = vpop.f32.mrb[3].mxu1  ;;  %v481_v38 = vpop.f32.mrb[0].mxu0  ;;  %v632_v61 = vmax.f32 %v627_v52, 0.0 }
  0xfe   : > { %v503_v40 = vmul.f32 %v835_v35, %v481_v38  ;;  %v483_v41 = vpop.f32.mrb[1].mxu0 }
  0xff   : > { %v484_v42 = vpop.f32.mrb[2].mxu0  ;;  %v742_v3 = vrot.slane %v632_v61, %v741_v62 }
 0x100   : > { %v514_v43 = vadd.f32 %v836_v39, %v503_v40  ;;  %v504_v44 = vmul.f32 %v835_v35, %v484_v42  ;;  %v486_v45 = vpop.f32.mrb[3].mxu0 }
 0x102   : > { %v518_v47 = vmax.f32 %v514_v43, 0.0  ;;  %v515_v48 = vadd.f32 %v836_v39, %v504_v44 }
 0x104   : > { %v519_v50 = vmax.f32 %v515_v48, 0.0 }
 0x105   : > { %v489_v51 = vpop.f32.mrb[4].mxu0 }
 0x106   : > { %v522_v54 = vmax.f32 %v518_v47, %v519_v50  ;;  %v505_v55 = vmul.f32 %v835_v35, %v489_v51  ;;  %v491_v56 = vpop.f32.mrb[5].mxu0 }
 0x107   : > { %v492_v57 = vpop.f32.mrb[6].mxu0 }
 0x108   : > { %v516_v58 = vadd.f32 %v836_v39, %v505_v55  ;;  %v506_v59 = vmul.f32 %v835_v35, %v492_v57  ;;  %v494_v60 = vpop.f32.mrb[7].mxu0 }
 0x10a   : > { %v520_v63 = vmax.f32 %v516_v58, 0.0  ;;  %v517_v0 = vadd.f32 %v836_v39, %v506_v59 }
 0x10c   : > { %v523_v1 = vmax.f32 %v522_v54, %v520_v63  ;;  %v521_v2 = vmax.f32 %v517_v0, 0.0 }
 0x10e   : > { %v524_v4 = vmax.f32 %v523_v1, %v521_v2 }
 0x110   : > { %v743_v5 = vmul.f32 %v742_v3, %v524_v4 }
 0x11a   : > { %v732_v7 = vpop.f32.mrb[4].mxu1 }
 0x11b   : > { %v733_v8 = vadd.f32 %v732_v7, %v649_v6  ;;  %v912_v9 = vpop.f32.mrb[5].mxu1 }
 0x11c   : > { %v735_v10 = vpop.f32.mrb[6].mxu1 }
 0x11d   : > { %v738_v11 = vmax.f32 %v733_v8, 0.0  ;;  %v913_v12 = vpop.f32.mrb[7].mxu1 }
 0x11f   : > { %v747_v13 = vrot.slane %v738_v11, %v741_v62 }
 0x121   : > { %v748_v14 = vadd.f32 %v747_v13, %v743_v5 }
 0x123   : > { %749 = vst.msk [vmem:[%s344_s23] sm:$0xff] %vm440_vm1, %v748_v14 }
 0x124 PF: > { %s19_s30 = sadd.s32 1, %s962_s30  }
 0x125   : > { %p16_p4 = scmp.ge.s32.totalorder %s19_s30, 4  }
 0x127   :  { %18 = sbr.rel (!%p16_p4) target bundleno = 1 (0x1), region = 89 }

// kernel: crnn_forward.7
= control target key start
LH: loop header
LB: loop body
LE: loop exit
PB: predicated region body
PF: predicated region fallthrough
CT: control target
= control target key end

     0   :  { %s1057_s17 = smov 0   ;;  %s1142_s0 = inlined_call_operand.vmem [shape: f32[4,2,32], index: 0, kind: input, shape index: {}, may-alias: {0,1}]   ;;  %s1143_s1 = inlined_call_operand.vmem [shape: f32[4,2,32], index: 1, kind: input, shape index: {}, may-alias: {0,1}]   ;;  %s1144_s2 = inlined_call_operand.vmem [shape: bf16[32,96], index: 2, kind: input, shape index: {}]   ;;  %s1145_s3 = inlined_call_operand.vmem [shape: bf16[32,96], index: 3, kind: input, shape index: {}]   ;;  %s1146_s4 = inlined_call_operand.vmem [shape: f32[1,96], index: 4, kind: input, shape index: {}]   ;;  %s1147_s5 = inlined_call_operand.vmem [shape: f32[1,96], index: 5, kind: input, shape index: {}]   ;;  %s1148_s6 = inlined_call_operand.vmem [shape: bf16[32,96], index: 6, kind: input, shape index: {}]   ;;  %s1149_s7 = inlined_call_operand.vmem [shape: bf16[32,96], index: 7, kind: input, shape index: {}]   ;;  %s1150_s8 = inlined_call_operand.vmem [shape: f32[1,96], index: 8, kind: input, shape index: {}]   ;;  %s1151_s9 = inlined_call_operand.vmem [shape: f32[1,96], index: 9, kind: input, shape index: {}]   ;;  %s1152_s10 = inlined_call_operand.vmem [shape: f32[4,2,32], index: 10, kind: output, shape index: {0}]   ;;  %s1153_s11 = inlined_call_operand.vmem [shape: f32[4,2,32], index: 11, kind: output, shape index: {1}]  }
   0x1 LB: > { %s875_s18 = sadd.s32 4294967295, %s989_s17   ;;  %p879_p0 = scmp.ge.s32.totalorder %s989_s17, 1  ;;  %s989_s17 = sphi %s1057_s17, %s22_s17  }
   0x2   : > { %p354_p1 = scmp.lt.s32.totalorder %s989_s17, 5 }
   0x4   : > { %p355_p2 = pnand %p879_p0, %p354_p1 }
   0x5   : > { %p402_p3 = scmp.lt.s32.totalorder (!%p355_p2), %s875_s18, 3  ;;  %s406_s19 = ssub.s32 (!%p355_p2), 3, %s875_s18 }
   0x6   : > { %358 = sbr.rel (%p355_p2) target bundleno = 732 (0x2dc), region = 60  ;;  %p407_p4 = scmp.lt.s32.totalorder (!%p355_p2), %s406_s19, 3 }
   0x7   : > { %p884_p5 = scmp.ne.s32.totalorder (!%p355_p2), %s875_s18, 0 }
   0xd   : > { %s403_s20 = scalar_select %p402_p3, %s875_s18, 3 }
   0xe   : > { %s1155_s19 = smov (!%p407_p4, %s406_s19), 3  ;;  %426 = sbr.rel (%p884_p5) target bundleno = 21 (0x15), region = 64 }
   0xf   : > { %s880_s21 = sshll.u32 %s403_s20, 1  ;;  %s881_s25 = sshll.u32 %s1155_s19, 1  ;;  %vm427_vm0 = vcmask (!%p884_p5), 254976   ;;  %v991_v0 = vmov (!%p884_p5), 0.0  }
  0x10   : > { %s405_s24 = scalar_lea.vmem %s1142_s0, %s880_s21  ;;  %s1071_s28 = scalar_lea.vmem %s1143_s1, %s881_s25  ;;  %428 = vst.msk [vmem:[#allocation2] sm:$0x3] (!%p884_p5), %vm427_vm0, %v991_v0  ;;  %429 = vst.msk [vmem:[#allocation3] sm:$0x3] (!%p884_p5), %vm427_vm0, %v991_v0 }
  0x11   : > { %s1076_s12 = scalar_lea.vmem %s1152_s10, %s880_s21  ;;  %s1081_s15 = scalar_lea.vmem %s1153_s11, %s881_s25 }
  0x15 PF: > { %v963_v1 = vld [vmem:[%s1145_s3] sm:$0xff]   ;;  %v992_v2 = vmov 0.0   ;;  %v965_v4 = vld [vmem:[%s1145_s3 + $0x8] sm:$0xff]   ;;  %vm993_vm1 = vmmov 0   ;;  %vm456_vm2 = vcmask 261120   ;;  %s995_s27 = smov 32  }
  0x16   : > { %925 = vmatprep.subr.bf16.mxu1 %v992_v2  ;;  %917 = vmatprep.subr.bf16.mxu0 %v992_v2  ;;  %v964_v3 = vld [vmem:[%s1144_s2] sm:$0xff]   ;;  %v966_v5 = vld [vmem:[%s1144_s2 + $0x8] sm:$0xff]   ;;  %s996_s29 = smov 96   ;;  %vm601_vm3 = vcmask 254976  }
  0x17   : > { %926 = vmatpush3.bf16.msra.mxu1 %v963_v1  ;;  %929 = vmatprep.mubr.msk.bf16.mxu1 %vm993_vm1, %v992_v2  ;;  %v1097_v6 = vld [vmem:[#allocation2] sm:$0x3]  ;;  %v969_v12 = vld [vmem:[%s1149_s7 + $0x8] sm:$0xff]   ;;  %v605_v13 = vld [vmem:[#allocation3] sm:$0x3] }
  0x18   : > { %918 = vmatpush3.bf16.msra.mxu0 %v964_v3  ;;  %927 = vmatprep.subr.bf16.mxu1 %v992_v2  ;;  %v430_v7 = vld [vmem:[%s405_s24] sm:$0x3]  ;;  %v500_v8 = vpack.c.bf16 %v1097_v6, %v1097_v6  ;;  %v970_v14 = vld [vmem:[%s1148_s6 + $0x8] sm:$0xff]   ;;  %v673_v16 = vpack.c.bf16 %v605_v13, %v605_v13 }
  0x19   : > { %919 = vmatprep.subr.bf16.mxu0 %v992_v2  ;;  %921 = vmatprep.mubr.msk.bf16.mxu0 %vm993_vm1, %v992_v2  ;;  %v432_v9 = vpack.c.bf16 %v430_v7, %v430_v7  ;;  %v967_v10 = vld [vmem:[%s1149_s7] sm:$0xff]  }
  0x1a   : > { %v968_v11 = vld [vmem:[%s1148_s6] sm:$0xff]  }
  0x1b   : > { %928 = vmatpush3.bf16.msra.mxu1 %v965_v4  ;;  %v604_v15 = vld [vmem:[%s1071_s28] sm:$0x3]  ;;  %s994_s28 = smov 64  }
  0x1c   : > { %920 = vmatpush3.bf16.msra.mxu0 %v966_v5  ;;  %941 = vmatprep.subr.bf16.mxu1 %v992_v2  ;;  %v606_v17 = vpack.c.bf16 %v604_v15, %v604_v15  ;;  %v889_v18 = vld [vmem:[%s1147_s5] ss:$0 sm:$0xff] }
  0x1d   : > { %933 = vmatprep.subr.bf16.mxu0 %v992_v2  ;;  %v898_v28 = vld [vmem:[%s1151_s9] ss:$0 sm:$0xff] }
  0x1e   : > { %930 = vmatmul.mubr.msk.bf16.vlgmr.msra.gmra.mrb[0].mxu1 %vm456_vm2, %v500_v8  ;;  %v885_v38 = vld [vmem:[%s1146_s4] ss:$0 sm:$0xff] }
  0x1f   : > { %922 = vmatmul.mubr.msk.bf16.vlgmr.msra.gmra.mrb[0].mxu0 %vm456_vm2, %v432_v9  ;;  %942 = vmatpush3.bf16.msra.mxu1 %v967_v10  ;;  %v894_v41 = vld [vmem:[%s1150_s8] ss:$0 sm:$0xff] }
  0x20   : > { %934 = vmatpush3.bf16.msra.mxu0 %v968_v11  ;;  %943 = vmatprep.subr.bf16.mxu1 %v992_v2 }
  0x21   : > { %935 = vmatprep.subr.bf16.mxu0 %v992_v2  ;;  %945 = vmatprep.mubr.msk.bf16.mxu1 %vm993_vm1, %v992_v2 }
  0x22   : > { %937 = vmatprep.mubr.msk.bf16.mxu0 %vm993_vm1, %v992_v2 }
  0x23   : > { %944 = vmatpush3.bf16.msra.mxu1 %v969_v12 }
  0x24   : > { %936 = vmatpush3.bf16.msra.mxu0 %v970_v14 }
  0x26   : > { %946 = vmatmul.mubr.msk.bf16.vlgmr.msra.gmra.mrb[4].mxu1 %vm456_vm2, %v673_v16 }
  0x27   : > { %938 = vmatmul.mubr.msk.bf16.vlgmr.msra.gmra.mrb[4].mxu0 %vm456_vm2, %v606_v17 }
  0xf1   : > { %v561_v19 = vpop.f32.mrb[0].mxu1 }
  0xf2   : > { %v562_v20 = vadd.f32 %v889_v18, %v561_v19  ;;  %v494_v21 = vpop.f32.mrb[0].mxu0  ;;  %v931_v22 = vpop.f32.mrb[1].mxu1 }
  0xf3   : > { %v564_v23 = vpop.f32.mrb[2].mxu1  ;;  %v923_v24 = vpop.f32.mrb[1].mxu0  ;;  %v495_v39 = vadd.f32 %v885_v38, %v494_v21 }
  0xf4   : > { %575 = vrot.lane.b32.xlu0 %v562_v20, %s994_s28  ;;  %v932_v25 = vpop.f32.mrb[3].mxu1  ;;  %v497_v26 = vpop.f32.mrb[2].mxu0 }
  0xf5   : > { %v924_v27 = vpop.f32.mrb[3].mxu0  ;;  %v567_v40 = vadd.f32 %v562_v20, %v495_v39 }
  0xf7   : > { %v893_v42 = vmul.f32 -1.442695, %v567_v40 }
  0xf9   : > { %v734_v29 = vpop.f32.mrb[4].mxu1  ;;  %971 = vpow2.f32 %v893_v42 }
  0xfa   : > { %v735_v30 = vadd.f32 %v898_v28, %v734_v29  ;;  %v667_v31 = vpop.f32.mrb[4].mxu0  ;;  %v947_v32 = vpop.f32.mrb[5].mxu1 }
  0xfb   : > { %v737_v33 = vpop.f32.mrb[6].mxu1  ;;  %v939_v34 = vpop.f32.mrb[5].mxu0  ;;  %v668_v43 = vadd.f32 %v894_v41, %v667_v31 }
  0xfc   : > { %748 = vrot.lane.b32.xlu0 %v735_v30, %s994_s28  ;;  %v948_v35 = vpop.f32.mrb[7].mxu1  ;;  %v670_v36 = vpop.f32.mrb[6].mxu0 }
  0xfd   : > { %v940_v37 = vpop.f32.mrb[7].mxu0  ;;  %v740_v44 = vadd.f32 %v735_v30, %v668_v43 }
  0xff   : > { %v902_v45 = vmul.f32 -1.442695, %v740_v44 }
 0x101   : > { %973 = vpow2.f32 %v902_v45 }
 0x103   : > { %v972_v46 = vpop.eup %971 }
 0x104   : > { %v571_v47 = vadd.f32 1.0, %v972_v46 }
 0x106   : > { %975 = vrcp.f32 %v571_v47 }
 0x10b   : > { %v974_v48 = vpop.eup %973 }
 0x10c   : > { %v744_v49 = vadd.f32 1.0, %v974_v48 }
 0x10e   : > { %977 = vrcp.f32 %v744_v49 }
 0x110   : > { %v976_v50 = vpop.eup %975 }
 0x111   : > { %v585_v63 = vsub.f32 1.0, %v976_v50 }
 0x118   : > { %v978_v53 = vpop.eup %977 }
 0x119   : > { %v758_v5 = vsub.f32 1.0, %v978_v53 }
 0x166   : > { %v576_v51 = vpop.permute.xlu0 %575 }
 0x167   : > { %v578_v52 = vmul.f32 %v976_v50, %v576_v51 }
 0x169   : > { %580 = vrot.lane.b32.xlu1 %v578_v52, %s994_s28 }
 0x16e   : > { %v749_v54 = vpop.permute.xlu0 %748 }
 0x16f   : > { %v751_v55 = vmul.f32 %v978_v53, %v749_v54 }
 0x171   : > { %753 = vrot.lane.b32.xlu1 %v751_v55, %s994_s28 }
 0x175   : > { %592 = vrot.lane.b32.xlu1 %v1097_v6, %s995_s27 }
 0x179   : > { %765 = vrot.lane.b32.xlu1 %v605_v13, %s995_s27 }
 0x1db   : > { %v581_v56 = vpop.permute.xlu1 %580 }
 0x1dc   : > { %v583_v57 = vadd.f32 %v581_v56, %v495_v39 }
 0x1de   : > { %979 = vtanh.f32 %v583_v57 }
 0x1e3   : > { %v754_v58 = vpop.permute.xlu1 %753 }
 0x1e4   : > { %v756_v59 = vadd.f32 %v754_v58, %v668_v43 }
 0x1e6   : > { %981 = vtanh.f32 %v756_v59 }
 0x1e7   : > { %v593_v62 = vpop.permute.xlu1 %592 }
 0x1e8   : > { %v980_v60 = vpop.eup %979  ;;  %v595_v1 = vmul.f32 %v976_v50, %v593_v62 }
 0x1e9   : > { %587 = vrot.lane.b32.xlu0 %v980_v60, %s996_s29 }
 0x1eb   : > { %v766_v4 = vpop.permute.xlu1 %765 }
 0x1ec   : > { %v768_v7 = vmul.f32 %v978_v53, %v766_v4 }
 0x1f0   : > { %v982_v61 = vpop.eup %981 }
 0x1f1   : > { %760 = vrot.lane.b32.xlu0 %v982_v61, %s996_s29 }
 0x25b   : > { %v588_v0 = vpop.permute.xlu0 %587 }
 0x25c   : > { %v590_v2 = vmul.f32 %v588_v0, %v585_v63 }
 0x25e   : > { %v596_v3 = vadd.f32 %v595_v1, %v590_v2 }
 0x260   : > { %598 = vrot.lane.b32.xlu0 %v596_v3, %s996_s29 }
 0x263   : > { %v761_v6 = vpop.permute.xlu0 %760 }
 0x264   : > { %v763_v8 = vmul.f32 %v761_v6, %v758_v5 }
 0x266   : > { %v769_v9 = vadd.f32 %v768_v7, %v763_v8 }
 0x268   : > { %771 = vrot.lane.b32.xlu1 %v769_v9, %s996_s29 }
 0x2d2   : > { %v599_v10 = vpop.permute.xlu0 %598 }
 0x2d3   : > { %602 = vst.msk [vmem:[#allocation2] sm:$0x3] %vm601_vm3, %v599_v10  ;;  %603 = vst.msk [vmem:[%s1076_s12] sm:$0x3] %vm601_vm3, %v599_v10 }
 0x2da   : > { %v772_v11 = vpop.permute.xlu1 %771 }
 0x2db   : > { %774 = vst.msk [vmem:[#allocation3] sm:$0x3] %vm601_vm3, %v772_v11  ;;  %775 = vst.msk [vmem:[%s1081_s15] sm:$0x3] %vm601_vm3, %v772_v11 }
 0x2dc PF: > { %s22_s17 = sadd.s32 1, %s989_s17  }
 0x2dd   : > { %p19_p6 = scmp.ge.s32.totalorder %s22_s17, 6  }
 0x2df   :  { %21 = sbr.rel (!%p19_p6) target bundleno = 1 (0x1), region = 109 }

// kernel: crnn_forward.8
= control target key start
LH: loop header
LB: loop body
LE: loop exit
PB: predicated region body
PF: predicated region fallthrough
CT: control target
= control target key end

     0   :  { %s1110_s17 = smov 0   ;;  %s1210_s0 = inlined_call_operand.vmem [shape: f32[4,2,64], index: 0, kind: input, shape index: {}, may-alias: {0,1}]   ;;  %s1211_s1 = inlined_call_operand.vmem [shape: f32[4,2,64], index: 1, kind: input, shape index: {}, may-alias: {0,1}]   ;;  %s1212_s2 = inlined_call_operand.vmem [shape: bf16[64,96], index: 2, kind: input, shape index: {}]   ;;  %s1213_s3 = inlined_call_operand.vmem [shape: bf16[32,96], index: 3, kind: input, shape index: {}]   ;;  %s1214_s4 = inlined_call_operand.vmem [shape: f32[1,96], index: 4, kind: input, shape index: {}]   ;;  %s1215_s5 = inlined_call_operand.vmem [shape: f32[1,96], index: 5, kind: input, shape index: {}]   ;;  %s1216_s6 = inlined_call_operand.vmem [shape: bf16[64,96], index: 6, kind: input, shape index: {}]   ;;  %s1217_s7 = inlined_call_operand.vmem [shape: bf16[32,96], index: 7, kind: input, shape index: {}]   ;;  %s1218_s8 = inlined_call_operand.vmem [shape: f32[1,96], index: 8, kind: input, shape index: {}]   ;;  %s1219_s9 = inlined_call_operand.vmem [shape: f32[1,96], index: 9, kind: input, shape index: {}]   ;;  %s1220_s10 = inlined_call_operand.vmem [shape: f32[4,2,32], index: 10, kind: output, shape index: {0}]   ;;  %s1221_s11 = inlined_call_operand.vmem [shape: f32[4,2,32], index: 11, kind: output, shape index: {1}]  }
   0x1 LB: > { %s908_s18 = sadd.s32 4294967295, %s1042_s17   ;;  %p912_p0 = scmp.ge.s32.totalorder %s1042_s17, 1  ;;  %s1042_s17 = sphi %s1110_s17, %s22_s17  }
   0x2   : > { %p354_p1 = scmp.lt.s32.totalorder %s1042_s17, 5 }
   0x4   : > { %p355_p2 = pnand %p912_p0, %p354_p1 }
   0x5   : > { %p402_p3 = scmp.lt.s32.totalorder (!%p355_p2), %s908_s18, 3  ;;  %s406_s19 = ssub.s32 (!%p355_p2), 3, %s908_s18 }
   0x6   : > { %358 = sbr.rel (%p355_p2) target bundleno = 740 (0x2e4), region = 60  ;;  %p407_p4 = scmp.lt.s32.totalorder (!%p355_p2), %s406_s19, 3 }
   0x7   : > { %p917_p5 = scmp.ne.s32.totalorder (!%p355_p2), %s908_s18, 0 }
   0xd   : > { %s403_s20 = scalar_select %p402_p3, %s908_s18, 3 }
   0xe   : > { %s1223_s19 = smov (!%p407_p4, %s406_s19), 3  ;;  %426 = sbr.rel (%p917_p5) target bundleno = 21 (0x15), region = 64 }
   0xf   : > { %s913_s21 = sshll.u32 %s403_s20, 1  ;;  %s914_s25 = sshll.u32 %s1223_s19, 1  ;;  %vm427_vm0 = vcmask (!%p917_p5), 254976   ;;  %v1044_v0 = vmov (!%p917_p5), 0.0  }
  0x10   : > { %s1121_s24 = scalar_lea.vmem %s1210_s0, %s913_s21  ;;  %s1126_s28 = scalar_lea.vmem %s1211_s1, %s914_s25  ;;  %428 = vst.msk [vmem:[#allocation2] sm:$0x3] (!%p917_p5), %vm427_vm0, %v1044_v0  ;;  %429 = vst.msk [vmem:[#allocation3] sm:$0x3] (!%p917_p5), %vm427_vm0, %v1044_v0 }
  0x11   : > { %s1131_s12 = scalar_lea.vmem %s1220_s10, %s913_s21  ;;  %s1136_s15 = scalar_lea.vmem %s1221_s11, %s914_s25 }
  0x15 PF: > { %v1012_v1 = vld [vmem:[%s1212_s2] sm:$0xff]   ;;  %v1045_v2 = vmov 0.0   ;;  %v1014_v4 = vld [vmem:[%s1212_s2 + $0x8] sm:$0xff]   ;;  %vm1046_vm1 = vmmov 0   ;;  %v1016_v8 = vld [vmem:[%s1212_s2 + $0x10] sm:$0xff]   ;;  %vm540_vm2 = vcmask 261120  }
  0x16   : > { %958 = vmatprep.subr.bf16.mxu0 %v1045_v2  ;;  %970 = vmatprep.subr.bf16.mxu1 %v1045_v2  ;;  %v1013_v3 = vld [vmem:[%s1213_s3] sm:$0xff]   ;;  %v1015_v5 = vld [vmem:[%s1213_s3 + $0x8] sm:$0xff]   ;;  %v1018_v10 = vld [vmem:[%s1212_s2 + $0x18] sm:$0xff]   ;;  %vm472_vm3 = vcmask 523264   ;;  %s1047_s30 = smov 64   ;;  %s1048_s21 = smov 32  }
  0x17   : > { %959 = vmatpush3.bf16.msra.mxu0 %v1012_v1  ;;  %974 = vmatprep.mubr.msk.bf16.mxu1 %vm1046_vm1, %v1045_v2  ;;  %v1151_v6 = vld [vmem:[#allocation2] sm:$0x3]  ;;  %v1019_v12 = vld [vmem:[%s1216_s6 + $0x8] sm:$0xff]   ;;  %v1021_v15 = vld [vmem:[%s1216_s6 + $0x10] sm:$0xff]   ;;  %vm618_vm4 = vcmask 254976  }
  0x18   : > { %971 = vmatpush3.bf16.msra.mxu1 %v1013_v3  ;;  %960 = vmatprep.subr.bf16.mxu0 %v1045_v2  ;;  %v516_v7 = vpack.c.bf16 %v1151_v6, %v1151_v6  ;;  %v1017_v9 = vld [vmem:[%s1216_s6] sm:$0xff]   ;;  %v1022_v16 = vld [vmem:[%s1217_s7 + $0x8] sm:$0xff]   ;;  %v1023_v18 = vld [vmem:[%s1216_s6 + $0x18] sm:$0xff]  }
  0x19   : > { %972 = vmatprep.subr.bf16.mxu1 %v1045_v2  ;;  %966 = vmatprep.mubr.msk.bf16.mxu0 %vm1046_vm1, %v1045_v2  ;;  %v430_v11 = vld [vmem:[%s1121_s24] sm:$0x3]  ;;  %v622_v17 = vld [vmem:[#allocation3] sm:$0x3]  ;;  %s1049_s24 = smov 96  }
  0x1a   : > { %v432_v13 = vpack.c.bf16 %v430_v11, %v430_v11  ;;  %v1020_v14 = vld [vmem:[%s1217_s7] sm:$0xff]   ;;  %v706_v20 = vpack.c.bf16 %v622_v17, %v622_v17 }
  0x1b   : > { %961 = vmatpush3.bf16.msra.mxu0 %v1014_v4  ;;  %v621_v19 = vld [vmem:[%s1126_s28] sm:$0x3] }
  0x1c   : > { %973 = vmatpush3.bf16.msra.mxu1 %v1015_v5  ;;  %962 = vmatprep.subr.bf16.mxu0 %v1045_v2  ;;  %v623_v21 = vpack.c.bf16 %v621_v19, %v621_v19  ;;  %v924_v22 = vld [vmem:[%s1215_s5] ss:$0 sm:$0xff] }
  0x1d   : > { %978 = vmatprep.subr.bf16.mxu1 %v1045_v2  ;;  %v935_v32 = vld [vmem:[%s1219_s9] ss:$0 sm:$0xff] }
  0x1e   : > { %v918_v42 = vld [vmem:[%s1214_s4] ss:$0 sm:$0xff] }
  0x1f   : > { %975 = vmatmul.mubr.msk.bf16.vlgmr.msra.gmra.mrb[0].mxu1 %vm540_vm2, %v516_v7  ;;  %963 = vmatpush3.bf16.msra.mxu0 %v1016_v8  ;;  %v929_v46 = vld [vmem:[%s1218_s8] ss:$0 sm:$0xff] }
  0x20   : > { %979 = vmatpush3.bf16.msra.mxu1 %v1017_v9  ;;  %964 = vmatprep.subr.bf16.mxu0 %v1045_v2 }
  0x21   : > { %980 = vmatprep.subr.bf16.mxu1 %v1045_v2  ;;  %986 = vmatprep.mubr.msk.bf16.mxu1 %vm1046_vm1, %v1045_v2 }
  0x23   : > { %965 = vmatpush3.bf16.msra.mxu0 %v1018_v10 }
  0x24   : > { %981 = vmatpush3.bf16.msra.mxu1 %v1019_v12  ;;  %990 = vmatprep.subr.bf16.mxu0 %v1045_v2 }
  0x25   : > { %982 = vmatprep.subr.bf16.mxu1 %v1045_v2 }
  0x26   : > { %967 = vmatmul.mubr.msk.bf16.vlgmr.msra.gmra.mrb[0].mxu0 %vm472_vm3, %v432_v13 }
  0x27   : > { %991 = vmatpush3.bf16.msra.mxu0 %v1020_v14  ;;  %994 = vmatprep.mubr.msk.bf16.mxu0 %vm1046_vm1, %v1045_v2 }
  0x28   : > { %983 = vmatpush3.bf16.msra.mxu1 %v1021_v15  ;;  %992 = vmatprep.subr.bf16.mxu0 %v1045_v2 }
  0x29   : > { %984 = vmatprep.subr.bf16.mxu1 %v1045_v2 }
  0x2b   : > { %993 = vmatpush3.bf16.msra.mxu0 %v1022_v16 }
  0x2c   : > { %985 = vmatpush3.bf16.msra.mxu1 %v1023_v18 }
  0x2e   : > { %995 = vmatmul.mubr.msk.bf16.vlgmr.msra.gmra.mrb[4].mxu0 %vm540_vm2, %v706_v20 }
  0x2f   : > { %987 = vmatmul.mubr.msk.bf16.vlgmr.msra.gmra.mrb[4].mxu1 %vm472_vm3, %v623_v21 }
  0xf2   : > { %v578_v23 = vpop.f32.mrb[0].mxu1 }
  0xf3   : > { %v579_v24 = vadd.f32 %v924_v22, %v578_v23  ;;  %v976_v25 = vpop.f32.mrb[1].mxu1 }
  0xf4   : > { %v581_v26 = vpop.f32.mrb[2].mxu1 }
  0xf5   : > { %592 = vrot.lane.b32.xlu0 %v579_v24, %s1047_s30  ;;  %v977_v27 = vpop.f32.mrb[3].mxu1 }
  0xf9   : > { %v510_v28 = vpop.f32.mrb[0].mxu0 }
  0xfa   : > { %v968_v29 = vpop.f32.mrb[1].mxu0  ;;  %v511_v43 = vadd.f32 %v918_v42, %v510_v28 }
  0xfb   : > { %v513_v30 = vpop.f32.mrb[2].mxu0 }
  0xfc   : > { %v969_v31 = vpop.f32.mrb[3].mxu0  ;;  %v584_v44 = vadd.f32 %v579_v24, %v511_v43 }
  0xfe   : > { %v928_v45 = vmul.f32 -1.442695, %v584_v44 }
 0x100   : > { %1024 = vpow2.f32 %v928_v45 }
 0x101   : > { %v767_v33 = vpop.f32.mrb[4].mxu0 }
 0x102   : > { %v768_v34 = vadd.f32 %v935_v32, %v767_v33  ;;  %v700_v35 = vpop.f32.mrb[4].mxu1  ;;  %v996_v36 = vpop.f32.mrb[5].mxu0 }
 0x103   : > { %v770_v37 = vpop.f32.mrb[6].mxu0  ;;  %v988_v38 = vpop.f32.mrb[5].mxu1  ;;  %v701_v47 = vadd.f32 %v929_v46, %v700_v35 }
 0x104   : > { %781 = vrot.lane.b32.xlu0 %v768_v34, %s1047_s30  ;;  %v997_v39 = vpop.f32.mrb[7].mxu0  ;;  %v703_v40 = vpop.f32.mrb[6].mxu1 }
 0x105   : > { %v989_v41 = vpop.f32.mrb[7].mxu1  ;;  %v773_v48 = vadd.f32 %v768_v34, %v701_v47 }
 0x107   : > { %v939_v50 = vmul.f32 -1.442695, %v773_v48 }
 0x109   : > { %1026 = vpow2.f32 %v939_v50 }
 0x10a   : > { %v1025_v49 = vpop.eup %1024 }
 0x10b   : > { %v588_v51 = vadd.f32 1.0, %v1025_v49 }
 0x10d   : > { %1028 = vrcp.f32 %v588_v51 }
 0x113   : > { %v1027_v52 = vpop.eup %1026 }
 0x114   : > { %v777_v55 = vadd.f32 1.0, %v1027_v52 }
 0x116   : > { %1030 = vrcp.f32 %v777_v55 }
 0x117   : > { %v1029_v53 = vpop.eup %1028 }
 0x118   : > { %v602_v3 = vsub.f32 1.0, %v1029_v53 }
 0x120   : > { %v1031_v57 = vpop.eup %1030 }
 0x121   : > { %v791_v9 = vsub.f32 1.0, %v1031_v57 }
 0x167   : > { %v593_v54 = vpop.permute.xlu0 %592 }
 0x168   : > { %v595_v56 = vmul.f32 %v1029_v53, %v593_v54 }
 0x16a   : > { %597 = vrot.lane.b32.xlu1 %v595_v56, %s1047_s30 }
 0x176   : > { %v782_v58 = vpop.permute.xlu0 %781 }
 0x177   : > { %v784_v59 = vmul.f32 %v1031_v57, %v782_v58 }
 0x179   : > { %786 = vrot.lane.b32.xlu1 %v784_v59, %s1047_s30 }
 0x17d   : > { %609 = vrot.lane.b32.xlu1 %v1151_v6, %s1048_s21 }
 0x181   : > { %798 = vrot.lane.b32.xlu1 %v622_v17, %s1048_s21 }
 0x1dc   : > { %v598_v60 = vpop.permute.xlu1 %597 }
 0x1dd   : > { %v600_v61 = vadd.f32 %v598_v60, %v511_v43 }
 0x1df   : > { %1032 = vtanh.f32 %v600_v61 }
 0x1e9   : > { %v1033_v62 = vpop.eup %1032 }
 0x1ea   : > { %604 = vrot.lane.b32.xlu0 %v1033_v62, %s1049_s24 }
 0x1eb   : > { %v787_v63 = vpop.permute.xlu1 %786 }
 0x1ec   : > { %v789_v0 = vadd.f32 %v787_v63, %v701_v47 }
 0x1ee   : > { %1034 = vtanh.f32 %v789_v0 }
 0x1ef   : > { %v610_v2 = vpop.permute.xlu1 %609 }
 0x1f0   : > { %v612_v5 = vmul.f32 %v1029_v53, %v610_v2 }
 0x1f3   : > { %v799_v8 = vpop.permute.xlu1 %798 }
 0x1f4   : > { %v801_v11 = vmul.f32 %v1031_v57, %v799_v8 }
 0x1f8   : > { %v1035_v1 = vpop.eup %1034 }
 0x1f9   : > { %793 = vrot.lane.b32.xlu0 %v1035_v1, %s1049_s24 }
 0x25c   : > { %v605_v4 = vpop.permute.xlu0 %604 }
 0x25d   : > { %v607_v7 = vmul.f32 %v605_v4, %v602_v3 }
 0x25f   : > { %v613_v6 = vadd.f32 %v612_v5, %v607_v7 }
 0x261   : > { %615 = vrot.lane.b32.xlu0 %v613_v6, %s1049_s24 }
 0x26b   : > { %v794_v10 = vpop.permute.xlu0 %793 }
 0x26c   : > { %v796_v12 = vmul.f32 %v794_v10, %v791_v9 }
 0x26e   : > { %v802_v13 = vadd.f32 %v801_v11, %v796_v12 }
 0x270   : > { %804 = vrot.lane.b32.xlu1 %v802_v13, %s1049_s24 }
 0x2d3   : > { %v616_v14 = vpop.permute.xlu0 %615 }
 0x2d4   : > { %619 = vst.msk [vmem:[#allocation2] sm:$0x3] %vm618_vm4, %v616_v14  ;;  %620 = vst.msk [vmem:[%s1131_s12] sm:$0x3] %vm618_vm4, %v616_v14 }
 0x2e2   : > { %v805_v15 = vpop.permute.xlu1 %804 }
 0x2e3   : > { %807 = vst.msk [vmem:[#allocation3] sm:$0x3] %vm618_vm4, %v805_v15  ;;  %808 = vst.msk [vmem:[%s1136_s15] sm:$0x3] %vm618_vm4, %v805_v15 }
 0x2e4 PF: > { %s22_s17 = sadd.s32 1, %s1042_s17  }
 0x2e5   : > { %p19_p6 = scmp.ge.s32.totalorder %s22_s17, 6  }
 0x2e7   :  { %21 = sbr.rel (!%p19_p6) target bundleno = 1 (0x1), region = 109 }

// kernel: crnn_forward.9
= control target key start
LH: loop header
LB: loop body
LE: loop exit
PB: predicated region body
PF: predicated region fallthrough
CT: control target
= control target key end

     0   :  { %12 = vsyncpa [#allocation3], 0  ;;  %s1938_s0 = inlined_call_operand.vmem [shape: f32[2,4,32], index: 0, kind: input, shape index: {}]   ;;  %s1939_s1 = inlined_call_operand.vmem [shape: bf16[32,96], index: 1, kind: input, shape index: {}]   ;;  %s1940_s2 = inlined_call_operand.vmem [shape: f32[1,96], index: 2, kind: input, shape index: {}]   ;;  %s1941_s3 = inlined_call_operand.vmem [shape: bf16[4,8,32], index: 3, kind: input, shape index: {}]   ;;  %s1942_s4 = inlined_call_operand.vmem [shape: f32[1,32], index: 4, kind: input, shape index: {}]   ;;  %s1943_s5 = inlined_call_operand.vmem [shape: bf16[32,12], index: 5, kind: input, shape index: {}]   ;;  %s1944_s6 = inlined_call_operand.vmem [shape: f32[1,12], index: 6, kind: input, shape index: {}]   ;;  %s1945_s7 = inlined_call_operand.hbm [shape: f32[2,4,12], index: 7, kind: output, shape index: {}]  }
   0x1   :  { %14 = vsyncpa [#allocation3 + $0x1], 0  ;;  %s1710_s24 = smov 0   ;;  %s1712_s25 = smov 0  }
   0x2   :  { %s1714_s26 = smov 0   ;;  %s1716_s27 = smov 0  }
   0x3 LB: > { %s1731_s28 = sadd.s32 4294967295, %s1654_s27   ;;  %s1364_s29 = sadd.s32 4294967294, %s1654_s27   ;;  %s1654_s27 = sphi %s1716_s27, %s1951_s27   ;;  %s1650_s26 = sphi %s1714_s26, %s1950_s26   ;;  %s1646_s25 = sphi %s1712_s25, %s1949_s25   ;;  %s1642_s24 = sphi %s1710_s24, %s1948_s24  }
   0x4   : > { %s1735_s30 = sadd.s32 1, %s1654_s27   ;;  %s179_s8 = sadd.s32 1, %s1650_s26 }
   0x5   : > { %s176_s9 = ssub.s32 %s1654_s27, %s1735_s30  ;;  %p189_p0 = scmp.ne.s32.totalorder %s1650_s26, %s1646_s25 }
   0x6   : > { %p177_p1 = scmp.eq.s32.totalorder %s176_s9, 0  ;;  %p190_p2 = scmp.eq.s32.totalorder %s1731_s28, 1 }
   0x7   : > { %p195_p3 = scmp.ne.s32.totalorder %s1646_s25, %s1642_s24  ;;  %p196_p4 = scmp.eq.s32.totalorder %s1364_s29, 1 }
   0x8   : > { %s1746_s10 = scalar_select %p177_p1, %s1650_s26, %s179_s8  }
   0x9   : > { %p1748_p5 = por %p190_p2, %p189_p0  ;;  %p1752_p6 = por %p196_p4, %p195_p3 }
   0xa   : > { %p1367_p7 = scmp.ge.s32.totalorder %s1654_s27, 1  ;;  %p239_p8 = scmp.lt.s32.totalorder %s1654_s27, 3 }
   0xc   : > { %p240_p9 = pnand %p1367_p7, %p239_p8 }
   0xd   : > { %v1568_v0 = vld [vmem:[%s1939_s1] sm:$0xff] (!%p240_p9)   ;;  %v1656_v1 = vmov (!%p240_p9), 0.0   ;;  %v1569_v2 = vld [vmem:[%s1939_s1 + $0x8] sm:$0xff] (!%p240_p9)   ;;  %vm1657_vm0 = vmmov (!%p240_p9), 0   ;;  %p270_p10 = scmp.lt.s32.totalorder (!%p240_p9), %s1731_s28, 1  ;;  %vm300_vm1 = vcmask (!%p240_p9), 261120  }
   0xe   : > { %243 = sbr.rel (%p240_p9) target bundleno = 3384 (0xd38), region = 48  ;;  %1436 = vmatprep.subr.bf16.mxu0 (!%p240_p9), %v1656_v1  ;;  %1444 = vmatprep.subr.mxu1 (!%p240_p9), %v1656_v1  ;;  %v1370_v5 = vld [vmem:[%s1940_s2] ss:$0 sm:$0xff] (!%p240_p9)  ;;  %s1658_s29 = smov (!%p240_p9), 64   ;;  %vm347_vm2 = vcmask (!%p240_p9), 64512   ;;  %vm441_vm3 = vcmask (!%p240_p9), 1043456  }
   0xf   : > { %1437 = vmatpush3.bf16.msra.mxu0 (!%p240_p9), %v1568_v0  ;;  %1440 = vmatprep.mubr.msk.bf16.mxu0 (!%p240_p9), %vm1657_vm0, %v1656_v1  ;;  %s1659_s8 = smov (!%p240_p9), 96   ;;  %s1660_s9 = smov (!%p240_p9), 88   ;;  %vm423_vm4 = vcmask (!%p240_p9), 27648   ;;  %vm437_vm5 = vcmask (!%p240_p9), 31744   ;;  %v515_v27 = vld [vmem:[%s1941_s3] sm:$0xf] (!%p240_p9) }
  0x10   : > { %1438 = vmatprep.subr.bf16.mxu0 (!%p240_p9), %v1656_v1  ;;  %1446 = vmatprep.mubr.msk.f32.mxu1 (!%p240_p9), %vm1657_vm0, %v1656_v1  ;;  %s1661_s13 = smov (!%p240_p9), 120   ;;  %v736_v28 = vsel (!%p240_p9), %vm441_vm3, %v515_v27, 0  ;;  %s1662_s16 = smov (!%p240_p9), 56   ;;  %v1382_v47 = vld [vmem:[%s1941_s3 + $0x4] sm:$0xf] (!%p240_p9)  ;;  %vm1289_vm6 = vcmask (!%p240_p9), 93184  }
  0x11   : > { %v690_v50 = vsel (!%p240_p9), %vm441_vm3, %v1382_v47, 0  ;;  %s1666_s22 = smov (!%p240_p9), 72   ;;  %s1667_s23 = smov (!%p240_p9), 104  }
  0x13   : > { %1439 = vmatpush3.bf16.msra.mxu0 (!%p240_p9), %v1569_v2 }
  0x14   : > { %1470 = vmatprep.subr.bf16.mxu0 (!%p240_p9), %v1656_v1 }
  0x15   : > { %s271_s17 = scalar_select %p270_p10, %s1731_s28, 1 }
  0x17   : > { %s1369_s18 = sshll.u32 %s271_s17, 2  ;;  %s1663_s17 = smov 80  }
  0x18   : > { %s273_s21 = scalar_lea.vmem %s1938_s0, %s1369_s18  ;;  %s1664_s18 = smov 112  }
  0x19   : > { %v275_v3 = vld [vmem:[%s273_s21] sm:$0xf]  ;;  %s1665_s21 = smov 48  }
  0x1a   : > { %v276_v4 = vpack.c.bf16 %v275_v3, %v275_v3 }
  0x1c   : > { %1441 = vmatmul.mubr.msk.bf16.vlgmr.msra.gmra.mrb[0].mxu0 %vm300_vm1, %v276_v4 }
  0x1d   : > { %1472 = vmatprep.mubr.msk.bf16.mxu0 %vm1657_vm0, %v1656_v1  ;;  %1471 = vmatpush3.bf16.msra.mxu0 %v736_v28  ;;  %v1395_v28 = vld [vmem:[%s1941_s3 + $0xc] sm:$0xf] }
  0x1e   : > { %1481 = vmatprep.subr.mxu0 %v1656_v1 }
  0xef   : > { %v338_v6 = vpop.f32.mrb[0].mxu0 }
  0xf0   : > { %v1783_v7 = vadd.f32 %v1370_v5, %v338_v6  ;;  %v1442_v8 = vpop.f32.mrb[1].mxu0 }
  0xf1   : > { %v341_v9 = vpop.f32.mrb[2].mxu0 }
  0xf2   : > { %435 = vrot.lane.b32.xlu1 %v1783_v7, %s1658_s29  ;;  %345 = vrot.lane.b32.xlu0 %v1783_v7, %s1659_s8  ;;  %v1443_v10 = vpop.f32.mrb[3].mxu0  ;;  %s1403_s8 = sshll.u32 %s1731_s28, 6  ;;  %s1669_s28 = smov [#allocation2]  }
  0xf3   : > { %s1596_s19 = sshll.u32 %s1669_s28, 4  ;;  %s1597_s19 = int_to_ptr.vmem [resolvable:$false] %s1596_s19 }
  0xf4   : > { %s1598_s20 = scalar_lea.vmem %s1597_s19, 128 }
  0xf6   : > { %518 = vrot.lane.b32.xlu1 %v1783_v7, %s1660_s9  ;;  %s1668_s9 = smov 40  }
 0x164   : > { %v346_v11 = vpop.permute.xlu0 %345  ;;  %v436_v12 = vpop.permute.xlu1 %435 }
 0x165   : > { %1445 = vmatpush3.xpose.msk.msra.mxu1 %vm347_vm2, %v346_v11 }
 0x166   : > { %1449 = vmatprep.subr.mxu1 %v1656_v1 }
 0x168   : > { %1447 = vmatmul.mubr.msk.f32.vlgmr.msra.gmra.mrb[0].mxu1 %vm347_vm2, %v1783_v7  ;;  %v519_v22 = vpop.permute.xlu1 %518 }
 0x169   : > { %1450 = vmatpush3.msk.msra.mxu1 %vm441_vm3, %v436_v12  ;;  %1451 = vmatprep.mubr.msk.f32.mxu1 %vm1657_vm0, %v1656_v1 }
 0x16a   : > { %1454 = vmatprep.subr.mxu1 %v1656_v1 }
 0x23b   : > { %v418_v13 = vpop.f32.mrb[0].mxu1 }
 0x23c   : > { %v422_v14 = vmul.f32 0.35355338, %v418_v13  ;;  %v1448_v15 = vpop.f32.mrb[1].mxu1 }
 0x23e   : > { %v424_v16 = vsel %vm423_vm4, %v422_v14, -inf }
 0x23f   : > { %425 = vmax.xlane.f32.xlu0 %v424_v16 }
 0x2cc   : > { %v426_v17 = vpop.xlane.xlu0 %425 }
 0x2cd   : > { %v427_v18 = vsub.f32 %v422_v14, %v426_v17  ;;  %v1389_v14 = vld [vmem:[%s1941_s3 + $0x8] sm:$0xf] }
 0x2ce   : > { %v952_v15 = vsel %vm441_vm3, %v1389_v14, 0 }
 0x2cf   : > { %v428_v19 = vmul.f32 1.442695, %v427_v18 }
 0x2d1   : > { %1572 = vpow2.f32 %v428_v19 }
 0x2db   : > { %v1573_v20 = vpop.eup %1572 }
 0x2dc   : > { %v430_v21 = vsel %vm423_vm4, %v1573_v20, 0.0 }
 0x2dd   : > { %431 = vadd.xlane.f32.xlu1 %v430_v21 }
 0x2ee   : > { %516 = vrot.lane.b32.xlu1 %v1783_v7, %s1661_s13 }
 0x36a   : > { %v432_v23 = vpop.xlane.xlu1 %431 }
 0x36b   : > { %1574 = vrcp.f32 %v432_v23 }
 0x36e   : > { %v517_v26 = vpop.permute.xlu1 %516 }
 0x375   : > { %v1575_v24 = vpop.eup %1574 }
 0x376   : > { %v434_v25 = vmul.f32 %v1575_v24, %v1573_v20 }
 0x378   : > { %1452 = vmatmul.mubr.msk.f32.vlgmr.msra.gmra.mrb[2].mxu1 %vm437_vm5, %v434_v25 }
 0x379   : > { %1455 = vmatpush3.xpose.msk.msra.mxu1 %vm347_vm2, %v519_v22  ;;  %1456 = vmatprep.mubr.msk.f32.mxu1 %vm1657_vm0, %v1656_v1 }
 0x37a   : > { %1459 = vmatprep.subr.mxu1 %v1656_v1 }
 0x37c   : > { %1457 = vmatmul.mubr.msk.f32.vlgmr.msra.gmra.mrb[4].mxu1 %vm347_vm2, %v517_v26 }
 0x37d   : > { %1461 = vmatprep.mubr.msk.f32.mxu1 %vm1657_vm0, %v1656_v1 }
 0x44b   : > { %v510_v29 = vpop.f32.mrb[2].mxu1 }
 0x44c   : > { %v514_v30 = vpack.c.bf16 %v510_v29, %v510_v29  ;;  %v1453_v31 = vpop.f32.mrb[3].mxu1  ;;  %v1169_v29 = vsel %vm441_vm3, %v1395_v28, 0 }
 0x44e   : > { %1473 = vmatmul.mubr.msk.bf16.vlgmr.msra.gmra.mrb[4].mxu0 %vm347_vm2, %v514_v30 }
 0x44f   : > { %v590_v32 = vpop.f32.mrb[4].mxu1  ;;  %1483 = vmatprep.mubr.msk.f32.mxu0 %vm1657_vm0, %v1656_v1 }
 0x450   : > { %v594_v33 = vmul.f32 0.35355338, %v590_v32  ;;  %v1458_v34 = vpop.f32.mrb[5].mxu1 }
 0x452   : > { %v595_v35 = vsel %vm423_vm4, %v594_v33, -inf }
 0x453   : > { %596 = vmax.xlane.f32.xlu1 %v595_v35 }
 0x4e0   : > { %v597_v36 = vpop.xlane.xlu1 %596 }
 0x4e1   : > { %v598_v37 = vsub.f32 %v594_v33, %v597_v36 }
 0x4e3   : > { %v599_v38 = vmul.f32 1.442695, %v598_v37 }
 0x4e5   : > { %1576 = vpow2.f32 %v599_v38 }
 0x4ef   : > { %v1577_v39 = vpop.eup %1576 }
 0x4f0   : > { %v601_v40 = vsel %vm423_vm4, %v1577_v39, 0.0 }
 0x4f1   : > { %602 = vadd.xlane.f32.xlu0 %v601_v40 }
 0x507   : > { %606 = vrot.lane.b32.xlu0 %v1783_v7, %s1662_s16  ;;  %s1896_s16 = scalar_lea.hbm %s1945_s7, %s1403_s8 }
 0x50b   : > { %780 = vrot.lane.b32.xlu0 %v1783_v7, %s1663_s17 }
 0x50f   : > { %778 = vrot.lane.b32.xlu0 %v1783_v7, %s1664_s18 }
 0x521   : > { %v772_v41 = vpop.f32.mrb[4].mxu0 }
 0x522   : > { %v1474_v42 = vpop.f32.mrb[5].mxu0 }
 0x523   : > { %v775_v43 = vpop.f32.mrb[6].mxu0  ;;  %v1571_v42 = vld [vmem:[%s1943_s5 + $0x8] sm:$0xff]  }
 0x524   : > { %v1475_v44 = vpop.f32.mrb[7].mxu0 }
 0x525   : > { %v1397_v44 = vld [vmem:[%s1942_s4] ss:$0 sm:$0xff] }
 0x57e   : > { %v603_v45 = vpop.xlane.xlu0 %602 }
 0x57f   : > { %1578 = vrcp.f32 %v603_v45 }
 0x582   : > { %v607_v46 = vpop.permute.xlu0 %606 }
 0x583   : > { %1460 = vmatpush3.msk.msra.mxu1 %vm441_vm3, %v607_v46 }
 0x584   : > { %1464 = vmatprep.subr.bf16.mxu1 %v1656_v1 }
 0x586   : > { %v781_v54 = vpop.permute.xlu0 %780 }
 0x589   : > { %v1579_v48 = vpop.eup %1578 }
 0x58a   : > { %v605_v49 = vmul.f32 %v1579_v48, %v1577_v39  ;;  %v779_v55 = vpop.permute.xlu0 %778 }
 0x58c   : > { %1462 = vmatmul.mubr.msk.f32.vlgmr.msra.gmra.mrb[6].mxu1 %vm437_vm5, %v605_v49 }
 0x58d   : > { %1465 = vmatpush3.bf16.msra.mxu1 %v690_v50  ;;  %1466 = vmatprep.mubr.msk.bf16.mxu1 %vm1657_vm0, %v1656_v1 }
 0x58e   : > { %1476 = vmatprep.subr.mxu1 %v1656_v1 }
 0x65f   : > { %v679_v51 = vpop.f32.mrb[6].mxu1 }
 0x660   : > { %v683_v52 = vpack.c.bf16 %v679_v51, %v679_v51  ;;  %v1463_v53 = vpop.f32.mrb[7].mxu1  ;;  %v1398_v51 = vld [vmem:[%s1944_s6] ss:$0 sm:$0xff] }
 0x662   : > { %1467 = vmatmul.mubr.msk.bf16.vlgmr.msra.gmra.mrb[8].mxu1 %vm347_vm2, %v683_v52 }
 0x663   : > { %1477 = vmatpush3.xpose.msk.msra.mxu1 %vm347_vm2, %v781_v54  ;;  %1478 = vmatprep.mubr.msk.f32.mxu1 %vm1657_vm0, %v1656_v1 }
 0x664   : > { %1486 = vmatprep.subr.bf16.mxu1 %v1656_v1 }
 0x66a   : > { %1479 = vmatmul.mubr.msk.f32.vlgmr.msra.gmra.mrb[12].mxu1 %vm347_vm2, %v779_v55 }
 0x66b   : > { %1488 = vmatprep.mubr.msk.bf16.mxu1 %vm1657_vm0, %v1656_v1  ;;  %1487 = vmatpush3.bf16.msra.mxu1 %v952_v15 }
 0x66c   : > { %1502 = vmatprep.subr.bf16.mxu1 %v1656_v1 }
 0x735   : > { %v726_v56 = vpop.f32.mrb[8].mxu1 }
 0x736   : > { %v1838_v57 = vadd.f32 %v772_v41, %v726_v56  ;;  %v1468_v58 = vpop.f32.mrb[9].mxu1  ;;  %v1570_v41 = vld [vmem:[%s1943_s5] sm:$0xff]  }
 0x737   : > { %v729_v59 = vpop.f32.mrb[10].mxu1 }
 0x738   : > { %v1469_v60 = vpop.f32.mrb[11].mxu1 }
 0x73d   : > { %v852_v61 = vpop.f32.mrb[12].mxu1 }
 0x73e   : > { %v856_v62 = vmul.f32 0.35355338, %v852_v61  ;;  %v1480_v63 = vpop.f32.mrb[13].mxu1 }
 0x740   : > { %v857_v0 = vsel %vm423_vm4, %v856_v62, -inf }
 0x741   : > { %858 = vmax.xlane.f32.xlu1 %v857_v0 }
 0x752   : > { %868 = vrot.lane.b32.xlu1 %v1783_v7, %s1665_s21 }
 0x756   : > { %997 = vrot.lane.b32.xlu1 %v1783_v7, %s1666_s22 }
 0x75a   : > { %995 = vrot.lane.b32.xlu1 %v1783_v7, %s1667_s23  ;;  %s267_s23 = sand.u32 1, %s1646_s25  }
 0x75b   : > { %s1368_s29 = sshll.u32 %s267_s23, 2  ;;  %s1292_s17 = scalar_lea.sflag [#allocation3], %s267_s23 }
 0x7ce   : > { %v859_v2 = vpop.xlane.xlu1 %858 }
 0x7cf   : > { %v860_v3 = vsub.f32 %v856_v62, %v859_v2 }
 0x7d1   : > { %v861_v4 = vmul.f32 1.442695, %v860_v3 }
 0x7d2   : > { %v869_v5 = vpop.permute.xlu1 %868 }
 0x7d3   : > { %1580 = vpow2.f32 %v861_v4  ;;  %1482 = vmatpush3.msk.msra.mxu0 %vm441_vm3, %v869_v5 }
 0x7d4   : > { %1492 = vmatprep.subr.mxu0 %v1656_v1 }
 0x7d6   : > { %v998_v11 = vpop.permute.xlu1 %997 }
 0x7da   : > { %v996_v13 = vpop.permute.xlu1 %995 }
 0x7dd   : > { %v1581_v6 = vpop.eup %1580 }
 0x7de   : > { %v863_v8 = vsel %vm423_vm4, %v1581_v6, 0.0 }
 0x7df   : > { %864 = vadd.xlane.f32.xlu0 %v863_v8 }
 0x86c   : > { %v865_v9 = vpop.xlane.xlu0 %864 }
 0x86d   : > { %1582 = vrcp.f32 %v865_v9 }
 0x877   : > { %v1583_v10 = vpop.eup %1582 }
 0x878   : > { %v867_v12 = vmul.f32 %v1583_v10, %v1581_v6 }
 0x87a   : > { %1484 = vmatmul.mubr.msk.f32.vlgmr.msra.gmra.mrb[8].mxu0 %vm437_vm5, %v867_v12 }
 0x87b   : > { %1493 = vmatpush3.xpose.msk.msra.mxu0 %vm347_vm2, %v998_v11  ;;  %1494 = vmatprep.mubr.msk.f32.mxu0 %vm1657_vm0, %v1656_v1 }
 0x87c   : > { %1497 = vmatprep.subr.mxu0 %v1656_v1 }
 0x87e   : > { %1495 = vmatmul.mubr.msk.f32.vlgmr.msra.gmra.mrb[10].mxu0 %vm347_vm2, %v996_v13 }
 0x87f   : > { %1499 = vmatprep.mubr.msk.f32.mxu0 %vm1657_vm0, %v1656_v1 }
 0x94d   : > { %v941_v16 = vpop.f32.mrb[8].mxu0 }
 0x94e   : > { %v945_v17 = vpack.c.bf16 %v941_v16, %v941_v16  ;;  %v1485_v18 = vpop.f32.mrb[9].mxu0 }
 0x950   : > { %1489 = vmatmul.mubr.msk.bf16.vlgmr.msra.gmra.mrb[16].mxu1 %vm347_vm2, %v945_v17 }
 0x951   : > { %v1069_v19 = vpop.f32.mrb[10].mxu0  ;;  %1504 = vmatprep.mubr.msk.bf16.mxu1 %vm1657_vm0, %v1656_v1  ;;  %1503 = vmatpush3.bf16.msra.mxu1 %v1169_v29 }
 0x952   : > { %v1073_v20 = vmul.f32 0.35355338, %v1069_v19  ;;  %v1496_v21 = vpop.f32.mrb[11].mxu0 }
 0x954   : > { %v1074_v22 = vsel %vm423_vm4, %v1073_v20, -inf }
 0x955   : > { %1075 = vmax.xlane.f32.xlu1 %v1074_v22 }
 0x9e2   : > { %v1076_v23 = vpop.xlane.xlu1 %1075 }
 0x9e3   : > { %v1077_v24 = vsub.f32 %v1073_v20, %v1076_v23 }
 0x9e5   : > { %v1078_v25 = vmul.f32 1.442695, %v1077_v24 }
 0x9e7   : > { %1584 = vpow2.f32 %v1078_v25 }
 0x9f1   : > { %v1585_v26 = vpop.eup %1584 }
 0x9f2   : > { %v1080_v27 = vsel %vm423_vm4, %v1585_v26, 0.0 }
 0x9f3   : > { %1081 = vadd.xlane.f32.xlu0 %v1080_v27 }
 0xa09   : > { %1085 = vrot.lane.b32.xlu0 %v1783_v7, %s1668_s9  ;;  %s269_s9 = scalar_lea.vmem [#allocation2], %s1368_s29 }
 0xa0a   : > { %s1305_s13 = sshll.u32 %s269_s9, 4  ;;  %s1898_s13 = int_to_ptr.vmem [resolvable:$true] %s1305_s13 }
 0xa0b   : > { %s1592_s18 = scalar_lea.vmem %s1898_s13, 64  ;;  %p1599_p0 = scmp.lt.s32.totalorder %s1898_s13, %s1597_s19 }
 0xa0c   : > { %p1593_p11 = scmp.ne.s32.totalorder %s1898_s13, %s1592_s18  ;;  %p1600_p1 = scmp.lt.s32.totalorder %s1598_s20, %s1592_s18 }
 0xa0e   : > { %p1594_p12 = pnand %p1593_p11, %p1748_p5  ;;  %p1601_p2 = por %p1600_p1, %p1599_p0 }
 0xa10   : > { %p1595_p13 = pneg %p1594_p12 }
 0xa12   : > { %p1602_p3 = pnand %p1601_p2, %p1595_p13 }
 0xa23   : > { %v988_v30 = vpop.f32.mrb[16].mxu1 }
 0xa24   : > { %v994_v31 = vadd.f32 %v988_v30, %v1838_v57  ;;  %v1490_v32 = vpop.f32.mrb[17].mxu1 }
 0xa25   : > { %v991_v33 = vpop.f32.mrb[18].mxu1 }
 0xa26   : > { %v1491_v34 = vpop.f32.mrb[19].mxu1 }
 0xa80   : > { %v1082_v35 = vpop.xlane.xlu0 %1081 }
 0xa81   : > { %1586 = vrcp.f32 %v1082_v35 }
 0xa84   : > { %v1086_v36 = vpop.permute.xlu0 %1085 }
 0xa85   : > { %1498 = vmatpush3.msk.msra.mxu0 %vm441_vm3, %v1086_v36 }
 0xa86   : > { %1508 = vmatprep.subr.bf16.mxu0 %v1656_v1 }
 0xa8b   : > { %v1587_v7 = vpop.eup %1586 }
 0xa8c   : > { %v1084_v37 = vmul.f32 %v1587_v7, %v1585_v26 }
 0xa8e   : > { %1500 = vmatmul.mubr.msk.f32.vlgmr.msra.gmra.mrb[12].mxu0 %vm437_vm5, %v1084_v37 }
 0xa8f   : > { %1512 = vmatprep.mubr.msk.bf16.mxu0 %vm1657_vm0, %v1656_v1  ;;  %1509 = vmatpush3.bf16.msra.mxu0 %v1570_v41 }
 0xa90   : > { %1510 = vmatprep.subr.bf16.mxu0 %v1656_v1 }
 0xa93   : > { %1511 = vmatpush3.bf16.msra.mxu0 %v1571_v42 }
 0xb61   : > { %v1158_v38 = vpop.f32.mrb[12].mxu0 }
 0xb62   : > { %v1162_v39 = vpack.c.bf16 %v1158_v38, %v1158_v38  ;;  %v1501_v40 = vpop.f32.mrb[13].mxu0 }
 0xb64   : > { %1505 = vmatmul.mubr.msk.bf16.vlgmr.msra.gmra.mrb[20].mxu1 %vm347_vm2, %v1162_v39 }
 0xc37   : > { %v1205_v43 = vpop.f32.mrb[20].mxu1 }
 0xc38   : > { %v1211_v45 = vadd.f32 %v1205_v43, %v994_v31  ;;  %v1506_v46 = vpop.f32.mrb[21].mxu1 }
 0xc39   : > { %v1208_v47 = vpop.f32.mrb[22].mxu1 }
 0xc3a   : > { %v1219_v48 = vadd.f32 %v1397_v44, %v1211_v45  ;;  %v1507_v49 = vpop.f32.mrb[23].mxu1 }
 0xc3c   : > { %1588 = vtanh.f32 %v1219_v48 }
 0xc46   : > { %v1589_v50 = vpop.eup %1588 }
 0xc47   : > { %v1221_v1 = vpack.c.bf16 %v1589_v50, %v1589_v50 }
 0xc49   : > { %1513 = vmatmul.mubr.msk.bf16.vlgmr.msra.gmra.mrb[16].mxu0 %vm300_vm1, %v1221_v1 }
 0xd1c   : > { %v1282_v52 = vpop.f32.mrb[16].mxu0 }
 0xd1d   : > { %v1283_v53 = vadd.f32 %v1398_v51, %v1282_v52  ;;  %v1514_v54 = vpop.f32.mrb[17].mxu0 }
 0xd1e   : > { %v1285_v55 = vpop.f32.mrb[18].mxu0 }
 0xd1f   : > { %1590 = vtanh.f32 %v1283_v53  ;;  %v1515_v56 = vpop.f32.mrb[19].mxu0 }
 0xd29   : > { %v1591_v57 = vpop.eup %1590 }
 0xd2a   : > { %1290 = vst.msk [vmem:[%s269_s9] sm:$0xf] %vm1289_vm6, %v1591_v57 }
 0xd2b   : > { %1605 = shalt.err (!%p1602_p3)
}
 0xd2c   : > { %s1606_s21 = scalar_lea.hbm %s1896_s16, 64  ;;  %s1610_s29 = scalar_lea.hbm %s1945_s7, 128 }
 0xd2d   : > { %p1607_p4 = scmp.ne.s32.totalorder %s1896_s16, %s1606_s21  ;;  %p1611_p9 = scmp.lt.u32.totalorder %s1896_s16, %s1945_s7 }
 0xd2e   : > { %p1612_p10 = scmp.lt.u32.totalorder %s1610_s29, %s1606_s21  ;;  %p1614_p12 = scmp.lt.u32.totalorder %s1606_s21, %s1896_s16 }
 0xd2f   : > { %p1608_p7 = pnand %p1607_p4, %p1748_p5 }
 0xd30   : > { %p1613_p11 = por %p1612_p10, %p1611_p9 }
 0xd31   : > { %p1609_p8 = pneg %p1608_p7 }
 0xd32   : > { %p1615_p13 = por %p1614_p12, %p1613_p11 }
 0xd34   : > { %p1616_p0 = pnand %p1615_p13, %p1609_p8 }
 0xd36   : > { %1619 = shalt.err (!%p1616_p0)
}
 0xd37   : > { %1516 = dma.vmem_to_hbm [thread:$0]  (%p1748_p5), %s1898_s13, 64, %s1896_s16, %s1292_s17  }
 0xd38 PF: > { %p1522_p1 = scmp.ge.s32.totalorder %s1654_s27, 2  ;;  %s1317_s14 = sand.u32 1, %s1642_s24  }
 0xd39   : > { %s1318_s15 = scalar_lea.sflag [#allocation3], %s1317_s14 }
 0xd3a   : > { %p1519_p2 = pnand %p1522_p1, %p1752_p6 }
 0xd3c   : > { %1637 = dma.done.wait (!%p1519_p2), %s1318_s15, 64  }
 0xd3d   : > { %1639 = vsyncadd (!%p1519_p2), %s1318_s15, 4294967232  ;;  %p17_p3 = scmp.ge.s32.totalorder %s1735_s30, 4   ;;  %s1948_s24 = smov %s1646_s25 }
 0xd3e   : > { %s1949_s25 = smov %s1650_s26  ;;  %s1950_s26 = smov %s1746_s10 }
 0xd3f   : > { %s1951_s27 = smov %s1735_s30  ;;  %19 = sbr.rel (!%p17_p3) target bundleno = 3 (0x3), region = 86 }
 0xd46   :  { %1323 = vsyncpa [#allocation3], 1 }
 0xd47   :  { %1325 = vsyncpa [#allocation3 + $0x1], 1 }

</bundles_post_ra>
